<compile_context>
chip_gen: v5e
topology: v5e:2x2
jax: 0.10.0
libtpu: 0.0.40
codegen_flags: <defaults>
</compile_context>

<pallas_src>
import jax
import jax.numpy as jnp
from jax import lax
from jax.experimental import pallas as pl
from jax.experimental.pallas import tpu as pltpu

BN_EPS = 1e-5


# ----------------------------------------------------------------------------
# Fused double-conv kernel factory
# ----------------------------------------------------------------------------
def _make_kernel(c_out, cin_p, h, w, b_blk):
    """Fused conv-bn-relu-conv-bn-relu kernel for fixed H, W and batch block."""
    hp, wp = h + 2, w + 2
    lp = hp * wp                        # flat length of one zero-padded image
    mout = b_blk * lp - 2 * wp          # flat output length per batch block
    lflat = b_blk * lp + 2              # flat padded-input length (+2 keeps every tap slice in bounds)
    start = wp + 1                      # flat offset of pixel (0,0) inside a padded image
    offs = tuple(dy * wp + dx for dy in range(3) for dx in range(3))

    def kernel(x_ref, w1_ref, w2_ref, s1_ref, b1_ref, s2_ref, b2_ref, mask_ref,
               o_ref, h_ref, k1_ref, k2_ref):
        # Zero only the pad border of the intermediate scratch (tiny); the
        # interior [start, start+mout) is fully overwritten below.  Done per
        # step so the grid axis can safely stay "parallel".
        h_ref[:, :start] = jnp.zeros((c_out, start), jnp.bfloat16)
        h_ref[:, start + mout:] = jnp.zeros((c_out, lflat - start - mout),
                                            jnp.bfloat16)

        # ---- conv1: stack the 9 shifted taps along K -> ONE MXU matmul ----
        for t, off in enumerate(offs):
            k1_ref[t * cin_p:(t + 1) * cin_p, :] = x_ref[0, :, off:off + mout]
        acc1 = jnp.dot(w1_ref[...], k1_ref[...],
                       preferred_element_type=jnp.float32)
        h1 = jnp.maximum(acc1 * s1_ref[...] + b1_ref[...], 0.0)   # folded BN + ReLU

        # Stage the zero-padded intermediate in VMEM (bf16, no HBM round trip).
        # Masked zeros (right-pad columns / junk gap rows) double as the zero
        # pad of the neighbouring padded rows / stacked images.
        h_ref[:, start:start + mout] = (h1 * mask_ref[...]).astype(jnp.bfloat16)

        # ---- conv2: same stacked-K single MXU matmul over the bf16 scratch ----
        for t, off in enumerate(offs):
            k2_ref[t * c_out:(t + 1) * c_out, :] = h_ref[:, off:off + mout]
        acc2 = jnp.dot(w2_ref[...], k2_ref[...],
                       preferred_element_type=jnp.float32)
        o_ref[0] = jnp.maximum(acc2 * s2_ref[...] + b2_ref[...], 0.0)

    return kernel, mout, lflat


def _vmem_limit_bytes(cin_p, c_out, mout, lflat):
    """Derive a VMEM budget from the actual block/scratch footprint."""
    wbytes = c_out * 9 * cin_p * 2 + c_out * 9 * c_out * 2 + 4 * c_out * 4
    est = (2 * cin_p * lflat * 2          # input block, bf16, double-buffered
           + 2 * c_out * mout * 4         # output block, f32, double-buffered
           + 2 * (wbytes + mout * 4)      # weights + affine + mask
           + c_out * lflat * 2            # bf16 padded intermediate scratch
           + 9 * cin_p * mout * 2         # stacked-K operand, conv1
           + 9 * c_out * mout * 2)        # stacked-K operand, conv2
    # TODO(synk): at real UNet resolutions, tile H so this stays under v7x's 64 MiB.
    return int(min(64 * 1024 * 1024, max(8 * 1024 * 1024, 2 * est)))


# ----------------------------------------------------------------------------
# Public wrapper (NCHW in / NCHW out, like the PyTorch module)
# ----------------------------------------------------------------------------
def unet_conv(x_nchw, params, *, b_blk=None):
    """UNetConv forward: x (N, C_in, H, W) f32 -> (N, C_out, H, W) f32."""
    (w1m, s1, b1), (w2m, s2, b2) = params     # w*m: (C_out, 9*C) bf16, tap-major K
    n, c_in, h, w = x_nchw.shape
    c_out, k1w = w1m.shape
    cin_p = k1w // 9
    assert c_out % 16 == 0 and cin_p % 16 == 0, "channel counts must be 16-aligned"
    hp, wp = h + 2, w + 2
    lp = hp * wp

    # Fold the batch into the lane axis: B_blk padded images stacked along the
    # flattened padded-row axis per grid step (one step for the tiny test batch).
    if b_blk is None:
        b_blk = min(n, 8)
    n_pad = -(-n // b_blk) * b_blk
    n_blk = n_pad // b_blk

    kernel, mout, lflat = _make_kernel(c_out, cin_p, h, w, b_blk)

    # Layout plumbing (XLA, bf16 throughout): pad batch/channels, pad spatially,
    # stack B_blk images along the flattened padded-row axis, append 2 zeros so
    # every tap slice stays in bounds.
    x = x_nchw.astype(jnp.bfloat16)
    x = jnp.pad(x, ((0, n_pad - n), (0, cin_p - c_in), (1, 1), (1, 1)))
    x = x.reshape(n_blk, b_blk, cin_p, lp).transpose(0, 2, 1, 3)
    x = x.reshape(n_blk, cin_p, b_blk * lp)
    x = jnp.pad(x, ((0, 0), (0, 0), (0, lflat - b_blk * lp)))

    # Valid-pixel mask: flat position q is a real pixel iff (q mod Wp) < W and
    # ((q div Wp) mod Hp) < H (the latter kills the junk gap rows between
    # stacked images).  Tiny (1, mout) f32 replicated input.
    q = jnp.arange(mout, dtype=jnp.int32)
    mask = (((q % wp) < w) & (((q // wp) % hp) < h)).astype(jnp.float32)
    mask = mask.reshape(1, mout)

    def rep(a):
        r = a.ndim
        return pl.BlockSpec(a.shape, lambda i, _r=r: (0,) * _r)

    out = pl.pallas_call(
        kernel,
        grid=(n_blk,),
        in_specs=[
            pl.BlockSpec((1, cin_p, lflat), lambda i: (i, 0, 0)),
            rep(w1m), rep(w2m), rep(s1), rep(b1), rep(s2), rep(b2), rep(mask),
        ],
        out_specs=pl.BlockSpec((1, c_out, mout), lambda i: (i, 0, 0)),
        out_shape=jax.ShapeDtypeStruct((n_blk, c_out, mout), jnp.float32),
        scratch_shapes=[
            pltpu.VMEM((c_out, lflat), jnp.bfloat16),      # padded intermediate (bf16)
            pltpu.VMEM((9 * cin_p, mout), jnp.bfloat16),   # stacked-K operand, conv1
            pltpu.VMEM((9 * c_out, mout), jnp.bfloat16),   # stacked-K operand, conv2
        ],
        compiler_params=pltpu.CompilerParams(
            dimension_semantics=("parallel",),
            vmem_limit_bytes=_vmem_limit_bytes(cin_p, c_out, mout, lflat)),
    )(x, w1m, w2m, s1, b1, s2, b2, mask)

    # Unstack: pad the flat axis back to B_blk*Lp, split (image, row, col),
    # drop the pad/junk rows and columns.
    out = jnp.pad(out, ((0, 0), (0, 0), (0, b_blk * lp - mout)))
    out = out.reshape(n_blk, c_out, b_blk, hp, wp).transpose(0, 2, 1, 3, 4)
    out = out.reshape(n_pad, c_out, hp, wp)
    return out[:n, :, :h, :w]


# ----------------------------------------------------------------------------
# Parameter init (deterministic) + pure-JAX reference
# ----------------------------------------------------------------------------
def init_unet_conv_params(key, c_in, c_out):
    """Conv2d(3x3, bias=False) + BatchNorm2d folded (eval mode).  Returns
    (kernel_params, reference_params)."""
    # TODO(synk): training-mode BatchNorm (batch statistics + running-stat
    # momentum update) is not implemented; eval-mode folded scale/bias only.
    assert c_out % 16 == 0, "kernel assumes C_out is a multiple of 16"
    cin_p = ((c_in + 15) // 16) * 16

    def one(k, ci, ci_pad, co):
        kw, kg, kb, km, kv = jax.random.split(k, 5)
        wgt = jax.random.normal(kw, (co, ci, 3, 3), jnp.float32) / jnp.sqrt(9.0 * ci)
        gamma = 1.0 + 0.1 * jax.random.normal(kg, (co,), jnp.float32)
        beta = 0.1 * jax.random.normal(kb, (co,), jnp.float32)
        mean = 0.1 * jax.random.normal(km, (co,), jnp.float32)
        var = 1.0 + 0.1 * jax.random.uniform(kv, (co,), jnp.float32)
        scale = gamma / jnp.sqrt(var + BN_EPS)        # eval-mode BN fold
        bias = beta - mean * scale
        # torch (co, ci, ky, kx) -> merged-K layout (co, 9*ci_pad); K row
        # t*ci_pad + c holds tap t = ky*3+kx, input channel c (zero-padded).
        w_pad = jnp.pad(wgt, ((0, 0), (0, ci_pad - ci), (0, 0), (0, 0)))
        w_m = jnp.transpose(w_pad, (2, 3, 1, 0)).reshape(9 * ci_pad, co).T
        return ((w_m.astype(jnp.bfloat16),
                 scale.reshape(co, 1), bias.reshape(co, 1)),
                (wgt, scale, bias))

    k1, k2 = jax.random.split(key)
    p1, r1 = one(k1, c_in, cin_p, c_out)
    p2, r2 = one(k2, c_out, c_out, c_out)
    return (p1, p2), (r1, r2)


def unet_conv_reference(x, ref_params):
    """Pure-JAX reference with the same bf16 operand rounding as the kernel."""
    def block(xv, wgt, scale, bias):
        y = lax.conv_general_dilated(
            xv.astype(jnp.bfloat16), wgt.astype(jnp.bfloat16),
            window_strides=(1, 1), padding=((1, 1), (1, 1)),
            dimension_numbers=("NCHW", "OIHW", "NCHW"),
            preferred_element_type=jnp.float32)
        y = y * scale.reshape(1, -1, 1, 1) + bias.reshape(1, -1, 1, 1)
        return jnp.maximum(y, 0.0)

    (w1, s1, b1), (w2, s2, b2) = ref_params
    return block(block(x, w1, s1, b1), w2, s2, b2)


# ----------------------------------------------------------------------------
if __name__ == "__main__":
    key = jax.random.PRNGKey(0)
    kx, kp = jax.random.split(key)

    N, C_IN, C_OUT, H, W = 2, 4, 32, 16, 16
    x = jax.random.normal(kx, (N, C_IN, H, W), jnp.float32)
    kernel_params, ref_params = init_unet_conv_params(kp, C_IN, C_OUT)

    y = jax.jit(unet_conv)(x, kernel_params)
    y = jax.block_until_ready(y)

    assert y.shape == (N, C_OUT, H, W), y.shape
    assert bool(jnp.all(jnp.isfinite(y)))

    y_ref = unet_conv_reference(x, ref_params)
    max_err = float(jnp.max(jnp.abs(y - y_ref)))
    assert max_err < 5e-2, f"max abs err vs reference: {max_err}"

    print("KERNEL_OK")
</pallas_src>

<mosaic_0001>
module attributes {stable_mosaic.version = 11 : i64} {
  func.func @kernel(%arg0: i32, %arg1: memref<1x16x650xbf16, #tpu.memory_space<vmem>>, %arg2: memref<32x144xbf16, #tpu.memory_space<vmem>>, %arg3: memref<32x288xbf16, #tpu.memory_space<vmem>>, %arg4: memref<32x1xf32, #tpu.memory_space<vmem>>, %arg5: memref<32x1xf32, #tpu.memory_space<vmem>>, %arg6: memref<32x1xf32, #tpu.memory_space<vmem>>, %arg7: memref<32x1xf32, #tpu.memory_space<vmem>>, %arg8: memref<1x612xf32, #tpu.memory_space<vmem>>, %arg9: memref<1x32x612xf32, #tpu.memory_space<vmem>>, %arg10: memref<32x650xbf16, #tpu.memory_space<vmem>>, %arg11: memref<144x612xbf16, #tpu.memory_space<vmem>>, %arg12: memref<288x612xbf16, #tpu.memory_space<vmem>>) attributes {dimension_semantics = [#tpu.dimension_semantics<parallel>], iteration_bounds = array<i64: 1>, scalar_prefetch = 0 : i64, scratch_operands = 3 : i64, tpu.core_type = #tpu.core_type<tc>, window_params = [{transform_indices = @transform_0, window_bounds = array<i64: 1, 16, 650>}, {pipeline_mode = #tpu.pipeline_mode<synchronous>, transform_indices = @transform_1, window_bounds = array<i64: 32, 144>}, {pipeline_mode = #tpu.pipeline_mode<synchronous>, transform_indices = @transform_2, window_bounds = array<i64: 32, 288>}, {pipeline_mode = #tpu.pipeline_mode<synchronous>, transform_indices = @transform_3, window_bounds = array<i64: 32, 1>}, {pipeline_mode = #tpu.pipeline_mode<synchronous>, transform_indices = @transform_4, window_bounds = array<i64: 32, 1>}, {pipeline_mode = #tpu.pipeline_mode<synchronous>, transform_indices = @transform_5, window_bounds = array<i64: 32, 1>}, {pipeline_mode = #tpu.pipeline_mode<synchronous>, transform_indices = @transform_6, window_bounds = array<i64: 32, 1>}, {pipeline_mode = #tpu.pipeline_mode<synchronous>, transform_indices = @transform_7, window_bounds = array<i64: 1, 612>}, {transform_indices = @transform_8, window_bounds = array<i64: 1, 32, 612>}]} {
    %cst = arith.constant 0.000000e+00 : bf16
    %0 = vector.broadcast %cst : bf16 to vector<32x19xbf16>
    %c0 = arith.constant 0 : index
    %c0_0 = arith.constant 0 : index
    %1 = vector.load %arg10[%c0, %c0_0] : memref<32x650xbf16, #tpu.memory_space<vmem>>, vector<32x19xbf16>
    tpu.vector_store %arg10[%c0, %c0_0], %0 {strides = array<i32>} : memref<32x650xbf16, #tpu.memory_space<vmem>>, vector<32x19xbf16>,
    %cst_1 = arith.constant 0.000000e+00 : bf16
    %2 = vector.broadcast %cst_1 : bf16 to vector<32x19xbf16>
    %c0_2 = arith.constant 0 : index
    %c631 = arith.constant 631 : index
    %3 = vector.load %arg10[%c0_2, %c631] : memref<32x650xbf16, #tpu.memory_space<vmem>>, vector<32x19xbf16>
    tpu.vector_store %arg10[%c0_2, %c631], %2 {strides = array<i32>} : memref<32x650xbf16, #tpu.memory_space<vmem>>, vector<32x19xbf16>,
    %c0_3 = arith.constant 0 : index
    %c0_4 = arith.constant 0 : index
    %c0_5 = arith.constant 0 : index
    %4 = vector.load %arg1[%c0_3, %c0_4, %c0_5] : memref<1x16x650xbf16, #tpu.memory_space<vmem>>, vector<1x16x612xbf16>
    %5 = vector.shape_cast %4 : vector<1x16x612xbf16> to vector<16x612xbf16>
    %c0_6 = arith.constant 0 : index
    %c0_7 = arith.constant 0 : index
    %6 = vector.load %arg11[%c0_6, %c0_7] : memref<144x612xbf16, #tpu.memory_space<vmem>>, vector<16x612xbf16>
    tpu.vector_store %arg11[%c0_6, %c0_7], %5 {strides = array<i32>} : memref<144x612xbf16, #tpu.memory_space<vmem>>, vector<16x612xbf16>,
    %c0_8 = arith.constant 0 : index
    %c0_9 = arith.constant 0 : index
    %c1 = arith.constant 1 : index
    %7 = vector.load %arg1[%c0_8, %c0_9, %c1] : memref<1x16x650xbf16, #tpu.memory_space<vmem>>, vector<1x16x612xbf16>
    %8 = vector.shape_cast %7 : vector<1x16x612xbf16> to vector<16x612xbf16>
    %c16 = arith.constant 16 : index
    %c0_10 = arith.constant 0 : index
    %9 = vector.load %arg11[%c16, %c0_10] : memref<144x612xbf16, #tpu.memory_space<vmem>>, vector<16x612xbf16>
    tpu.vector_store %arg11[%c16, %c0_10], %8 {strides = array<i32>} : memref<144x612xbf16, #tpu.memory_space<vmem>>, vector<16x612xbf16>,
    %c0_11 = arith.constant 0 : index
    %c0_12 = arith.constant 0 : index
    %c2 = arith.constant 2 : index
    %10 = vector.load %arg1[%c0_11, %c0_12, %c2] : memref<1x16x650xbf16, #tpu.memory_space<vmem>>, vector<1x16x612xbf16>
    %11 = vector.shape_cast %10 : vector<1x16x612xbf16> to vector<16x612xbf16>
    %c32 = arith.constant 32 : index
    %c0_13 = arith.constant 0 : index
    %12 = vector.load %arg11[%c32, %c0_13] : memref<144x612xbf16, #tpu.memory_space<vmem>>, vector<16x612xbf16>
    tpu.vector_store %arg11[%c32, %c0_13], %11 {strides = array<i32>} : memref<144x612xbf16, #tpu.memory_space<vmem>>, vector<16x612xbf16>,
    %c0_14 = arith.constant 0 : index
    %c0_15 = arith.constant 0 : index
    %c18 = arith.constant 18 : index
    %13 = vector.load %arg1[%c0_14, %c0_15, %c18] : memref<1x16x650xbf16, #tpu.memory_space<vmem>>, vector<1x16x612xbf16>
    %14 = vector.shape_cast %13 : vector<1x16x612xbf16> to vector<16x612xbf16>
    %c48 = arith.constant 48 : index
    %c0_16 = arith.constant 0 : index
    %15 = vector.load %arg11[%c48, %c0_16] : memref<144x612xbf16, #tpu.memory_space<vmem>>, vector<16x612xbf16>
    tpu.vector_store %arg11[%c48, %c0_16], %14 {strides = array<i32>} : memref<144x612xbf16, #tpu.memory_space<vmem>>, vector<16x612xbf16>,
    %c0_17 = arith.constant 0 : index
    %c0_18 = arith.constant 0 : index
    %c19 = arith.constant 19 : index
    %16 = vector.load %arg1[%c0_17, %c0_18, %c19] : memref<1x16x650xbf16, #tpu.memory_space<vmem>>, vector<1x16x612xbf16>
    %17 = vector.shape_cast %16 : vector<1x16x612xbf16> to vector<16x612xbf16>
    %c64 = arith.constant 64 : index
    %c0_19 = arith.constant 0 : index
    %18 = vector.load %arg11[%c64, %c0_19] : memref<144x612xbf16, #tpu.memory_space<vmem>>, vector<16x612xbf16>
    tpu.vector_store %arg11[%c64, %c0_19], %17 {strides = array<i32>} : memref<144x612xbf16, #tpu.memory_space<vmem>>, vector<16x612xbf16>,
    %c0_20 = arith.constant 0 : index
    %c0_21 = arith.constant 0 : index
    %c20 = arith.constant 20 : index
    %19 = vector.load %arg1[%c0_20, %c0_21, %c20] : memref<1x16x650xbf16, #tpu.memory_space<vmem>>, vector<1x16x612xbf16>
    %20 = vector.shape_cast %19 : vector<1x16x612xbf16> to vector<16x612xbf16>
    %c80 = arith.constant 80 : index
    %c0_22 = arith.constant 0 : index
    %21 = vector.load %arg11[%c80, %c0_22] : memref<144x612xbf16, #tpu.memory_space<vmem>>, vector<16x612xbf16>
    tpu.vector_store %arg11[%c80, %c0_22], %20 {strides = array<i32>} : memref<144x612xbf16, #tpu.memory_space<vmem>>, vector<16x612xbf16>,
    %c0_23 = arith.constant 0 : index
    %c0_24 = arith.constant 0 : index
    %c36 = arith.constant 36 : index
    %22 = vector.load %arg1[%c0_23, %c0_24, %c36] : memref<1x16x650xbf16, #tpu.memory_space<vmem>>, vector<1x16x612xbf16>
    %23 = vector.shape_cast %22 : vector<1x16x612xbf16> to vector<16x612xbf16>
    %c96 = arith.constant 96 : index
    %c0_25 = arith.constant 0 : index
    %24 = vector.load %arg11[%c96, %c0_25] : memref<144x612xbf16, #tpu.memory_space<vmem>>, vector<16x612xbf16>
    tpu.vector_store %arg11[%c96, %c0_25], %23 {strides = array<i32>} : memref<144x612xbf16, #tpu.memory_space<vmem>>, vector<16x612xbf16>,
    %c0_26 = arith.constant 0 : index
    %c0_27 = arith.constant 0 : index
    %c37 = arith.constant 37 : index
    %25 = vector.load %arg1[%c0_26, %c0_27, %c37] : memref<1x16x650xbf16, #tpu.memory_space<vmem>>, vector<1x16x612xbf16>
    %26 = vector.shape_cast %25 : vector<1x16x612xbf16> to vector<16x612xbf16>
    %c112 = arith.constant 112 : index
    %c0_28 = arith.constant 0 : index
    %27 = vector.load %arg11[%c112, %c0_28] : memref<144x612xbf16, #tpu.memory_space<vmem>>, vector<16x612xbf16>
    tpu.vector_store %arg11[%c112, %c0_28], %26 {strides = array<i32>} : memref<144x612xbf16, #tpu.memory_space<vmem>>, vector<16x612xbf16>,
    %c0_29 = arith.constant 0 : index
    %c0_30 = arith.constant 0 : index
    %c38 = arith.constant 38 : index
    %28 = vector.load %arg1[%c0_29, %c0_30, %c38] : memref<1x16x650xbf16, #tpu.memory_space<vmem>>, vector<1x16x612xbf16>
    %29 = vector.shape_cast %28 : vector<1x16x612xbf16> to vector<16x612xbf16>
    %c128 = arith.constant 128 : index
    %c0_31 = arith.constant 0 : index
    %30 = vector.load %arg11[%c128, %c0_31] : memref<144x612xbf16, #tpu.memory_space<vmem>>, vector<16x612xbf16>
    tpu.vector_store %arg11[%c128, %c0_31], %29 {strides = array<i32>} : memref<144x612xbf16, #tpu.memory_space<vmem>>, vector<16x612xbf16>,
    %c0_32 = arith.constant 0 : index
    %c0_33 = arith.constant 0 : index
    %31 = vector.load %arg2[%c0_32, %c0_33] : memref<32x144xbf16, #tpu.memory_space<vmem>>, vector<32x144xbf16>
    %c0_34 = arith.constant 0 : index
    %c0_35 = arith.constant 0 : index
    %32 = vector.load %arg11[%c0_34, %c0_35] : memref<144x612xbf16, #tpu.memory_space<vmem>>, vector<144x612xbf16>
    %cst_36 = arith.constant dense<0.000000e+00> : vector<32x612xf32>
    %33 = tpu.matmul %31, %32, %cst_36 {dimension_numbers = #tpu.dot_dimension_numbers<[1], [0], [0], [1], [0, 0, 1, 1], [], []>} : vector<32x144xbf16>, vector<144x612xbf16>, vector<32x612xf32> -> vector<32x612xf32>
    %c0_37 = arith.constant 0 : index
    %c0_38 = arith.constant 0 : index
    %34 = vector.load %arg4[%c0_37, %c0_38] : memref<32x1xf32, #tpu.memory_space<vmem>>, vector<32x1xf32>
    %35 = vector.broadcast %34 : vector<32x1xf32> to vector<32x612xf32>
    %36 = arith.mulf %33, %35 : vector<32x612xf32>
    %c0_39 = arith.constant 0 : index
    %c0_40 = arith.constant 0 : index
    %37 = vector.load %arg5[%c0_39, %c0_40] : memref<32x1xf32, #tpu.memory_space<vmem>>, vector<32x1xf32>
    %38 = vector.broadcast %37 : vector<32x1xf32> to vector<32x612xf32>
    %39 = arith.addf %36, %38 : vector<32x612xf32>
    %cst_41 = arith.constant 0.000000e+00 : f32
    %40 = vector.broadcast %cst_41 : f32 to vector<32x612xf32>
    %41 = arith.maximumf %39, %40 : vector<32x612xf32>
    %c0_42 = arith.constant 0 : index
    %c0_43 = arith.constant 0 : index
    %42 = vector.load %arg8[%c0_42, %c0_43] : memref<1x612xf32, #tpu.memory_space<vmem>>, vector<1x612xf32>
    %43 = vector.broadcast %42 : vector<1x612xf32> to vector<32x612xf32>
    %44 = arith.mulf %41, %43 : vector<32x612xf32>
    %45 = arith.truncf %44 : vector<32x612xf32> to vector<32x612xbf16>
    %c0_44 = arith.constant 0 : index
    %c19_45 = arith.constant 19 : index
    %46 = vector.load %arg10[%c0_44, %c19_45] : memref<32x650xbf16, #tpu.memory_space<vmem>>, vector<32x612xbf16>
    tpu.vector_store %arg10[%c0_44, %c19_45], %45 {strides = array<i32>} : memref<32x650xbf16, #tpu.memory_space<vmem>>, vector<32x612xbf16>,
    %c0_46 = arith.constant 0 : index
    %c0_47 = arith.constant 0 : index
    %47 = vector.load %arg10[%c0_46, %c0_47] : memref<32x650xbf16, #tpu.memory_space<vmem>>, vector<32x612xbf16>
    %c0_48 = arith.constant 0 : index
    %c0_49 = arith.constant 0 : index
    %48 = vector.load %arg12[%c0_48, %c0_49] : memref<288x612xbf16, #tpu.memory_space<vmem>>, vector<32x612xbf16>
    tpu.vector_store %arg12[%c0_48, %c0_49], %47 {strides = array<i32>} : memref<288x612xbf16, #tpu.memory_space<vmem>>, vector<32x612xbf16>,
    %c0_50 = arith.constant 0 : index
    %c1_51 = arith.constant 1 : index
    %49 = vector.load %arg10[%c0_50, %c1_51] : memref<32x650xbf16, #tpu.memory_space<vmem>>, vector<32x612xbf16>
    %c32_52 = arith.constant 32 : index
    %c0_53 = arith.constant 0 : index
    %50 = vector.load %arg12[%c32_52, %c0_53] : memref<288x612xbf16, #tpu.memory_space<vmem>>, vector<32x612xbf16>
    tpu.vector_store %arg12[%c32_52, %c0_53], %49 {strides = array<i32>} : memref<288x612xbf16, #tpu.memory_space<vmem>>, vector<32x612xbf16>,
    %c0_54 = arith.constant 0 : index
    %c2_55 = arith.constant 2 : index
    %51 = vector.load %arg10[%c0_54, %c2_55] : memref<32x650xbf16, #tpu.memory_space<vmem>>, vector<32x612xbf16>
    %c64_56 = arith.constant 64 : index
    %c0_57 = arith.constant 0 : index
    %52 = vector.load %arg12[%c64_56, %c0_57] : memref<288x612xbf16, #tpu.memory_space<vmem>>, vector<32x612xbf16>
    tpu.vector_store %arg12[%c64_56, %c0_57], %51 {strides = array<i32>} : memref<288x612xbf16, #tpu.memory_space<vmem>>, vector<32x612xbf16>,
    %c0_58 = arith.constant 0 : index
    %c18_59 = arith.constant 18 : index
    %53 = vector.load %arg10[%c0_58, %c18_59] : memref<32x650xbf16, #tpu.memory_space<vmem>>, vector<32x612xbf16>
    %c96_60 = arith.constant 96 : index
    %c0_61 = arith.constant 0 : index
    %54 = vector.load %arg12[%c96_60, %c0_61] : memref<288x612xbf16, #tpu.memory_space<vmem>>, vector<32x612xbf16>
    tpu.vector_store %arg12[%c96_60, %c0_61], %53 {strides = array<i32>} : memref<288x612xbf16, #tpu.memory_space<vmem>>, vector<32x612xbf16>,
    %c0_62 = arith.constant 0 : index
    %c19_63 = arith.constant 19 : index
    %55 = vector.load %arg10[%c0_62, %c19_63] : memref<32x650xbf16, #tpu.memory_space<vmem>>, vector<32x612xbf16>
    %c128_64 = arith.constant 128 : index
    %c0_65 = arith.constant 0 : index
    %56 = vector.load %arg12[%c128_64, %c0_65] : memref<288x612xbf16, #tpu.memory_space<vmem>>, vector<32x612xbf16>
    tpu.vector_store %arg12[%c128_64, %c0_65], %55 {strides = array<i32>} : memref<288x612xbf16, #tpu.memory_space<vmem>>, vector<32x612xbf16>,
    %c0_66 = arith.constant 0 : index
    %c20_67 = arith.constant 20 : index
    %57 = vector.load %arg10[%c0_66, %c20_67] : memref<32x650xbf16, #tpu.memory_space<vmem>>, vector<32x612xbf16>
    %c160 = arith.constant 160 : index
    %c0_68 = arith.constant 0 : index
    %58 = vector.load %arg12[%c160, %c0_68] : memref<288x612xbf16, #tpu.memory_space<vmem>>, vector<32x612xbf16>
    tpu.vector_store %arg12[%c160, %c0_68], %57 {strides = array<i32>} : memref<288x612xbf16, #tpu.memory_space<vmem>>, vector<32x612xbf16>,
    %c0_69 = arith.constant 0 : index
    %c36_70 = arith.constant 36 : index
    %59 = vector.load %arg10[%c0_69, %c36_70] : memref<32x650xbf16, #tpu.memory_space<vmem>>, vector<32x612xbf16>
    %c192 = arith.constant 192 : index
    %c0_71 = arith.constant 0 : index
    %60 = vector.load %arg12[%c192, %c0_71] : memref<288x612xbf16, #tpu.memory_space<vmem>>, vector<32x612xbf16>
    tpu.vector_store %arg12[%c192, %c0_71], %59 {strides = array<i32>} : memref<288x612xbf16, #tpu.memory_space<vmem>>, vector<32x612xbf16>,
    %c0_72 = arith.constant 0 : index
    %c37_73 = arith.constant 37 : index
    %61 = vector.load %arg10[%c0_72, %c37_73] : memref<32x650xbf16, #tpu.memory_space<vmem>>, vector<32x612xbf16>
    %c224 = arith.constant 224 : index
    %c0_74 = arith.constant 0 : index
    %62 = vector.load %arg12[%c224, %c0_74] : memref<288x612xbf16, #tpu.memory_space<vmem>>, vector<32x612xbf16>
    tpu.vector_store %arg12[%c224, %c0_74], %61 {strides = array<i32>} : memref<288x612xbf16, #tpu.memory_space<vmem>>, vector<32x612xbf16>,
    %c0_75 = arith.constant 0 : index
    %c38_76 = arith.constant 38 : index
    %63 = vector.load %arg10[%c0_75, %c38_76] : memref<32x650xbf16, #tpu.memory_space<vmem>>, vector<32x612xbf16>
    %c256 = arith.constant 256 : index
    %c0_77 = arith.constant 0 : index
    %64 = vector.load %arg12[%c256, %c0_77] : memref<288x612xbf16, #tpu.memory_space<vmem>>, vector<32x612xbf16>
    tpu.vector_store %arg12[%c256, %c0_77], %63 {strides = array<i32>} : memref<288x612xbf16, #tpu.memory_space<vmem>>, vector<32x612xbf16>,
    %c0_78 = arith.constant 0 : index
    %c0_79 = arith.constant 0 : index
    %65 = vector.load %arg3[%c0_78, %c0_79] : memref<32x288xbf16, #tpu.memory_space<vmem>>, vector<32x288xbf16>
    %c0_80 = arith.constant 0 : index
    %c0_81 = arith.constant 0 : index
    %66 = vector.load %arg12[%c0_80, %c0_81] : memref<288x612xbf16, #tpu.memory_space<vmem>>, vector<288x612xbf16>
    %cst_82 = arith.constant dense<0.000000e+00> : vector<32x612xf32>
    %67 = tpu.matmul %65, %66, %cst_82 {dimension_numbers = #tpu.dot_dimension_numbers<[1], [0], [0], [1], [0, 0, 1, 1], [], []>} : vector<32x288xbf16>, vector<288x612xbf16>, vector<32x612xf32> -> vector<32x612xf32>
    %c0_83 = arith.constant 0 : index
    %c0_84 = arith.constant 0 : index
    %68 = vector.load %arg6[%c0_83, %c0_84] : memref<32x1xf32, #tpu.memory_space<vmem>>, vector<32x1xf32>
    %69 = vector.broadcast %68 : vector<32x1xf32> to vector<32x612xf32>
    %70 = arith.mulf %67, %69 : vector<32x612xf32>
    %c0_85 = arith.constant 0 : index
    %c0_86 = arith.constant 0 : index
    %71 = vector.load %arg7[%c0_85, %c0_86] : memref<32x1xf32, #tpu.memory_space<vmem>>, vector<32x1xf32>
    %72 = vector.broadcast %71 : vector<32x1xf32> to vector<32x612xf32>
    %73 = arith.addf %70, %72 : vector<32x612xf32>
    %cst_87 = arith.constant 0.000000e+00 : f32
    %74 = vector.broadcast %cst_87 : f32 to vector<32x612xf32>
    %75 = arith.maximumf %73, %74 : vector<32x612xf32>
    %c0_88 = arith.constant 0 : index
    %c0_89 = arith.constant 0 : index
    %c0_90 = arith.constant 0 : index
    %76 = vector.load %arg9[%c0_88, %c0_89, %c0_90] : memref<1x32x612xf32, #tpu.memory_space<vmem>>, vector<1x32x612xf32>
    %77 = vector.shape_cast %76 : vector<1x32x612xf32> to vector<32x612xf32>
    %78 = vector.shape_cast %75 : vector<32x612xf32> to vector<1x32x612xf32>
    tpu.vector_store %arg9[%c0_88, %c0_89, %c0_90], %78 {strides = array<i32>} : memref<1x32x612xf32, #tpu.memory_space<vmem>>, vector<1x32x612xf32>,
    return
  }
  func.func @transform_0(%arg0: i32) -> (i32, i32, i32) {
    %c0_i32 = arith.constant 0 : i32
    %c0_i32_0 = arith.constant 0 : i32
    %c0_i32_1 = arith.constant 0 : i32
    return %arg0, %c0_i32, %c0_i32_0 : i32, i32, i32
  }
  func.func @transform_1(%arg0: i32) -> (i32, i32) {
    %c0_i32 = arith.constant 0 : i32
    %c0_i32_0 = arith.constant 0 : i32
    %c0_i32_1 = arith.constant 0 : i32
    return %c0_i32, %c0_i32_0 : i32, i32
  }
  func.func @transform_2(%arg0: i32) -> (i32, i32) {
    %c0_i32 = arith.constant 0 : i32
    %c0_i32_0 = arith.constant 0 : i32
    %c0_i32_1 = arith.constant 0 : i32
    return %c0_i32, %c0_i32_0 : i32, i32
  }
  func.func @transform_3(%arg0: i32) -> (i32, i32) {
    %c0_i32 = arith.constant 0 : i32
    %c0_i32_0 = arith.constant 0 : i32
    %c0_i32_1 = arith.constant 0 : i32
    return %c0_i32, %c0_i32_0 : i32, i32
  }
  func.func @transform_4(%arg0: i32) -> (i32, i32) {
    %c0_i32 = arith.constant 0 : i32
    %c0_i32_0 = arith.constant 0 : i32
    %c0_i32_1 = arith.constant 0 : i32
    return %c0_i32, %c0_i32_0 : i32, i32
  }
  func.func @transform_5(%arg0: i32) -> (i32, i32) {
    %c0_i32 = arith.constant 0 : i32
    %c0_i32_0 = arith.constant 0 : i32
    %c0_i32_1 = arith.constant 0 : i32
    return %c0_i32, %c0_i32_0 : i32, i32
  }
  func.func @transform_6(%arg0: i32) -> (i32, i32) {
    %c0_i32 = arith.constant 0 : i32
    %c0_i32_0 = arith.constant 0 : i32
    %c0_i32_1 = arith.constant 0 : i32
    return %c0_i32, %c0_i32_0 : i32, i32
  }
  func.func @transform_7(%arg0: i32) -> (i32, i32) {
    %c0_i32 = arith.constant 0 : i32
    %c0_i32_0 = arith.constant 0 : i32
    %c0_i32_1 = arith.constant 0 : i32
    return %c0_i32, %c0_i32_0 : i32, i32
  }
  func.func @transform_8(%arg0: i32) -> (i32, i32, i32) {
    %c0_i32 = arith.constant 0 : i32
    %c0_i32_0 = arith.constant 0 : i32
    %c0_i32_1 = arith.constant 0 : i32
    return %arg0, %c0_i32, %c0_i32_0 : i32, i32, i32
  }
}

</mosaic_0001>

<bundles_post_ra>
// kernel: unet_conv.1
= control target key start
LH: loop header
LB: loop body
LE: loop exit
PB: predicated region body
PF: predicated region fallthrough
CT: control target
= control target key end

     0   :  { %s3859_s9 = smov 91   ;;  %s3860_s10 = smov 92   ;;  %vm85_vm0 = vcmask 1043456   ;;  %vm342_vm1 = vcmask 752640   ;;  %vm395_vm2 = vcmask 744448   ;;  %vm291_vm3 = vcmask 883712   ;;  %s5424_s0 = inlined_call_operand.vmem [shape: bf16[1,16,650], index: 0, kind: input, shape index: {}]   ;;  %s5425_s3 = inlined_call_operand.vmem [shape: f32[32,1], index: 3, kind: input, shape index: {}]   ;;  %s5426_s4 = inlined_call_operand.vmem [shape: f32[32,1], index: 4, kind: input, shape index: {}]   ;;  %s5427_s1 = inlined_call_operand.vmem [shape: bf16[32,144], index: 1, kind: input, shape index: {}]   ;;  %s5428_s7 = inlined_call_operand.vmem [shape: f32[1,612], index: 7, kind: input, shape index: {}]   ;;  %s5429_s5 = inlined_call_operand.vmem [shape: f32[32,1], index: 5, kind: input, shape index: {}]   ;;  %s5430_s6 = inlined_call_operand.vmem [shape: f32[32,1], index: 6, kind: input, shape index: {}]   ;;  %s5431_s2 = inlined_call_operand.vmem [shape: bf16[32,288], index: 2, kind: input, shape index: {}]   ;;  %s5432_s8 = inlined_call_operand.vmem [shape: f32[1,32,612], index: 8, kind: output, shape index: {}]  }
   0x1   :  { %v367_v0 = vld [vmem:[%s5424_s0 + $0x18] sm:$0xff]  ;;  %v364_v1 = vld [vmem:[%s5424_s0] sm:$0xff]  ;;  %v365_v3 = vld [vmem:[%s5424_s0 + $0x8] sm:$0xff]  ;;  %s3861_s15 = smov 108   ;;  %s3862_s16 = smov 109   ;;  %vm240_vm4 = vcmask 891904  }
   0x2   :  { %382 = vrot.lane.b32.xlu1 %v367_v0, %s3859_s9  ;;  %376 = vrot.lane.b32.xlu0 %v364_v1, %s3859_s9  ;;  %48 = vst [vmem:[#allocation3] sm:$0xff] %v364_v1  ;;  %v368_v2 = vld [vmem:[%s5424_s0 + $0x20] sm:$0xff]  ;;  %s3863_s17 = smov 110   ;;  %s3864_s18 = smov 126   ;;  %v366_v4 = vld [vmem:[%s5424_s0 + $0x10] sm:$0xff]  ;;  %vm189_vm5 = vcmask 900096  }
   0x3   :  { %323 = vrot.lane.b32.xlu2 %v364_v1, %s3860_s10  ;;  %52 = vst [vmem:[#allocation3 + $0x14] sm:$0xff] %v367_v0  ;;  %s3865_s19 = smov 90   ;;  %s3866_s20 = smov 127   ;;  %v369_v5 = vld [vmem:[%s5424_s0 + $0x28] sm:$0xff]  ;;  %v262_v7 = vld [vmem:[%s5424_s0 + $0x10] sm:$0xf] }
   0x4   :  { %v265_v8 = vld [vmem:[%s5424_s0 + $0x28] sm:$0xf]  ;;  %v211_v9 = vld [vmem:[%s5424_s0 + $0x10] sm:$0xf]  ;;  %vm138_vm6 = vcmask 1031168   ;;  %vm50_vm7 = vcmask 814080  }
   0x5   :  { %v214_v13 = vld [vmem:[%s5424_s0 + $0x28] sm:$0xf]  ;;  %v160_v14 = vld [vmem:[%s5424_s0 + $0x10] sm:$0xf]  ;;  %vm448_vm8 = vcmask 736256   ;;  %vm87_vm9 = vcmask 1039360  }
   0x6   :  { %v163_v16 = vld [vmem:[%s5424_s0 + $0x28] sm:$0xf]  ;;  %v109_v19 = vld [vmem:[%s5424_s0 + $0x10] sm:$0xf]  ;;  %vm780_vm10 = vcmask 130048   ;;  %vm30_vm11 = vcmask 150528  }
   0x7   :  { %v112_v23 = vld [vmem:[%s5424_s0 + $0x28] sm:$0xf]  ;;  %v57_v24 = vld [vmem:[%s5424_s0 + $0x10] sm:$0xf]  ;;  %vm1202_vm12 = vcmask 1043608   ;;  %vm1203_vm13 = vcmask 1047556  }
   0x8   :  { %v60_v25 = vld [vmem:[%s5424_s0 + $0x28] sm:$0xf]  ;;  %vm1173_vm14 = vcmask 154624   ;;  %vm4423_vm15 = vmor %vm1203_vm13, %vm1202_vm12  ;;  %vm1207_vm13 = vcmask 969728  }
   0xa   :  { %384 = vrot.lane.b32.xlu1 %v368_v2, %s3859_s9  ;;  %378 = vrot.lane.b32.xlu0 %v365_v3, %s3859_s9 }
   0xb   :  { %325 = vrot.lane.b32.xlu2 %v365_v3, %s3860_s10 }
  0x12   :  { %331 = vrot.lane.b32.xlu1 %v368_v2, %s3860_s10  ;;  %329 = vrot.lane.b32.xlu0 %v367_v0, %s3860_s10 }
  0x13   :  { %272 = vrot.lane.b32.xlu2 %v364_v1, %s3861_s15 }
  0x1a   :  { %278 = vrot.lane.b32.xlu1 %v367_v0, %s3861_s15  ;;  %274 = vrot.lane.b32.xlu0 %v365_v3, %s3861_s15 }
  0x1b   :  { %280 = vrot.lane.b32.xlu2 %v368_v2, %s3861_s15 }
  0x22   :  { %223 = vrot.lane.b32.xlu1 %v365_v3, %s3862_s16  ;;  %221 = vrot.lane.b32.xlu0 %v364_v1, %s3862_s16 }
  0x23   :  { %227 = vrot.lane.b32.xlu2 %v367_v0, %s3862_s16 }
  0x2a   :  { %229 = vrot.lane.b32.xlu0 %v368_v2, %s3862_s16  ;;  %170 = vrot.lane.b32.xlu1 %v364_v1, %s3863_s17 }
  0x2b   :  { %172 = vrot.lane.b32.xlu2 %v365_v3, %s3863_s17 }
  0x32   :  { %176 = vrot.lane.b32.xlu0 %v367_v0, %s3863_s17  ;;  %178 = vrot.lane.b32.xlu1 %v368_v2, %s3863_s17 }
  0x33   :  { %119 = vrot.lane.b32.xlu2 %v364_v1, %s3864_s18 }
  0x3a   :  { %125 = vrot.lane.b32.xlu1 %v367_v0, %s3864_s18  ;;  %121 = vrot.lane.b32.xlu0 %v365_v3, %s3864_s18 }
  0x3b   :  { %127 = vrot.lane.b32.xlu2 %v368_v2, %s3864_s18 }
  0x42   :  { %431 = vrot.lane.b32.xlu1 %v365_v3, %s3865_s19  ;;  %429 = vrot.lane.b32.xlu0 %v364_v1, %s3865_s19 }
  0x43   :  { %435 = vrot.lane.b32.xlu2 %v367_v0, %s3865_s19 }
  0x4a   :  { %437 = vrot.lane.b32.xlu0 %v368_v2, %s3865_s19  ;;  %67 = vrot.lane.b32.xlu1 %v364_v1, %s3866_s20 }
  0x4b   :  { %69 = vrot.lane.b32.xlu2 %v365_v3, %s3866_s20 }
  0x52   :  { %73 = vrot.lane.b32.xlu0 %v367_v0, %s3866_s20  ;;  %75 = vrot.lane.b32.xlu1 %v368_v2, %s3866_s20 }
  0x53   :  { %380 = vrot.lane.b32.xlu2 %v366_v4, %s3859_s9 }
  0x5a   :  { %386 = vrot.lane.b32.xlu0 %v369_v5, %s3859_s9  ;;  %327 = vrot.lane.b32.xlu1 %v366_v4, %s3860_s10 }
  0x5b   :  { %333 = vrot.lane.b32.xlu2 %v369_v5, %s3860_s10 }
  0x5d   :  { %v324_v6 = vpop.permute.xlu2 %323 }
  0x5e   :  { %v335_v10 = vrot.slane %v324_v6, 4 }
  0x62   :  { %276 = vrot.lane.b32.xlu0 %v262_v7, %s3861_s15  ;;  %282 = vrot.lane.b32.xlu1 %v265_v8, %s3861_s15 }
  0x63   :  { %225 = vrot.lane.b32.xlu2 %v211_v9, %s3862_s16 }
  0x65   :  { %v3980_v11 = vpop.permute.xlu2 %325 }
  0x66   :  { %v336_v12 = vrot.slane %v3980_v11, 4 }
  0x68   :  { %v341_v15 = vsel %vm85_vm0, %v335_v10, %v336_v12 }
  0x69   :  { %v343_v17 = vsel %vm342_vm1, %v324_v6, %v341_v15 }
  0x6a   :  { %358 = vst [vmem:[#allocation3 + $0xf0] sm:$0xff] %v343_v17  ;;  %231 = vrot.lane.b32.xlu0 %v214_v13, %s3862_s16  ;;  %174 = vrot.lane.b32.xlu1 %v160_v14, %s3863_s17 }
  0x6b   :  { %180 = vrot.lane.b32.xlu2 %v163_v16, %s3863_s17 }
  0x6d   :  { %v273_v18 = vpop.permute.xlu2 %272 }
  0x6e   :  { %v284_v50 = vrot.slane %v273_v18, 4 }
  0x71   :  { %v3231_v59 = vld [vmem:[#allocation3 + $0xf0] sm:$0xf]  ;;  %v3727_v63 = vld [vmem:[#allocation3 + $0xf4] sm:$0xf] }
  0x72   :  { %433 = vrot.lane.b32.xlu0 %v366_v4, %s3865_s19  ;;  %439 = vrot.lane.b32.xlu1 %v369_v5, %s3865_s19 }
  0x73   :  { %123 = vrot.lane.b32.xlu2 %v109_v19, %s3864_s18 }
  0x74   :  { %v383_v20 = vpop.permute.xlu1 %382  ;;  %v377_v21 = vpop.permute.xlu0 %376 }
  0x75   :  { %v4005_v22 = vpop.permute.xlu2 %280  ;;  %v391_v28 = vrot.slane %v383_v20, 4  ;;  %v388_v29 = vrot.slane %v377_v21, 4 }
  0x76   :  { %v288_v51 = vrot.slane %v4005_v22, 4 }
  0x7a   :  { %129 = vrot.lane.b32.xlu0 %v112_v23, %s3864_s18  ;;  %71 = vrot.lane.b32.xlu1 %v57_v24, %s3866_s20 }
  0x7b   :  { %77 = vrot.lane.b32.xlu2 %v60_v25, %s3866_s20 }
  0x7c   :  { %v4019_v26 = vpop.permute.xlu1 %384  ;;  %v4021_v27 = vpop.permute.xlu0 %378 }
  0x7d   :  { %v392_v30 = vrot.slane %v4019_v26, 4  ;;  %v389_v31 = vrot.slane %v4021_v27, 4  ;;  %v4025_v32 = vpop.permute.xlu2 %227 }
  0x7f   :  { %v400_v33 = vsel %vm85_vm0, %v391_v28, %v392_v30  ;;  %v394_v34 = vsel %vm85_vm0, %v388_v29, %v389_v31 }
  0x80   :  { %v401_v35 = vsel %vm395_vm2, %v383_v20, %v400_v33  ;;  %v396_v36 = vsel %vm395_vm2, %v377_v21, %v394_v34 }
  0x81   :  { %414 = vst [vmem:[#allocation3 + $0x12c] sm:$0xff] %v401_v35 }
  0x82   :  { %411 = vst [vmem:[#allocation3 + $0x118] sm:$0xff] %v396_v36 }
  0x84   :  { %v4035_v37 = vpop.permute.xlu1 %331  ;;  %v330_v38 = vpop.permute.xlu0 %329 }
  0x85   :  { %v339_v39 = vrot.slane %v4035_v37, 4  ;;  %v338_v40 = vrot.slane %v330_v38, 4  ;;  %v4038_v41 = vpop.permute.xlu2 %172 }
  0x86   :  { %v183_v19 = vrot.slane %v4038_v41, 4 }
  0x87   :  { %v347_v42 = vsel %vm85_vm0, %v338_v40, %v339_v39 }
  0x88   :  { %v348_v43 = vsel %vm342_vm1, %v330_v38, %v347_v42  ;;  %v3734_v44 = vld [vmem:[#allocation3 + $0x128] sm:$0xf0]  ;;  %v3253_v45 = vld [vmem:[#allocation3 + $0x12c] sm:$0xf0] }
  0x89   :  { %361 = vst [vmem:[#allocation3 + $0x104] sm:$0xff] %v348_v43  ;;  %v3251_v46 = vld [vmem:[#allocation3 + $0x118] sm:$0xf]  ;;  %v3732_v47 = vld [vmem:[#allocation3 + $0x11c] sm:$0xf] }
  0x8a   :  { %v3252_v48 = vor.u32 %v3734_v44, %v3251_v46  ;;  %v3256_v49 = vor.u32 %v3732_v47, %v3253_v45 }
  0x8c   :  { %787 = vmatpush.bf16.msra.mxu0 %v3252_v48  ;;  %825 = vmatpush.bf16.msra.mxu2 %v3256_v49  ;;  %v279_v52 = vpop.permute.xlu1 %278  ;;  %v4045_v53 = vpop.permute.xlu0 %274 }
  0x8d   :  { %v287_v54 = vrot.slane %v279_v52, 4  ;;  %v285_v55 = vrot.slane %v4045_v53, 4  ;;  %v4048_v56 = vpop.permute.xlu2 %119 }
  0x8f   :  { %v295_v57 = vsel %vm85_vm0, %v287_v54, %v288_v51  ;;  %v290_v58 = vsel %vm85_vm0, %v284_v50, %v285_v55  ;;  %v131_v50 = vrot.slane %v4048_v56, 4 }
  0x90   :  { %v296_v60 = vsel %vm291_vm3, %v279_v52, %v295_v57  ;;  %v292_v61 = vsel %vm291_vm3, %v273_v18, %v290_v58  ;;  %v3729_v62 = vld [vmem:[#allocation3 + $0x100] sm:$0xf0]  ;;  %v3233_v0 = vld [vmem:[#allocation3 + $0x104] sm:$0xf0]  ;;  %v236_v18 = vrot.slane %v4025_v32, 4 }
  0x91   :  { %308 = vst [vmem:[#allocation3 + $0xdc] sm:$0xff] %v296_v60  ;;  %v3232_v1 = vor.u32 %v3729_v62, %v3231_v59  ;;  %v3236_v2 = vor.u32 %v3727_v63, %v3233_v0 }
  0x92   :  { %305 = vst [vmem:[#allocation3 + $0xc8] sm:$0xff] %v292_v61 }
  0x93   :  { %788 = vmatpush.bf16.msra.mxu0 %v3232_v1  ;;  %826 = vmatpush.bf16.msra.mxu2 %v3236_v2 }
  0x94   :  { %v4058_v3 = vpop.permute.xlu1 %223  ;;  %v222_v4 = vpop.permute.xlu0 %221 }
  0x95   :  { %v234_v5 = vrot.slane %v4058_v3, 4  ;;  %v233_v6 = vrot.slane %v222_v4, 4  ;;  %v4061_v7 = vpop.permute.xlu2 %127 }
  0x96   :  { %v135_v52 = vrot.slane %v4061_v7, 4 }
  0x97   :  { %v239_v8 = vsel %vm85_vm0, %v233_v6, %v234_v5 }
  0x98   :  { %v241_v9 = vsel %vm240_vm4, %v222_v4, %v239_v8  ;;  %v3724_v10 = vld [vmem:[#allocation3 + $0xd8] sm:$0xf0]  ;;  %v3213_v13 = vld [vmem:[#allocation3 + $0xdc] sm:$0xf0] }
  0x99   :  { %254 = vst [vmem:[#allocation3 + $0xa0] sm:$0xff] %v241_v9  ;;  %v3211_v14 = vld [vmem:[#allocation3 + $0xc8] sm:$0xf]  ;;  %v3722_v15 = vld [vmem:[#allocation3 + $0xcc] sm:$0xf] }
  0x9a   :  { %v3212_v16 = vor.u32 %v3724_v10, %v3211_v14  ;;  %v3216_v17 = vor.u32 %v3722_v15, %v3213_v13  ;;  %v3867_v13 = vmov 0   ;;  %v980_v14 = vld [vmem:[%s5425_s3 + $0x18] sm:$0xff] }
  0x9b   :  { %3857 = vset.pattern.permute.xlu1 %v3867_v13  ;;  %3856 = vset.pattern.permute.xlu0 %v3867_v13  ;;  %31 = vst.msk [vmem:[#allocation2] sm:$0xf] %vm30_vm11, %v3867_v13 }
  0x9c   :  { %789 = vmatpush.bf16.msra.mxu0 %v3212_v16  ;;  %827 = vmatpush.bf16.msra.mxu2 %v3216_v17  ;;  %v4069_v20 = vpop.permute.xlu0 %229  ;;  %v171_v21 = vpop.permute.xlu1 %170  ;;  %32 = vst.msk [vmem:[#allocation2 + $0x18] sm:$0xf] %vm30_vm11, %v3867_v13 }
  0x9d   :  { %v237_v23 = vrot.slane %v4069_v20, 4  ;;  %v182_v24 = vrot.slane %v171_v21, 4  ;;  %v4072_v25 = vpop.permute.xlu2 %435  ;;  %998 = vperm.xlu1 %3857, %v980_v14   ;;  %3858 = vset.pattern.permute.xlu2 %v3867_v13  ;;  %33 = vst.msk [vmem:[#allocation2 + $0x30] sm:$0xf] %vm30_vm11, %v3867_v13 }
  0x9e   :  { %34 = vst.msk [vmem:[#allocation2 + $0x48] sm:$0xf] %vm30_vm11, %v3867_v13  ;;  %vm36_vm11 = vcmask 80900  }
  0x9f   :  { %v244_v28 = vsel %vm85_vm0, %v236_v18, %v237_v23  ;;  %v188_v29 = vsel %vm85_vm0, %v182_v24, %v183_v19 }
  0xa0   :  { %v245_v33 = vsel %vm240_vm4, %v4025_v32, %v244_v28  ;;  %v190_v34 = vsel %vm189_vm5, %v171_v21, %v188_v29  ;;  %v3191_v44 = vld [vmem:[#allocation3 + $0xa0] sm:$0xf]  ;;  %v3717_v46 = vld [vmem:[#allocation3 + $0xa4] sm:$0xf] }
  0xa1   :  { %257 = vst [vmem:[#allocation3 + $0xb4] sm:$0xff] %v245_v33 }
  0xa2   :  { %203 = vst [vmem:[#allocation3 + $0x78] sm:$0xff] %v190_v34 }
  0xa4   :  { %v177_v35 = vpop.permute.xlu0 %176  ;;  %v4083_v36 = vpop.permute.xlu1 %178 }
  0xa5   :  { %v185_v38 = vrot.slane %v177_v35, 4  ;;  %v186_v40 = vrot.slane %v4083_v36, 4  ;;  %v4086_v42 = vpop.permute.xlu2 %69 }
  0xa7   :  { %v193_v43 = vsel %vm85_vm0, %v185_v38, %v186_v40 }
  0xa8   :  { %v194_v45 = vsel %vm189_vm5, %v177_v35, %v193_v43  ;;  %v3719_v32 = vld [vmem:[#allocation3 + $0xb0] sm:$0xf0]  ;;  %v3193_v47 = vld [vmem:[#allocation3 + $0xb4] sm:$0xf0] }
  0xa9   :  { %206 = vst [vmem:[#allocation3 + $0x8c] sm:$0xff] %v194_v45  ;;  %v3192_v48 = vor.u32 %v3719_v32, %v3191_v44  ;;  %v3196_v49 = vor.u32 %v3717_v46, %v3193_v47  ;;  %v3171_v0 = vld [vmem:[#allocation3 + $0x78] sm:$0xf]  ;;  %v3712_v1 = vld [vmem:[#allocation3 + $0x7c] sm:$0xf] }
  0xaa   :  { %v1024_v43 = vld [vmem:[%s5426_s4 + $0x18] sm:$0xff] }
  0xab   :  { %790 = vmatpush.bf16.msra.mxu0 %v3192_v48  ;;  %828 = vmatpush.bf16.msra.mxu2 %v3196_v49  ;;  %v80_v48 = vrot.slane %v4086_v42, 4 }
  0xac   :  { %v126_v54 = vpop.permute.xlu1 %125  ;;  %v4094_v57 = vpop.permute.xlu0 %121  ;;  %1042 = vperm.xlu1 %3857, %v1024_v43  }
  0xad   :  { %v134_v58 = vrot.slane %v126_v54, 4  ;;  %v132_v59 = vrot.slane %v4094_v57, 4  ;;  %v381_v60 = vpop.permute.xlu2 %380 }
  0xae   :  { %v390_v61 = vrot.slane %v381_v60, 4 }
  0xaf   :  { %v142_v62 = vsel %vm85_vm0, %v134_v58, %v135_v52  ;;  %v137_v63 = vsel %vm85_vm0, %v131_v50, %v132_v59 }
  0xb0   :  { %v143_v2 = vsel %vm138_vm6, %v126_v54, %v142_v62  ;;  %v139_v4 = vsel %vm138_vm6, %v4048_v56, %v137_v63  ;;  %v397_v6 = vsel %vm85_vm0, %v389_v31, %v390_v61  ;;  %v399_v8 = vsel %vm395_vm2, %v381_v60, %v390_v61  ;;  %v3714_v9 = vld [vmem:[#allocation3 + $0x88] sm:$0xf0]  ;;  %v3173_v10 = vld [vmem:[#allocation3 + $0x8c] sm:$0xf0] }
  0xb1   :  { %155 = vst [vmem:[#allocation3 + $0x64] sm:$0xff] %v143_v2  ;;  %v398_v56 = vsel %vm395_vm2, %v4021_v27, %v397_v6  ;;  %v3172_v15 = vor.u32 %v3714_v9, %v3171_v0  ;;  %v3176_v16 = vor.u32 %v3712_v1, %v3173_v10 }
  0xb2   :  { %152 = vst [vmem:[#allocation3 + $0x50] sm:$0xff] %v139_v4  ;;  %v1021_v4 = vld [vmem:[%s5426_s4] sm:$0xff] }
  0xb3   :  { %412 = vst [vmem:[#allocation3 + $0x120] sm:$0xff] %v398_v56  ;;  %791 = vmatpush.bf16.msra.mxu0 %v3172_v15  ;;  %829 = vmatpush.bf16.msra.mxu2 %v3176_v16  ;;  %v3693_v56 = vld [vmem:[%s5427_s1 + $0x4] sm:$0xf]  ;;  %v3097_v15 = vld [vmem:[%s5427_s1 + $0x8] sm:$0xf0] }
  0xb4   :  { %413 = vst.msk [vmem:[#allocation3 + $0x128] sm:$0xf] %vm50_vm7, %v399_v8  ;;  %v4119_v31 = vpop.permute.xlu1 %431  ;;  %v430_v17 = vpop.permute.xlu0 %429  ;;  %1027 = vperm.xlu1 %3857, %v1021_v4  }
  0xb5   :  { %v442_v18 = vrot.slane %v4119_v31, 4  ;;  %v441_v27 = vrot.slane %v430_v17, 4  ;;  %v334_v21 = vpop.permute.xlu2 %333 }
  0xb6   :  { %v340_v24 = vrot.slane %v334_v21, 4 }
  0xb7   :  { %v447_v28 = vsel %vm85_vm0, %v441_v27, %v442_v18 }
  0xb8   :  { %v449_v29 = vsel %vm448_vm8, %v430_v17, %v447_v28  ;;  %v349_v33 = vsel %vm85_vm0, %v339_v39, %v340_v24  ;;  %v351_v34 = vsel %vm342_vm1, %v334_v21, %v340_v24  ;;  %v3709_v35 = vld [vmem:[#allocation3 + $0x60] sm:$0xf0]  ;;  %v3153_v38 = vld [vmem:[#allocation3 + $0x64] sm:$0xf0]  ;;  %v444_v39 = vrot.slane %v4072_v25, 4 }
  0xb9   :  { %464 = vst [vmem:[#allocation3 + $0x140] sm:$0xff] %v449_v29  ;;  %v350_v44 = vsel %vm342_vm1, %v4035_v37, %v349_v33  ;;  %v3151_v45 = vld [vmem:[#allocation3 + $0x50] sm:$0xf]  ;;  %v3707_v32 = vld [vmem:[#allocation3 + $0x54] sm:$0xf] }
  0xba   :  { %362 = vst [vmem:[#allocation3 + $0x10c] sm:$0xff] %v350_v44  ;;  %v3152_v46 = vor.u32 %v3709_v35, %v3151_v45  ;;  %v3156_v47 = vor.u32 %v3707_v32, %v3153_v38  ;;  %v4181_v35 = vor.u32 %v3693_v56, %v3097_v15  ;;  %v3111_v32 = vld [vmem:[#allocation3] sm:$0xf] }
  0xbb   :  { %363 = vst.msk [vmem:[#allocation3 + $0x114] sm:$0xf] %vm50_vm7, %v351_v34  ;;  %v979_v34 = vld [vmem:[%s5425_s3 + $0x10] sm:$0xff] }
  0xbc   :  { %792 = vmatpush.bf16.msra.mxu0 %v3152_v46  ;;  %830 = vmatpush.bf16.msra.mxu2 %v3156_v47  ;;  %v4138_v49 = vpop.permute.xlu0 %437  ;;  %v68_v50 = vpop.permute.xlu1 %67  ;;  %v3699_v46 = vld [vmem:[#allocation3 + $0x10] sm:$0xf0]  ;;  %v3697_v47 = vld [vmem:[#allocation3 + $0x4] sm:$0xf] }
  0xbd   :  { %v445_v54 = vrot.slane %v4138_v49, 4  ;;  %v226_v37 = vpop.permute.xlu2 %225  ;;  %v79_v58 = vrot.slane %v68_v50, 4  ;;  %993 = vperm.xlu0 %3856, %v979_v34  }
  0xbe   :  { %v235_v60 = vrot.slane %v226_v37, 4  ;;  %256 = vst.msk [vmem:[#allocation3 + $0xb0] sm:$0xf] %vm50_vm7, %v226_v37 }
  0xbf   :  { %v453_v61 = vsel %vm85_vm0, %v444_v39, %v445_v54  ;;  %v86_v62 = vsel %vm85_vm0, %v79_v58, %v80_v48  ;;  %v3113_v39 = vld [vmem:[#allocation3 + $0x14] sm:$0xf0] }
  0xc0   :  { %v454_v63 = vsel %vm448_vm8, %v4072_v25, %v453_v61  ;;  %v242_v0 = vsel %vm85_vm0, %v234_v5, %v235_v60  ;;  %v88_v1 = vsel %vm87_vm9, %v68_v50, %v86_v62  ;;  %v3271_v14 = vld [vmem:[#allocation3 + $0x140] sm:$0xf]  ;;  %v3737_v21 = vld [vmem:[#allocation3 + $0x144] sm:$0xf]  ;;  %v1023_v62 = vld [vmem:[%s5426_s4 + $0x10] sm:$0xff] }
  0xc1   :  { %467 = vst [vmem:[#allocation3 + $0x154] sm:$0xff] %v454_v63  ;;  %v243_v2 = vsel %vm240_vm4, %v4058_v3, %v242_v0  ;;  %1037 = vperm.xlu2 %3858, %v1023_v62   ;;  %v1022_v62 = vld [vmem:[%s5426_s4 + $0x8] sm:$0xff] }
  0xc2   :  { %255 = vst [vmem:[#allocation3 + $0xa8] sm:$0xff] %v243_v2 }
  0xc3   :  { %101 = vst [vmem:[#allocation3 + $0x28] sm:$0xff] %v88_v1 }
  0xc4   :  { %v74_v6 = vpop.permute.xlu0 %73  ;;  %v4159_v8 = vpop.permute.xlu1 %75 }
  0xc5   :  { %v82_v25 = vrot.slane %v74_v6, 4  ;;  %v181_v9 = vpop.permute.xlu2 %180  ;;  %v83_v5 = vrot.slane %v4159_v8, 4 }
  0xc6   :  { %v187_v10 = vrot.slane %v181_v9, 4  ;;  %208 = vst.msk [vmem:[#allocation3 + $0x9c] sm:$0xf] %vm50_vm7, %v181_v9  ;;  %v3095_v9 = vld [vmem:[%s5427_s1] sm:$0xf] }
  0xc7   :  { %v91_v3 = vsel %vm85_vm0, %v82_v25, %v83_v5  ;;  %v978_v25 = vld [vmem:[%s5425_s3 + $0x8] sm:$0xff] }
  0xc8   :  { %v195_v16 = vsel %vm85_vm0, %v186_v40, %v187_v10  ;;  %v92_v17 = vsel %vm87_vm9, %v74_v6, %v91_v3  ;;  %v3739_v27 = vld [vmem:[#allocation3 + $0x150] sm:$0xf0]  ;;  %v3273_v24 = vld [vmem:[#allocation3 + $0x154] sm:$0xf0]  ;;  %988 = vperm.xlu0 %3856, %v978_v25  }
  0xc9   :  { %v196_v28 = vsel %vm189_vm5, %v4083_v36, %v195_v16  ;;  %104 = vst [vmem:[#allocation3 + $0x3c] sm:$0xff] %v92_v17  ;;  %v3272_v29 = vor.u32 %v3739_v27, %v3271_v14  ;;  %v3276_v33 = vor.u32 %v3737_v21, %v3273_v24  ;;  %v977_v16 = vld [vmem:[%s5425_s3] sm:$0xff] }
  0xca   :  { %207 = vst [vmem:[#allocation3 + $0x94] sm:$0xff] %v196_v28  ;;  %v3131_v60 = vld [vmem:[#allocation3 + $0x28] sm:$0xf]  ;;  %v3702_v61 = vld [vmem:[#allocation3 + $0x2c] sm:$0xf]  ;;  %983 = vperm.xlu2 %3858, %v977_v16  }
  0xcb   :  { %813 = vmatpush.bf16.msra.mxu1 %v3272_v29  ;;  %851 = vmatpush.bf16.msra.mxu3 %v3276_v33  ;;  %v3259_v21 = vld [vmem:[#allocation3 + $0x120] sm:$0xf]  ;;  %v3695_v29 = vld [vmem:[%s5427_s1 + $0x14] sm:$0xf]  ;;  %v3105_v33 = vld [vmem:[%s5427_s1 + $0x18] sm:$0xf0] }
  0xcc   :  { %v387_v40 = vpop.permute.xlu0 %386  ;;  %v328_v38 = vpop.permute.xlu1 %327 }
  0xcd   :  { %v393_v43 = vrot.slane %v387_v40, 4  ;;  %v124_v44 = vpop.permute.xlu2 %123  ;;  %v337_v45 = vrot.slane %v328_v38, 4 }
  0xce   :  { %v133_v36 = vrot.slane %v124_v44, 4  ;;  %154 = vst.msk [vmem:[#allocation3 + $0x60] sm:$0xf] %vm50_vm7, %v124_v44  ;;  %3291 = vmatmul.msk.bf16.vlgmr.msra.gmra.mxu3 %vm780_vm10, %v4181_v35  ;;  %3289 = vmatmul.msk.bf16.vlgmr.msra.gmra.mxu1 %vm780_vm10, %v4181_v35 }
  0xcf   :  { %v402_v50 = vsel %vm85_vm0, %v392_v30, %v393_v43  ;;  %v404_v37 = vsel %vm395_vm2, %v387_v40, %v393_v43  ;;  %v344_v58 = vsel %vm85_vm0, %v336_v12, %v337_v45  ;;  %v346_v4 = vsel %vm342_vm1, %v328_v38, %v337_v45  ;;  %v3733_v38 = vld [vmem:[#allocation3 + $0x124] sm:$0xf] }
  0xd0   :  { %v403_v63 = vsel %vm395_vm2, %v4019_v26, %v402_v50  ;;  %416 = vst.msk [vmem:[#allocation3 + $0x13c] sm:$0xf] %vm50_vm7, %v404_v37  ;;  %v140_v30 = vsel %vm85_vm0, %v132_v59, %v133_v36  ;;  %v345_v0 = vsel %vm342_vm1, %v3980_v11, %v344_v58  ;;  %v3704_v1 = vld [vmem:[#allocation3 + $0x38] sm:$0xf0]  ;;  %v3133_v12 = vld [vmem:[#allocation3 + $0x3c] sm:$0xf0]  ;;  %v3112_v11 = vor.u32 %v3699_v46, %v3111_v32 }
  0xd1   :  { %415 = vst [vmem:[#allocation3 + $0x134] sm:$0xff] %v403_v63  ;;  %v141_v2 = vsel %vm138_vm6, %v4094_v57, %v140_v30  ;;  %v3132_v6 = vor.u32 %v3704_v1, %v3131_v60  ;;  %v3136_v26 = vor.u32 %v3702_v61, %v3133_v12  ;;  %v3116_v59 = vor.u32 %v3697_v47, %v3113_v39  ;;  %v3694_v57 = vld [vmem:[%s5427_s1 + $0x4] sm:$0xf0]  ;;  %v3730_v47 = vld [vmem:[#allocation3 + $0x108] sm:$0xf0]  ;;  %v46_v50 = vld [vmem:[%s5424_s0 + $0x20] sm:$0xff] }
  0xd2   :  { %153 = vst [vmem:[#allocation3 + $0x58] sm:$0xff] %v141_v2  ;;  %v4224_v27 = vor.u32 %v3694_v57, %v3095_v9  ;;  %v4250_v32 = vor.u32 %v3695_v29, %v3105_v33  ;;  %v3241_v39 = vld [vmem:[#allocation3 + $0x10c] sm:$0xf0]  ;;  %1032 = vperm.xlu2 %3858, %v1022_v62  }
  0xd3   :  { %359 = vst [vmem:[#allocation3 + $0xf8] sm:$0xff] %v345_v0  ;;  %793 = vmatpush.bf16.msra.mxu0 %v3132_v6  ;;  %831 = vmatpush.bf16.msra.mxu2 %v3136_v26 }
  0xd4   :  { %360 = vst.msk [vmem:[#allocation3 + $0x100] sm:$0xf] %vm50_vm7, %v346_v4  ;;  %v277_v10 = vpop.permute.xlu0 %276  ;;  %v283_v3 = vpop.permute.xlu1 %282 }
  0xd5   :  { %v286_v14 = vrot.slane %v277_v10, 4  ;;  %307 = vst.msk [vmem:[#allocation3 + $0xd8] sm:$0xf] %vm50_vm7, %v277_v10  ;;  %v78_v56 = vpop.permute.xlu2 %77  ;;  %v289_v15 = vrot.slane %v283_v3, 4 }
  0xd6   :  { %v84_v17 = vrot.slane %v78_v56, 4  ;;  %106 = vst.msk [vmem:[#allocation3 + $0x4c] sm:$0xf] %vm50_vm7, %v78_v56  ;;  %v3718_v56 = vld [vmem:[#allocation3 + $0xac] sm:$0xf] }
  0xd7   :  { %v293_v24 = vsel %vm85_vm0, %v285_v55, %v286_v14  ;;  %v297_v28 = vsel %vm85_vm0, %v288_v51, %v289_v15  ;;  %310 = vst.msk [vmem:[#allocation3 + $0xec] sm:$0xf] %vm50_vm7, %v283_v3  ;;  %794 = vmatpush.bf16.msra.mxu0 %v3112_v11  ;;  %832 = vmatpush.bf16.msra.mxu2 %v3116_v59  ;;  %v3199_v14 = vld [vmem:[#allocation3 + $0xa8] sm:$0xf] }
  0xd8   :  { %v294_v34 = vsel %vm291_vm3, %v4045_v53, %v293_v24  ;;  %v93_v55 = vsel %vm85_vm0, %v83_v5, %v84_v17  ;;  %v298_v51 = vsel %vm291_vm3, %v4005_v22, %v297_v28  ;;  %v3735_v40 = vld [vmem:[#allocation3 + $0x130] sm:$0xf0]  ;;  %v3261_v43 = vld [vmem:[#allocation3 + $0x134] sm:$0xf0]  ;;  %v43_v22 = vld [vmem:[%s5424_s0 + $0x8] sm:$0xff]  ;;  %53 = vst [vmem:[#allocation3 + $0x1c] sm:$0xff] %v46_v50 }
  0xd9   :  { %306 = vst [vmem:[#allocation3 + $0xd0] sm:$0xff] %v294_v34  ;;  %v94_v44 = vsel %vm87_vm9, %v4159_v8, %v93_v55  ;;  %v3260_v45 = vor.u32 %v3735_v40, %v3259_v21  ;;  %v3264_v36 = vor.u32 %v3733_v38, %v3261_v43  ;;  %v3181_v55 = vld [vmem:[#allocation3 + $0x94] sm:$0xf0] }
  0xda   :  { %105 = vst [vmem:[#allocation3 + $0x44] sm:$0xff] %v94_v44  ;;  %795 = vmatmul.bf16.vlgmr.msra.gmra.mxu0 %v4224_v27  ;;  %833 = vmatmul.bf16.vlgmr.msra.gmra.mxu2 %v4224_v27  ;;  %v3239_v53 = vld [vmem:[#allocation3 + $0xf8] sm:$0xf]  ;;  %v3728_v5 = vld [vmem:[#allocation3 + $0xfc] sm:$0xf] }
  0xdb   :  { %309 = vst [vmem:[#allocation3 + $0xe4] sm:$0xff] %v298_v51  ;;  %863 = vmatpush.bf16.msrb.mxu1 %v3260_v45  ;;  %901 = vmatpush.bf16.msrb.mxu0 %v3264_v36  ;;  %v3240_v60 = vor.u32 %v3730_v47, %v3239_v53  ;;  %v3244_v61 = vor.u32 %v3728_v5, %v3241_v39  ;;  %v47_v51 = vld [vmem:[%s5424_s0 + $0x28] sm:$0xf]  ;;  %v3736_v47 = vld [vmem:[#allocation3 + $0x138] sm:$0xf0] }
  0xdc   :  { %v232_v46 = vpop.permute.xlu0 %231  ;;  %v175_v8 = vpop.permute.xlu1 %174  ;;  %49 = vst [vmem:[#allocation3 + $0x8] sm:$0xff] %v43_v22  ;;  %v3267_v53 = vld [vmem:[#allocation3 + $0x128] sm:$0xf]  ;;  %v3227_v62 = vld [vmem:[#allocation3 + $0xd8] sm:$0xf] }
  0xdd   :  { %v238_v37 = vrot.slane %v232_v46, 4  ;;  %259 = vst.msk [vmem:[#allocation3 + $0xc4] sm:$0xf] %vm50_vm7, %v232_v46  ;;  %v184_v58 = vrot.slane %v175_v8, 4 }
  0xde   :  { %205 = vst.msk [vmem:[#allocation3 + $0x88] sm:$0xf] %vm50_vm7, %v175_v8  ;;  %3292 = vmatmul.msk.bf16.gmra.mxu3 %vm780_vm10, %v4250_v32  ;;  %3290 = vmatmul.msk.bf16.gmra.mxu1 %vm780_vm10, %v4250_v32 }
  0xdf   :  { %v246_v63 = vsel %vm85_vm0, %v237_v23, %v238_v37  ;;  %v191_v30 = vsel %vm85_vm0, %v183_v19, %v184_v58  ;;  %864 = vmatpush.bf16.msrb.mxu1 %v3240_v60  ;;  %902 = vmatpush.bf16.msrb.mxu0 %v3244_v61  ;;  %v3103_v19 = vld [vmem:[%s5427_s1 + $0x10] sm:$0xf]  ;;  %54 = vst.msk [vmem:[#allocation3 + $0x24] sm:$0xf] %vm50_vm7, %v47_v51  ;;  %v3247_v58 = vld [vmem:[#allocation3 + $0x100] sm:$0xf] }
  0xe0   :  { %v247_v0 = vsel %vm240_vm4, %v4069_v20, %v246_v63  ;;  %v192_v1 = vsel %vm189_vm5, %v4038_v41, %v191_v30  ;;  %v3219_v12 = vld [vmem:[#allocation3 + $0xd0] sm:$0xf]  ;;  %v3723_v2 = vld [vmem:[#allocation3 + $0xd4] sm:$0xf]  ;;  %v3696_v20 = vld [vmem:[%s5427_s1 + $0x14] sm:$0xf0]  ;;  %v3268_v37 = vor.u32 %v3736_v47, %v3267_v53 }
  0xe1   :  { %258 = vst [vmem:[#allocation3 + $0xbc] sm:$0xff] %v247_v0  ;;  %v4283_v9 = vor.u32 %v3696_v20, %v3103_v19  ;;  %v3731_v60 = vld [vmem:[#allocation3 + $0x110] sm:$0xf0]  ;;  %v3708_v61 = vld [vmem:[#allocation3 + $0x5c] sm:$0xf] }
  0xe2   :  { %204 = vst [vmem:[#allocation3 + $0x80] sm:$0xff] %v192_v1  ;;  %v3725_v4 = vld [vmem:[#allocation3 + $0xe0] sm:$0xf0]  ;;  %v3221_v23 = vld [vmem:[#allocation3 + $0xe4] sm:$0xf0] }
  0xe3   :  { %v3220_v6 = vor.u32 %v3725_v4, %v3219_v12  ;;  %v3224_v26 = vor.u32 %v3723_v2, %v3221_v23  ;;  %v3726_v0 = vld [vmem:[#allocation3 + $0xe8] sm:$0xf0]  ;;  %v3705_v4 = vld [vmem:[#allocation3 + $0x40] sm:$0xf0]  ;;  %v3141_v19 = vld [vmem:[#allocation3 + $0x44] sm:$0xf0] }
  0xe4   :  { %v434_v25 = vpop.permute.xlu0 %433  ;;  %v440_v11 = vpop.permute.xlu1 %439  ;;  %v3119_v20 = vld [vmem:[#allocation3 + $0x8] sm:$0xf] }
  0xe5   :  { %865 = vmatpush.bf16.msrb.mxu1 %v3220_v6  ;;  %903 = vmatpush.bf16.msrb.mxu0 %v3224_v26  ;;  %v443_v41 = vrot.slane %v434_v25, 4  ;;  %v446_v59 = vrot.slane %v440_v11, 4  ;;  %v3207_v6 = vld [vmem:[#allocation3 + $0xb0] sm:$0xf]  ;;  %v3228_v26 = vor.u32 %v3726_v0, %v3227_v62 }
  0xe7   :  { %v450_v57 = vsel %vm85_vm0, %v442_v18, %v443_v41  ;;  %v452_v10 = vsel %vm448_vm8, %v434_v25, %v443_v41  ;;  %v455_v3 = vsel %vm85_vm0, %v445_v54, %v446_v59  ;;  %v457_v17 = vsel %vm448_vm8, %v440_v11, %v446_v59  ;;  %v3698_v25 = vld [vmem:[#allocation3 + $0xc] sm:$0xf]  ;;  %v3721_v11 = vld [vmem:[#allocation3 + $0xc0] sm:$0xf0]  ;;  %v3700_v41 = vld [vmem:[#allocation3 + $0x18] sm:$0xf0] }
  0xe8   :  { %v451_v15 = vsel %vm448_vm8, %v4119_v31, %v450_v57  ;;  %466 = vst.msk [vmem:[#allocation3 + $0x150] sm:$0xf] %vm50_vm7, %v452_v10  ;;  %v456_v16 = vsel %vm448_vm8, %v4138_v49, %v455_v3  ;;  %v3720_v21 = vld [vmem:[#allocation3 + $0xb8] sm:$0xf0]  ;;  %v3201_v18 = vld [vmem:[#allocation3 + $0xbc] sm:$0xf0]  ;;  %v3208_v3 = vor.u32 %v3721_v11, %v3207_v6 }
  0xe9   :  { %465 = vst [vmem:[#allocation3 + $0x148] sm:$0xff] %v451_v15  ;;  %v3200_v24 = vor.u32 %v3720_v21, %v3199_v14  ;;  %v3204_v28 = vor.u32 %v3718_v56, %v3201_v18  ;;  %v3179_v29 = vld [vmem:[#allocation3 + $0x80] sm:$0xf]  ;;  %v3713_v54 = vld [vmem:[#allocation3 + $0x84] sm:$0xf]  ;;  %v3120_v14 = vor.u32 %v3700_v41, %v3119_v20 }
  0xea   :  { %468 = vst [vmem:[#allocation3 + $0x15c] sm:$0xff] %v456_v16  ;;  %800 = vmatmul.bf16.gmra.mxu0 %v4283_v9  ;;  %838 = vmatmul.bf16.gmra.mxu2 %v4283_v9  ;;  %v44_v31 = vld [vmem:[%s5424_s0 + $0x10] sm:$0xf]  ;;  %v3715_v49 = vld [vmem:[#allocation3 + $0x90] sm:$0xf0]  ;;  %v3184_v44 = vor.u32 %v3713_v54, %v3181_v55 }
  0xeb   :  { %469 = vst.msk [vmem:[#allocation3 + $0x164] sm:$0xf] %vm50_vm7, %v457_v17  ;;  %866 = vmatpush.bf16.msrb.mxu1 %v3200_v24  ;;  %904 = vmatpush.bf16.msrb.mxu0 %v3204_v28  ;;  %v3180_v43 = vor.u32 %v3715_v49, %v3179_v29  ;;  %v3121_v59 = vld [vmem:[#allocation3 + $0x1c] sm:$0xf0]  ;;  %v3187_v15 = vld [vmem:[#allocation3 + $0x88] sm:$0xf] }
  0xec   :  { %v130_v33 = vpop.permute.xlu0 %129  ;;  %v72_v34 = vpop.permute.xlu1 %71  ;;  %51 = vst.msk [vmem:[#allocation3 + $0x10] sm:$0xf] %vm50_vm7, %v44_v31  ;;  %v3124_v56 = vor.u32 %v3698_v25, %v3121_v59  ;;  %v3716_v16 = vld [vmem:[#allocation3 + $0x98] sm:$0xf0]  ;;  %v3167_v17 = vld [vmem:[#allocation3 + $0x60] sm:$0xf] }
  0xed   :  { %v136_v40 = vrot.slane %v130_v33, 4  ;;  %157 = vst.msk [vmem:[#allocation3 + $0x74] sm:$0xf] %vm50_vm7, %v130_v33  ;;  %v81_v38 = vrot.slane %v72_v34, 4  ;;  %v3188_v18 = vor.u32 %v3716_v16, %v3187_v15  ;;  %v3706_v29 = vld [vmem:[#allocation3 + $0x48] sm:$0xf0] }
  0xee   :  { %103 = vst.msk [vmem:[#allocation3 + $0x38] sm:$0xf] %vm50_vm7, %v72_v34  ;;  %v3701_v49 = vld [vmem:[#allocation3 + $0x20] sm:$0xf0] }
  0xef   :  { %v144_v45 = vsel %vm85_vm0, %v135_v52, %v136_v40  ;;  %v89_v36 = vsel %vm85_vm0, %v80_v48, %v81_v38  ;;  %867 = vmatpush.bf16.msrb.mxu1 %v3180_v43  ;;  %905 = vmatpush.bf16.msrb.mxu0 %v3184_v44  ;;  %v3287_v34 = vld [vmem:[#allocation3 + $0x150] sm:$0xf] }
  0xf0   :  { %v145_v5 = vsel %vm138_vm6, %v4061_v7, %v144_v45  ;;  %v90_v22 = vsel %vm87_vm9, %v4086_v42, %v89_v36  ;;  %v3279_v46 = vld [vmem:[#allocation3 + $0x148] sm:$0xf]  ;;  %v3738_v8 = vld [vmem:[#allocation3 + $0x14c] sm:$0xf]  ;;  %v3248_v7 = vor.u32 %v3731_v60, %v3247_v58  ;;  %v3159_v42 = vld [vmem:[#allocation3 + $0x58] sm:$0xf] }
  0xf1   :  { %156 = vst [vmem:[#allocation3 + $0x6c] sm:$0xff] %v145_v5  ;;  %v3740_v52 = vld [vmem:[#allocation3 + $0x158] sm:$0xf0]  ;;  %v3281_v39 = vld [vmem:[#allocation3 + $0x15c] sm:$0xf0] }
  0xf2   :  { %102 = vst [vmem:[#allocation3 + $0x30] sm:$0xff] %v90_v22  ;;  %v3280_v50 = vor.u32 %v3740_v52, %v3279_v46  ;;  %v3284_v48 = vor.u32 %v3738_v8, %v3281_v39  ;;  %v3741_v55 = vld [vmem:[#allocation3 + $0x160] sm:$0xf0] }
  0xf3   :  { %v3127_v31 = vld [vmem:[#allocation3 + $0x10] sm:$0xf]  ;;  %v3288_v51 = vor.u32 %v3741_v55, %v3287_v34  ;;  %v4356_v52 = vld [vmem:[%s5428_s7] sm:$0x1f]  ;;  %s3868_s7 = smov 19  }
  0xf4   :  { %889 = vmatpush.bf16.msrb.mxu3 %v3280_v50  ;;  %927 = vmatpush.bf16.msrb.mxu2 %v3284_v48  ;;  %v3711_v21 = vld [vmem:[#allocation3 + $0x70] sm:$0xf0]  ;;  %v3128_v33 = vor.u32 %v3701_v49, %v3127_v31  ;;  %v1087_v58 = vperm.slane %v4356_v52, 0 }
  0xf5   :  { %v3168_v24 = vor.u32 %v3711_v21, %v3167_v17  ;;  %v3147_v28 = vld [vmem:[#allocation3 + $0x38] sm:$0xf] }
  0xf6   :  { %v3148_v54 = vor.u32 %v3706_v29, %v3147_v28 }
  0xf7   :  { %3293 = vmatmul.msk.bf16.vlgmr.msrb.gmra.mxu3 %vm780_vm10, %v4181_v35 }
  0xf8   :  { %3838 = vmatpush.bf16.msra.mxu3 %v3268_v37  ;;  %v3710_v63 = vld [vmem:[#allocation3 + $0x68] sm:$0xf0]  ;;  %v3161_v30 = vld [vmem:[#allocation3 + $0x6c] sm:$0xf0] }
  0xf9   :  { %v3160_v1 = vor.u32 %v3710_v63, %v3159_v42  ;;  %v3164_v12 = vor.u32 %v3708_v61, %v3161_v30  ;;  %v3139_v2 = vld [vmem:[#allocation3 + $0x30] sm:$0xf]  ;;  %v3703_v23 = vld [vmem:[#allocation3 + $0x34] sm:$0xf]  ;;  %v1088_v61 = vperm.slane %v4356_v52, 1 }
  0xfa   :  { %3295 = vmatmul.msk.bf16.vlgmr.msrb.gmra.mxu2 %vm780_vm10, %v4181_v35  ;;  %v3140_v57 = vor.u32 %v3705_v4, %v3139_v2  ;;  %v3144_v10 = vor.u32 %v3703_v23, %v3141_v19 }
  0xfb   :  { %868 = vmatpush.bf16.msrb.mxu1 %v3160_v1  ;;  %906 = vmatpush.bf16.msrb.mxu0 %v3164_v12 }
  0xfc   :  { %3839 = vmatpush.bf16.msra.mxu3 %v3248_v7 }
  0xff   :  { %869 = vmatpush.bf16.msrb.mxu1 %v3140_v57  ;;  %907 = vmatpush.bf16.msrb.mxu0 %v3144_v10 }
 0x100   :  { %3840 = vmatpush.bf16.msra.mxu3 %v3228_v26 }
 0x103   :  { %870 = vmatpush.bf16.msrb.mxu1 %v3120_v14  ;;  %908 = vmatpush.bf16.msrb.mxu0 %v3124_v56 }
 0x104   :  { %3841 = vmatpush.bf16.msra.mxu3 %v3208_v3 }
 0x106   :  { %871 = vmatmul.bf16.vlgmr.msrb.gmra.mxu1 %v4224_v27  ;;  %909 = vmatmul.bf16.vlgmr.msrb.gmra.mxu0 %v4224_v27 }
 0x107   :  { %939 = vmatpush.bf16.msra.mxu1 %v3268_v37  ;;  %3294 = vmatmul.msk.bf16.gmra.mxu3 %vm780_vm10, %v4250_v32 }
 0x108   :  { %3842 = vmatpush.bf16.msra.mxu3 %v3188_v18 }
 0x10a   :  { %3296 = vmatmul.msk.bf16.gmra.mxu2 %vm780_vm10, %v4250_v32 }
 0x10b   :  { %940 = vmatpush.bf16.msra.mxu1 %v3248_v7 }
 0x10c   :  { %3843 = vmatpush.bf16.msra.mxu3 %v3168_v24 }
 0x10f   :  { %941 = vmatpush.bf16.msra.mxu1 %v3228_v26  ;;  %v4339_v40 = vpop.permute.xlu1 %998 }
 0x110   :  { %3844 = vmatpush.bf16.msra.mxu3 %v3148_v54 }
 0x113   :  { %942 = vmatpush.bf16.msra.mxu1 %v3208_v3 }
 0x114   :  { %3845 = vmatpush.bf16.msra.mxu3 %v3128_v33 }
 0x116   :  { %876 = vmatmul.bf16.gmra.mxu1 %v4283_v9  ;;  %914 = vmatmul.bf16.gmra.mxu0 %v4283_v9 }
 0x117   :  { %943 = vmatpush.bf16.msra.mxu1 %v3188_v18  ;;  %952 = vmatmul.bf16.vlgmr.msra.gmra.mxu3 %v4283_v9 }
 0x118   :  { %965 = vmatpush.bf16.msrb.mxu3 %v3288_v51 }
 0x11b   :  { %944 = vmatpush.bf16.msra.mxu1 %v3168_v24  ;;  %v4341_v38 = vpop.permute.xlu2 %1037 }
 0x11e   :  { %v4343_v44 = vpop.permute.xlu1 %1042 }
 0x11f   :  { %945 = vmatpush.bf16.msra.mxu1 %v3148_v54 }
 0x123   :  { %946 = vmatpush.bf16.msra.mxu1 %v3128_v33 }
 0x124   :  { %v4347_v5 = vpop.permute.xlu2 %983 }
 0x126   :  { %947 = vmatmul.bf16.vlgmr.msra.gmra.mxu1 %v4224_v27  ;;  %v4350_v22 = vpop.permute.xlu1 %1027 }
 0x127   :  { %3297 = vmatmul.msk.bf16.vlgmr.msrb.gmra.mxu3 %vm780_vm10, %v4181_v35 }
 0x12c   :  { %v4365_v30 = vpop.permute.xlu2 %1032 }
 0x12f   :  { %v4345_v9 = vpop.permute.xlu0 %993 }
 0x137   :  { %3298 = vmatmul.msk.bf16.gmra.mxu3 %vm780_vm10, %v4250_v32  ;;  %vm35_vm10 = vcmask 1044408  }
 0x138   :  { %vm37_vm12 = vmor %vm36_vm11, %vm35_vm10 }
 0x139   :  { %39 = vst.msk [vmem:[#allocation2 + $0x28] sm:$0xff] %vm37_vm12, %v3867_v13 }
 0x13a   :  { %v4358_v50 = vpop.permute.xlu0 %988  ;;  %38 = vst.msk [vmem:[#allocation2 + $0x10] sm:$0xff] %vm37_vm12, %v3867_v13 }
 0x13b   :  { %40 = vst.msk [vmem:[#allocation2 + $0x40] sm:$0xff] %vm37_vm12, %v3867_v13 }
 0x13c   :  { %41 = vst.msk [vmem:[#allocation2 + $0x58] sm:$0xff] %vm37_vm12, %v3867_v13 }
 0x14b   :  { %v815_v43 = vpop.f32.mrf.mxu1 }
 0x151   :  { %v853_v45 = vpop.f32.mrf.mxu3 }
 0x153   :  { %v817_v35 = vpop.f32.mrf.mxu1 }
 0x157   :  { %v796_v36 = vpop.f32.mrf.mxu0 }
 0x158   :  { %v816_v53 = vadd.f32 %v815_v43, %v796_v36 }
 0x159   :  { %v855_v47 = vpop.f32.mrf.mxu3 }
 0x15a   :  { %v1001_v27 = vmul.f32 %v4347_v5, %v816_v53 }
 0x15b   :  { %v820_v62 = vpop.f32.mrf.mxu1 }
 0x15c   :  { %v1045_v46 = vadd.f32 %v4350_v22, %v1001_v27 }
 0x15d   :  { %v834_v32 = vpop.f32.mrf.mxu2 }
 0x15e   :  { %v854_v8 = vadd.f32 %v853_v45, %v834_v32  ;;  %v1065_v60 = vmax.f32 %v1045_v46, 0.0 }
 0x15f   :  { %v798_v39 = vpop.f32.mrf.mxu0 }
 0x160   :  { %v1002_v48 = vmul.f32 %v4347_v5, %v854_v8  ;;  %v818_v37 = vadd.f32 %v817_v35, %v798_v39  ;;  %v1097_v2 = vmul.f32 %v1087_v58, %v1065_v60 }
 0x161   :  { %v858_v12 = vpop.f32.mrf.mxu3 }
 0x162   :  { %v1046_v7 = vadd.f32 %v4350_v22, %v1002_v48  ;;  %v1006_v42 = vmul.f32 %v4358_v50, %v818_v37 }
 0x163   :  { %v822_v10 = vpop.f32.mrf.mxu1 }
 0x164   :  { %v1066_v63 = vmax.f32 %v1046_v7, 0.0  ;;  %v1050_v23 = vadd.f32 %v4365_v30, %v1006_v42 }
 0x165   :  { %v836_v0 = vpop.f32.mrf.mxu2 }
 0x166   :  { %v856_v1 = vadd.f32 %v855_v47, %v836_v0  ;;  %v1098_v4 = vmul.f32 %v1088_v61, %v1066_v63  ;;  %v1070_v41 = vmax.f32 %v1050_v23, 0.0 }
 0x167   :  { %v801_v6 = vpop.f32.mrf.mxu0 }
 0x168   :  { %v1007_v26 = vmul.f32 %v4358_v50, %v856_v1  ;;  %v821_v19 = vadd.f32 %v820_v62, %v801_v6  ;;  %v1117_v20 = vpack.c.bf16 %v1098_v4, %v1097_v2  ;;  %v1102_v56 = vmul.f32 %v1087_v58, %v1070_v41 }
 0x169   :  { %v860_v18 = vpop.f32.mrf.mxu3 }
 0x16a   :  { %v1051_v25 = vadd.f32 %v4365_v30, %v1007_v26  ;;  %v1011_v11 = vmul.f32 %v4345_v9, %v821_v19  ;;  %1141 = vrot.lane.b32.xlu1 %v1117_v20, %s3868_s7 }
 0x16c   :  { %v1071_v59 = vmax.f32 %v1051_v25, 0.0  ;;  %v1055_v3 = vadd.f32 %v4341_v38, %v1011_v11 }
 0x16d   :  { %v839_v57 = vpop.f32.mrf.mxu2 }
 0x16e   :  { %v859_v14 = vadd.f32 %v858_v12, %v839_v57  ;;  %v1103_v15 = vmul.f32 %v1088_v61, %v1071_v59  ;;  %v1075_v28 = vmax.f32 %v1055_v3, 0.0 }
 0x16f   :  { %v803_v16 = vpop.f32.mrf.mxu0 }
 0x170   :  { %v1012_v17 = vmul.f32 %v4345_v9, %v859_v14  ;;  %v823_v21 = vadd.f32 %v822_v10, %v803_v16  ;;  %v1120_v24 = vpack.c.bf16 %v1103_v15, %v1102_v56  ;;  %v1107_v55 = vmul.f32 %v1087_v58, %v1075_v28 }
 0x172   :  { %v1056_v29 = vadd.f32 %v4341_v38, %v1012_v17  ;;  %v1016_v54 = vmul.f32 %v4339_v40, %v823_v21  ;;  %1147 = vrot.lane.b32.xlu0 %v1120_v24, %s3868_s7 }
 0x174   :  { %v1076_v31 = vmax.f32 %v1056_v29, 0.0  ;;  %v1060_v33 = vadd.f32 %v4343_v44, %v1016_v54 }
 0x175   :  { %v841_v49 = vpop.f32.mrf.mxu2 }
 0x176   :  { %v861_v34 = vadd.f32 %v860_v18, %v841_v49  ;;  %v1108_v51 = vmul.f32 %v1088_v61, %v1076_v31  ;;  %v1080_v36 = vmax.f32 %v1060_v33, 0.0 }
 0x178   :  { %v1017_v43 = vmul.f32 %v4339_v40, %v861_v34  ;;  %v1123_v45 = vpack.c.bf16 %v1108_v51, %v1107_v55  ;;  %v1112_v46 = vmul.f32 %v1087_v58, %v1080_v36  ;;  %v1089_v58 = vperm.slane %v4356_v52, 2 }
 0x17a   :  { %v1061_v53 = vadd.f32 %v4343_v44, %v1017_v43  ;;  %v891_v27 = vpop.f32.mrf.mxu3  ;;  %1153 = vrot.lane.b32.xlu0 %v1123_v45, %s3868_s7 }
 0x17c   :  { %v1081_v35 = vmax.f32 %v1061_v53, 0.0 }
 0x17d   :  { %v929_v32 = vpop.f32.mrf.mxu2 }
 0x17e   :  { %v1113_v8 = vmul.f32 %v1088_v61, %v1081_v35  ;;  %v1090_v61 = vperm.slane %v4356_v52, 3 }
 0x180   :  { %v1126_v47 = vpack.c.bf16 %v1113_v8, %v1112_v46 }
 0x182   :  { %v893_v39 = vpop.f32.mrf.mxu3  ;;  %1159 = vrot.lane.b32.xlu2 %v1126_v47, %s3868_s7 }
 0x183   :  { %v872_v48 = vpop.f32.mrf.mxu1  ;;  %v910_v37 = vpop.f32.mrf.mxu0 }
 0x184   :  { %v892_v60 = vadd.f32 %v891_v27, %v872_v48  ;;  %v930_v7 = vadd.f32 %v929_v32, %v910_v37 }
 0x185   :  { %v931_v42 = vpop.f32.mrf.mxu2 }
 0x186   :  { %v1003_v62 = vmul.f32 %v4347_v5, %v892_v60  ;;  %v1004_v63 = vmul.f32 %v4347_v5, %v930_v7 }
 0x188   :  { %v1047_v0 = vadd.f32 %v4350_v22, %v1003_v62  ;;  %v1048_v1 = vadd.f32 %v4350_v22, %v1004_v63 }
 0x18a   :  { %v1067_v12 = vmax.f32 %v1047_v0, 0.0  ;;  %v1068_v2 = vmax.f32 %v1048_v1, 0.0  ;;  %v896_v4 = vpop.f32.mrf.mxu3 }
 0x18b   :  { %v874_v23 = vpop.f32.mrf.mxu1  ;;  %v912_v6 = vpop.f32.mrf.mxu0 }
 0x18c   :  { %v894_v26 = vadd.f32 %v893_v39, %v874_v23  ;;  %v932_v19 = vadd.f32 %v931_v42, %v912_v6  ;;  %v1099_v20 = vmul.f32 %v1089_v58, %v1067_v12  ;;  %v1100_v25 = vmul.f32 %v1090_v61, %v1068_v2 }
 0x18d   :  { %v934_v57 = vpop.f32.mrf.mxu2  ;;  %v1091_v23 = vperm.slane %v4356_v52, 4 }
 0x18e   :  { %v1008_v11 = vmul.f32 %v4358_v50, %v894_v26  ;;  %v1009_v41 = vmul.f32 %v4358_v50, %v932_v19  ;;  %v1118_v59 = vpack.c.bf16 %v1100_v25, %v1099_v20 }
 0x190   :  { %v1052_v10 = vadd.f32 %v4365_v30, %v1008_v11  ;;  %v1053_v3 = vadd.f32 %v4365_v30, %v1009_v41  ;;  %1143 = vrot.lane.b32.xlu2 %v1118_v59, %s3868_s7 }
 0x192   :  { %v1072_v14 = vmax.f32 %v1052_v10, 0.0  ;;  %v1073_v56 = vmax.f32 %v1053_v3, 0.0  ;;  %v898_v15 = vpop.f32.mrf.mxu3 }
 0x193   :  { %v877_v16 = vpop.f32.mrf.mxu1  ;;  %v915_v17 = vpop.f32.mrf.mxu0 }
 0x194   :  { %v897_v21 = vadd.f32 %v896_v4, %v877_v16  ;;  %v935_v18 = vadd.f32 %v934_v57, %v915_v17  ;;  %v1104_v24 = vmul.f32 %v1089_v58, %v1072_v14  ;;  %v1105_v28 = vmul.f32 %v1090_v61, %v1073_v56 }
 0x195   :  { %v936_v34 = vpop.f32.mrf.mxu2 }
 0x196   :  { %v1013_v29 = vmul.f32 %v4345_v9, %v897_v21  ;;  %v1014_v54 = vmul.f32 %v4345_v9, %v935_v18  ;;  %v1121_v31 = vpack.c.bf16 %v1105_v28, %v1104_v24 }
 0x198   :  { %v1057_v49 = vadd.f32 %v4341_v38, %v1013_v29  ;;  %v1058_v33 = vadd.f32 %v4341_v38, %v1014_v54  ;;  %1149 = vrot.lane.b32.xlu1 %v1121_v31, %s3868_s7 }
 0x19a   :  { %v1077_v55 = vmax.f32 %v1057_v49, 0.0  ;;  %v1078_v51 = vmax.f32 %v1058_v33, 0.0  ;;  %v953_v43 = vpop.f32.mrf.mxu3 }
 0x19b   :  { %v879_v45 = vpop.f32.mrf.mxu1  ;;  %v917_v36 = vpop.f32.mrf.mxu0 }
 0x19c   :  { %v899_v53 = vadd.f32 %v898_v15, %v879_v45  ;;  %v937_v27 = vadd.f32 %v936_v34, %v917_v36  ;;  %v1109_v35 = vmul.f32 %v1089_v58, %v1077_v55  ;;  %v1110_v32 = vmul.f32 %v1090_v61, %v1078_v51 }
 0x19e   :  { %v1018_v46 = vmul.f32 %v4339_v40, %v899_v53  ;;  %v1019_v8 = vmul.f32 %v4339_v40, %v937_v27  ;;  %v1124_v47 = vpack.c.bf16 %v1110_v32, %v1109_v35 }
 0x1a0   :  { %v1062_v39 = vadd.f32 %v4343_v44, %v1018_v46  ;;  %v1063_v48 = vadd.f32 %v4343_v44, %v1019_v8  ;;  %1155 = vrot.lane.b32.xlu1 %v1124_v47, %s3868_s7 }
 0x1a2   :  { %v1082_v37 = vmax.f32 %v1062_v39, 0.0  ;;  %v1083_v60 = vmax.f32 %v1063_v48, 0.0  ;;  %v955_v7 = vpop.f32.mrf.mxu3 }
 0x1a3   :  { %v948_v0 = vpop.f32.mrf.mxu1 }
 0x1a4   :  { %v1114_v42 = vmul.f32 %v1089_v58, %v1082_v37  ;;  %v1115_v62 = vmul.f32 %v1090_v61, %v1083_v60 }
 0x1a6   :  { %v1127_v63 = vpack.c.bf16 %v1115_v62, %v1114_v42 }
 0x1a8   :  { %1161 = vrot.lane.b32.xlu0 %v1127_v63, %s3868_s7 }
 0x1aa   :  { %v967_v1 = vpop.f32.mrf.mxu3 }
 0x1ab   :  { %v968_v12 = vadd.f32 %v967_v1, %v948_v0  ;;  %v950_v6 = vpop.f32.mrf.mxu1 }
 0x1ad   :  { %v1005_v2 = vmul.f32 %v4347_v5, %v968_v12 }
 0x1af   :  { %v1049_v4 = vadd.f32 %v4350_v22, %v1005_v2 }
 0x1b1   :  { %v1069_v26 = vmax.f32 %v1049_v4, 0.0 }
 0x1b2   :  { %v969_v58 = vpop.f32.mrf.mxu3 }
 0x1b3   :  { %v970_v61 = vadd.f32 %v969_v58, %v950_v6  ;;  %v1101_v19 = vmul.f32 %v1091_v23, %v1069_v26 }
 0x1b5   :  { %v1010_v5 = vmul.f32 %v4358_v50, %v970_v61  ;;  %v1119_v20 = vpack.c.bf16 %v1101_v19, %v1101_v19 }
 0x1b7   :  { %v1054_v22 = vadd.f32 %v4365_v30, %v1010_v5  ;;  %1145 = vrot.lane.b32.xlu1 %v1119_v20, %s3868_s7 }
 0x1b9   :  { %v1074_v52 = vmax.f32 %v1054_v22, 0.0 }
 0x1ba   :  { %v972_v25 = vpop.f32.mrf.mxu3 }
 0x1bb   :  { %v973_v11 = vadd.f32 %v972_v25, %v953_v43  ;;  %v1106_v41 = vmul.f32 %v1091_v23, %v1074_v52 }
 0x1bd   :  { %v1015_v59 = vmul.f32 %v4345_v9, %v973_v11  ;;  %v1122_v57 = vpack.c.bf16 %v1106_v41, %v1106_v41 }
 0x1bf   :  { %v1059_v10 = vadd.f32 %v4341_v38, %v1015_v59  ;;  %1151 = vrot.lane.b32.xlu2 %v1122_v57, %s3868_s7 }
 0x1c1   :  { %v1079_v3 = vmax.f32 %v1059_v10, 0.0 }
 0x1c2   :  { %v974_v14 = vpop.f32.mrf.mxu3 }
 0x1c3   :  { %v975_v56 = vadd.f32 %v974_v14, %v955_v7  ;;  %v1111_v50 = vmul.f32 %v1091_v23, %v1079_v3 }
 0x1c5   :  { %v1020_v15 = vmul.f32 %v4339_v40, %v975_v56  ;;  %v1125_v30 = vpack.c.bf16 %v1111_v50, %v1111_v50 }
 0x1c7   :  { %v1064_v16 = vadd.f32 %v4343_v44, %v1020_v15  ;;  %1157 = vrot.lane.b32.xlu2 %v1125_v30, %s3868_s7 }
 0x1c9   :  { %v1084_v17 = vmax.f32 %v1064_v16, 0.0 }
 0x1cb   :  { %v1116_v21 = vmul.f32 %v1091_v23, %v1084_v17 }
 0x1cd   :  { %v1128_v18 = vpack.c.bf16 %v1116_v21, %v1116_v21 }
 0x1cf   :  { %1163 = vrot.lane.b32.xlu0 %v1128_v18, %s3868_s7 }
 0x1dc   :  { %v1142_v38 = vpop.permute.xlu1 %1141  ;;  %v4421_v9 = vpop.permute.xlu2 %1159 }
 0x1dd   :  { %v1165_v40 = vrot.slane %v1142_v38, 4  ;;  %v1171_v44 = vrot.slane %v4421_v9, 4 }
 0x1df   :  { %v1174_v28 = vsel %vm1173_vm14, %v1165_v40, %v1142_v38  ;;  %v1186_v29 = vsel %vm1173_vm14, %v1171_v44, %v4421_v9 }
 0x1e0   :  { %1205 = vst.msk [vmem:[#allocation2] sm:$0xff] %vm4423_vm15, %v1174_v28 }
 0x1e1   :  { %1215 = vst.msk [vmem:[#allocation2 + $0x48] sm:$0xff] %vm4423_vm15, %v1186_v29 }
 0x1e4   :  { %v1148_v54 = vpop.permute.xlu0 %1147 }
 0x1e5   :  { %v1167_v31 = vrot.slane %v1148_v54, 4 }
 0x1e7   :  { %v1218_v49 = vld [vmem:[#allocation2] sm:$0xff]  ;;  %v1178_v33 = vsel %vm1173_vm14, %v1167_v31, %v1148_v54 }
 0x1e8   :  { %1230 = vst [vmem:[#allocation4] sm:$0xff] %v1218_v49  ;;  %v4438_v34 = vld [vmem:[#allocation2 + $0x48] sm:$0xff]  ;;  %1666 = vrot.lane.b32.xlu0 %v1218_v49, %s3861_s15  ;;  %1870 = vrot.lane.b32.xlu1 %v1218_v49, %s3859_s9 }
 0x1e9   :  { %1239 = vst [vmem:[#allocation4 + $0x3c] sm:$0xff] %v4438_v34  ;;  %1766 = vrot.lane.b32.xlu2 %v1218_v49, %s3860_s10 }
 0x1ea   :  { %1209 = vst.msk [vmem:[#allocation2 + $0x18] sm:$0xff] %vm4423_vm15, %v1178_v33  ;;  %v4446_v55 = vpop.permute.xlu2 %1143 }
 0x1eb   :  { %v1166_v51 = vrot.slane %v4446_v55, 4 }
 0x1ec   :  { %v1154_v43 = vpop.permute.xlu0 %1153 }
 0x1ed   :  { %v1175_v45 = vsel %vm85_vm0, %v1165_v40, %v1166_v51  ;;  %v1169_v36 = vrot.slane %v1154_v43, 4 }
 0x1ee   :  { %v4454_v53 = vsel %vm1173_vm14, %v1175_v45, %v4446_v55 }
 0x1ef   :  { %v1182_v27 = vsel %vm1173_vm14, %v1169_v36, %v1154_v43  ;;  %1231 = vst [vmem:[#allocation4 + $0x8] sm:$0xff] %v4454_v53 }
 0x1f0   :  { %1266 = vrot.lane.b32.xlu0 %v1218_v49, %s3866_s20  ;;  %1466 = vrot.lane.b32.xlu1 %v1218_v49, %s3863_s17  ;;  %1212 = vst.msk [vmem:[#allocation2 + $0x30] sm:$0xff] %vm4423_vm15, %v1182_v27 }
 0x1f1   :  { %v1221_v35 = vld [vmem:[#allocation2 + $0x18] sm:$0xff]  ;;  %1366 = vrot.lane.b32.xlu2 %v1218_v49, %s3864_s18 }
 0x1f2   :  { %1233 = vst [vmem:[#allocation4 + $0x14] sm:$0xff] %v1221_v35 }
 0x1f7   :  { %v1224_v32 = vld [vmem:[#allocation2 + $0x30] sm:$0xff] }
 0x1f8   :  { %1974 = vrot.lane.b32.xlu0 %v1218_v49, %s3865_s19  ;;  %1566 = vrot.lane.b32.xlu1 %v1218_v49, %s3862_s16  ;;  %1236 = vst [vmem:[#allocation4 + $0x28] sm:$0xff] %v1224_v32 }
 0x1f9   :  { %1672 = vrot.lane.b32.xlu2 %v1221_v35, %s3861_s15 }
 0x200   :  { %1876 = vrot.lane.b32.xlu0 %v1221_v35, %s3859_s9  ;;  %1772 = vrot.lane.b32.xlu1 %v1221_v35, %s3860_s10 }
 0x201   :  { %1272 = vrot.lane.b32.xlu2 %v1221_v35, %s3866_s20 }
 0x208   :  { %1472 = vrot.lane.b32.xlu0 %v1221_v35, %s3863_s17  ;;  %1372 = vrot.lane.b32.xlu1 %v1221_v35, %s3864_s18 }
 0x209   :  { %1980 = vrot.lane.b32.xlu2 %v1221_v35, %s3865_s19 }
 0x20a   :  { %v1150_v46 = vpop.permute.xlu1 %1149 }
 0x20b   :  { %v1168_v8 = vrot.slane %v1150_v46, 4 }
 0x20d   :  { %v1179_v47 = vsel %vm85_vm0, %v1167_v31, %v1168_v8 }
 0x20e   :  { %v4478_v39 = vsel %vm1173_vm14, %v1179_v47, %v1150_v46 }
 0x20f   :  { %1234 = vst [vmem:[#allocation4 + $0x1c] sm:$0xff] %v4478_v39 }
 0x210   :  { %1572 = vrot.lane.b32.xlu0 %v1221_v35, %s3862_s16  ;;  %1678 = vrot.lane.b32.xlu1 %v1224_v32, %s3861_s15 }
 0x211   :  { %1478 = vrot.lane.b32.xlu2 %v1224_v32, %s3863_s17 }
 0x212   :  { %v1156_v13 = vpop.permute.xlu1 %1155 }
 0x213   :  { %v1170_v48 = vrot.slane %v1156_v13, 4 }
 0x215   :  { %v1183_v37 = vsel %vm85_vm0, %v1169_v36, %v1170_v48 }
 0x216   :  { %v4486_v60 = vsel %vm1173_vm14, %v1183_v37, %v1156_v13 }
 0x217   :  { %1237 = vst [vmem:[#allocation4 + $0x30] sm:$0xff] %v4486_v60 }
 0x218   :  { %1882 = vrot.lane.b32.xlu0 %v1224_v32, %s3859_s9  ;;  %1278 = vrot.lane.b32.xlu1 %v1224_v32, %s3866_s20 }
 0x219   :  { %1578 = vrot.lane.b32.xlu2 %v1224_v32, %s3862_s16  ;;  %v1152_v7 = vpop.permute.xlu2 %1151 }
 0x21a   :  { %v1181_v42 = vsel %vm1173_vm14, %v1168_v8, %v1152_v7  ;;  %v1162_v62 = vpop.permute.xlu0 %1161 }
 0x21b   :  { %1211 = vst.msk [vmem:[#allocation2 + $0x28] sm:$0xf] %vm1207_vm13, %v1181_v42  ;;  %v1172_v63 = vrot.slane %v1162_v62, 4 }
 0x21d   :  { %v1187_v0 = vsel %vm85_vm0, %v1171_v44, %v1172_v63 }
 0x21e   :  { %v4498_v1 = vsel %vm1173_vm14, %v1187_v0, %v1162_v62 }
 0x21f   :  { %1240 = vst [vmem:[#allocation4 + $0x44] sm:$0xff] %v4498_v1 }
 0x220   :  { %1778 = vrot.lane.b32.xlu0 %v1224_v32, %s3860_s10  ;;  %1484 = vrot.lane.b32.xlu1 %v4438_v34, %s3863_s17 }
 0x221   :  { %1986 = vrot.lane.b32.xlu2 %v1224_v32, %s3865_s19  ;;  %v1158_v12 = vpop.permute.xlu2 %1157 }
 0x222   :  { %v1223_v2 = vld [vmem:[#allocation2 + $0x28] sm:$0xf]  ;;  %v1185_v4 = vsel %vm1173_vm14, %v1170_v48, %v1158_v12 }
 0x223   :  { %1235 = vst.msk [vmem:[#allocation4 + $0x24] sm:$0xf] %vm50_vm7, %v1223_v2  ;;  %v1347_v29 = vld [vmem:[#allocation2 + $0x28] sm:$0xf] }
 0x224   :  { %1214 = vst.msk [vmem:[#allocation2 + $0x40] sm:$0xf] %vm1207_vm13, %v1185_v4  ;;  %v1247_v62 = vld [vmem:[#allocation2 + $0x28] sm:$0xf] }
 0x228   :  { %1378 = vrot.lane.b32.xlu0 %v1224_v32, %s3864_s18  ;;  %1584 = vrot.lane.b32.xlu1 %v4438_v34, %s3862_s16 }
 0x229   :  { %v1146_v23 = vpop.permute.xlu1 %1145  ;;  %1888 = vrot.lane.b32.xlu2 %v4438_v34, %s3859_s9 }
 0x22a   :  { %v1177_v6 = vsel %vm1173_vm14, %v1166_v51, %v1146_v23 }
 0x22b   :  { %v1226_v26 = vld [vmem:[#allocation2 + $0x40] sm:$0xf]  ;;  %1208 = vst.msk [vmem:[#allocation2 + $0x10] sm:$0xf] %vm1207_vm13, %v1177_v6 }
 0x22c   :  { %1238 = vst.msk [vmem:[#allocation4 + $0x38] sm:$0xf] %vm50_vm7, %v1226_v26  ;;  %v1350_v55 = vld [vmem:[#allocation2 + $0x40] sm:$0xf] }
 0x22d   :  { %v1450_v32 = vld [vmem:[#allocation2 + $0x40] sm:$0xf] }
 0x22e   :  { %v1250_v46 = vld [vmem:[#allocation2 + $0x40] sm:$0xf] }
 0x22f   :  { %v4680_v42 = vld [vmem:[#allocation2 + $0x40] sm:$0xff] }
 0x230   :  { %1684 = vrot.lane.b32.xlu0 %v4438_v34, %s3861_s15  ;;  %1992 = vrot.lane.b32.xlu1 %v4438_v34, %s3865_s19 }
 0x231   :  { %1784 = vrot.lane.b32.xlu2 %v4438_v34, %s3860_s10 }
 0x232   :  { %v1220_v58 = vld [vmem:[#allocation2 + $0x10] sm:$0xf] }
 0x233   :  { %1232 = vst.msk [vmem:[#allocation4 + $0x10] sm:$0xf] %vm50_vm7, %v1220_v58  ;;  %v1344_v18 = vld [vmem:[#allocation2 + $0x10] sm:$0xf] }
 0x234   :  { %v1444_v33 = vld [vmem:[#allocation2 + $0x10] sm:$0xf] }
 0x238   :  { %1284 = vrot.lane.b32.xlu0 %v4438_v34, %s3866_s20  ;;  %1668 = vrot.lane.b32.xlu1 %v4454_v53, %s3861_s15 }
 0x239   :  { %1384 = vrot.lane.b32.xlu2 %v4438_v34, %s3864_s18  ;;  %v1447_v34 = vld [vmem:[#allocation2 + $0x28] sm:$0xf] }
 0x240   :  { %1768 = vrot.lane.b32.xlu0 %v4454_v53, %s3860_s10  ;;  %1268 = vrot.lane.b32.xlu1 %v4454_v53, %s3866_s20 }
 0x241   :  { %v1164_v61 = vpop.permute.xlu0 %1163  ;;  %1872 = vrot.lane.b32.xlu2 %v4454_v53, %s3859_s9 }
 0x242   :  { %v1189_v19 = vsel %vm1173_vm14, %v1172_v63, %v1164_v61  ;;  %v1244_v63 = vld [vmem:[#allocation2 + $0x10] sm:$0xf]  ;;  %vm2668_vm14 = vcmask 261120  }
 0x243   :  { %1217 = vst.msk [vmem:[#allocation2 + $0x58] sm:$0xf] %vm1207_vm13, %v1189_v19  ;;  %v4539_v5 = vpop.permute.xlu2 %1766 }
 0x248   :  { %1368 = vrot.lane.b32.xlu0 %v4454_v53, %s3864_s18  ;;  %1976 = vrot.lane.b32.xlu1 %v4454_v53, %s3865_s19 }
 0x249   :  { %1468 = vrot.lane.b32.xlu2 %v4454_v53, %s3863_s17 }
 0x24a   :  { %v1229_v20 = vld [vmem:[#allocation2 + $0x58] sm:$0xf] }
 0x24b   :  { %1241 = vst.msk [vmem:[#allocation4 + $0x4c] sm:$0xf] %vm50_vm7, %v1229_v20  ;;  %v4548_v22 = vpop.permute.xlu2 %1366  ;;  %v1453_v8 = vld [vmem:[#allocation2 + $0x58] sm:$0xf] }
 0x24c   :  { %v1253_v20 = vld [vmem:[#allocation2 + $0x58] sm:$0xf] }
 0x250   :  { %1674 = vrot.lane.b32.xlu0 %v4478_v39, %s3861_s15  ;;  %1878 = vrot.lane.b32.xlu1 %v4478_v39, %s3859_s9 }
 0x251   :  { %1568 = vrot.lane.b32.xlu2 %v4454_v53, %s3862_s16 }
 0x253   :  { %v4556_v52 = vpop.permute.xlu2 %1672 }
 0x258   :  { %1274 = vrot.lane.b32.xlu0 %v4478_v39, %s3866_s20  ;;  %1474 = vrot.lane.b32.xlu1 %v4478_v39, %s3863_s17 }
 0x259   :  { %1774 = vrot.lane.b32.xlu2 %v4478_v39, %s3860_s10 }
 0x25a   :  { %v4564_v25 = vpop.permute.xlu0 %1666  ;;  %v1871_v11 = vpop.permute.xlu1 %1870 }
 0x25b   :  { %v4566_v41 = vpop.permute.xlu2 %1272  ;;  %v1894_v36 = vrot.slane %v1871_v11, 4  ;;  %v1690_v12 = vrot.slane %v4564_v25, 4 }
 0x260   :  { %1982 = vrot.lane.b32.xlu0 %v4478_v39, %s3865_s19  ;;  %1574 = vrot.lane.b32.xlu1 %v4478_v39, %s3862_s16 }
 0x261   :  { %1374 = vrot.lane.b32.xlu2 %v4478_v39, %s3864_s18 }
 0x262   :  { %v4574_v59 = vpop.permute.xlu0 %1266  ;;  %v4576_v57 = vpop.permute.xlu1 %1466 }
 0x263   :  { %v4578_v10 = vpop.permute.xlu2 %1980  ;;  %v1490_v48 = vrot.slane %v4576_v57, 4 }
 0x268   :  { %1480 = vrot.lane.b32.xlu0 %v4486_v60, %s3863_s17  ;;  %1884 = vrot.lane.b32.xlu1 %v4486_v60, %s3859_s9 }
 0x269   :  { %1680 = vrot.lane.b32.xlu2 %v4486_v60, %s3861_s15 }
 0x26a   :  { %v4586_v3 = vpop.permute.xlu0 %1974  ;;  %v4588_v14 = vpop.permute.xlu1 %1566 }
 0x26b   :  { %v4590_v56 = vpop.permute.xlu2 %1478  ;;  %v1590_v23 = vrot.slane %v4588_v14, 4 }
 0x270   :  { %1580 = vrot.lane.b32.xlu0 %v4486_v60, %s3862_s16  ;;  %1780 = vrot.lane.b32.xlu1 %v4486_v60, %s3860_s10 }
 0x271   :  { %1280 = vrot.lane.b32.xlu2 %v4486_v60, %s3866_s20 }
 0x272   :  { %v4598_v50 = vpop.permute.xlu0 %1876  ;;  %v4600_v15 = vpop.permute.xlu1 %1772 }
 0x273   :  { %v4602_v30 = vpop.permute.xlu2 %1578 }
 0x278   :  { %1988 = vrot.lane.b32.xlu0 %v4486_v60, %s3865_s19  ;;  %1380 = vrot.lane.b32.xlu1 %v4486_v60, %s3864_s18 }
 0x279   :  { %1486 = vrot.lane.b32.xlu2 %v4498_v1, %s3863_s17 }
 0x27a   :  { %v4610_v16 = vpop.permute.xlu0 %1472  ;;  %v4612_v17 = vpop.permute.xlu1 %1372 }
 0x27b   :  { %v4614_v21 = vpop.permute.xlu2 %1986 }
 0x280   :  { %1890 = vrot.lane.b32.xlu0 %v4498_v1, %s3859_s9  ;;  %1370 = vrot.lane.b32.xlu1 %v1344_v18, %s3864_s18  ;;  %v1790_v18 = vrot.slane %v4539_v5, 4 }
 0x281   :  { %1586 = vrot.lane.b32.xlu2 %v4498_v1, %s3862_s16 }
 0x282   :  { %v4621_v38 = vpop.permute.xlu0 %1572  ;;  %v4623_v9 = vpop.permute.xlu1 %1678 }
 0x283   :  { %v4625_v24 = vpop.permute.xlu2 %1888 }
 0x288   :  { %1786 = vrot.lane.b32.xlu0 %v4498_v1, %s3860_s10  ;;  %1686 = vrot.lane.b32.xlu1 %v4498_v1, %s3861_s15 }
 0x289   :  { %1994 = vrot.lane.b32.xlu2 %v4498_v1, %s3865_s19 }
 0x28a   :  { %v4633_v40 = vpop.permute.xlu0 %1882  ;;  %v4635_v44 = vpop.permute.xlu1 %1278 }
 0x28b   :  { %v4637_v28 = vpop.permute.xlu2 %1784 }
 0x290   :  { %1386 = vrot.lane.b32.xlu0 %v4498_v1, %s3864_s18  ;;  %1286 = vrot.lane.b32.xlu1 %v4498_v1, %s3866_s20 }
 0x291   :  { %1376 = vrot.lane.b32.xlu2 %v1347_v29, %s3864_s18  ;;  %v1290_v29 = vrot.slane %v4574_v59, 4 }
 0x292   :  { %v4644_v54 = vpop.permute.xlu0 %1778  ;;  %v4646_v31 = vpop.permute.xlu1 %1484 }
 0x293   :  { %v4648_v49 = vpop.permute.xlu2 %1384 }
 0x298   :  { %1470 = vrot.lane.b32.xlu0 %v1444_v33, %s3863_s17  ;;  %1476 = vrot.lane.b32.xlu1 %v1447_v34, %s3863_s17 }
 0x299   :  { %1382 = vrot.lane.b32.xlu2 %v1350_v55, %s3864_s18  ;;  %v1793_v55 = vrot.slane %v4600_v15, 4 }
 0x29a   :  { %v4653_v51 = vpop.permute.xlu0 %1378  ;;  %v4655_v43 = vpop.permute.xlu1 %1584 }
 0x29b   :  { %v4657_v45 = vpop.permute.xlu2 %1872 }
 0x29c   :  { %v5442_v53 = vrot.slane %v4657_v45, 4 }
 0x29e   :  { %v1906_v27 = vsel %vm85_vm0, %v1894_v36, %v5442_v53 }
 0x29f   :  { %v1907_v35 = vsel %vm395_vm2, %v1871_v11, %v1906_v27  ;;  %v1353_v11 = vld [vmem:[#allocation2 + $0x58] sm:$0xf] }
 0x2a0   :  { %1938 = vst [vmem:[#allocation4 + $0x230] sm:$0xff] %v1907_v35  ;;  %1482 = vrot.lane.b32.xlu1 %v1450_v32, %s3863_s17  ;;  %1282 = vrot.lane.b32.xlu0 %v1250_v46, %s3866_s20 }
 0x2a1   :  { %1488 = vrot.lane.b32.xlu2 %v1453_v8, %s3863_s17 }
 0x2a2   :  { %v4667_v47 = vpop.permute.xlu0 %1684  ;;  %v4669_v39 = vpop.permute.xlu1 %1992 }
 0x2a3   :  { %v4671_v13 = vpop.permute.xlu2 %1468 }
 0x2a4   :  { %v1491_v37 = vrot.slane %v4671_v13, 4 }
 0x2a6   :  { %v1502_v60 = vsel %vm85_vm0, %v1490_v48, %v1491_v37 }
 0x2a7   :  { %v1503_v7 = vsel %vm189_vm5, %v4576_v57, %v1502_v60  ;;  %v4737_v60 = vld [vmem:[#allocation2 + $0x28] sm:$0xff] }
 0x2a8   :  { %1530 = vst [vmem:[#allocation4 + $0xf0] sm:$0xff] %v1503_v7  ;;  %1886 = vrot.lane.b32.xlu1 %v4680_v42, %s3859_s9  ;;  %1276 = vrot.lane.b32.xlu0 %v1247_v62, %s3866_s20  ;;  %v4739_v7 = vld [vmem:[#allocation2 + $0x10] sm:$0xff]  ;;  %v1998_v62 = vrot.slane %v4586_v3, 4 }
 0x2a9   :  { %1270 = vrot.lane.b32.xlu2 %v1244_v63, %s3866_s20 }
 0x2aa   :  { %v4686_v0 = vpop.permute.xlu0 %1284  ;;  %v4688_v1 = vpop.permute.xlu1 %1668 }
 0x2ab   :  { %v5444_v2 = vrot.slane %v4688_v1, 4  ;;  %v4692_v4 = vpop.permute.xlu2 %1568 }
 0x2ac   :  { %v5434_v6 = vrot.slane %v4692_v4, 4 }
 0x2ad   :  { %v1702_v26 = vsel %vm85_vm0, %v1690_v12, %v5444_v2 }
 0x2ae   :  { %v1703_v58 = vsel %vm291_vm3, %v4564_v25, %v1702_v26  ;;  %v1602_v61 = vsel %vm85_vm0, %v1590_v23, %v5434_v6  ;;  %v1393_v26 = vrot.slane %v4612_v17, 4 }
 0x2af   :  { %1730 = vst [vmem:[#allocation4 + $0x190] sm:$0xff] %v1703_v58  ;;  %v1603_v19 = vsel %vm240_vm4, %v4588_v14, %v1602_v61 }
 0x2b0   :  { %1630 = vst [vmem:[#allocation4 + $0x140] sm:$0xff] %v1603_v19  ;;  %1288 = vrot.lane.b32.xlu1 %v1253_v20, %s3866_s20  ;;  %1388 = vrot.lane.b32.xlu0 %v1353_v11, %s3864_s18 }
 0x2b1   :  { %1782 = vrot.lane.b32.xlu2 %v4680_v42, %s3860_s10 }
 0x2b2   :  { %v4710_v57 = vpop.permute.xlu0 %1768  ;;  %v4712_v25 = vpop.permute.xlu1 %1268 }
 0x2b3   :  { %v5441_v14 = vrot.slane %v4710_v57, 4  ;;  %v1291_v33 = vrot.slane %v4712_v25, 4  ;;  %v4718_v34 = vpop.permute.xlu2 %1774 }
 0x2b4   :  { %v1794_v36 = vrot.slane %v4718_v34, 4 }
 0x2b5   :  { %v1802_v27 = vsel %vm85_vm0, %v1790_v18, %v5441_v14  ;;  %v1302_v35 = vsel %vm85_vm0, %v1290_v29, %v1291_v33 }
 0x2b6   :  { %v1803_v32 = vsel %vm342_vm1, %v4539_v5, %v1802_v27  ;;  %v1303_v46 = vsel %vm87_vm9, %v4574_v59, %v1302_v35  ;;  %v1807_v8 = vsel %vm85_vm0, %v1793_v55, %v1794_v36  ;;  %v1650_v55 = vld [vmem:[#allocation2 + $0x40] sm:$0xf]  ;;  %v4776_v27 = vld [vmem:[#allocation2 + $0x58] sm:$0xff]  ;;  %v1693_v35 = vrot.slane %v4556_v52, 4 }
 0x2b7   :  { %1834 = vst [vmem:[#allocation4 + $0x1e0] sm:$0xff] %v1803_v32  ;;  %v1808_v48 = vsel %vm342_vm1, %v4600_v15, %v1807_v8  ;;  %v1390_v15 = vrot.slane %v4548_v22, 4 }
 0x2b8   :  { %1330 = vst [vmem:[#allocation4 + $0x50] sm:$0xff] %v1303_v46  ;;  %1880 = vrot.lane.b32.xlu1 %v4737_v60, %s3859_s9  ;;  %1874 = vrot.lane.b32.xlu0 %v4739_v7, %s3859_s9 }
 0x2b9   :  { %1837 = vst [vmem:[#allocation4 + $0x1f4] sm:$0xff] %v1808_v48  ;;  %1776 = vrot.lane.b32.xlu2 %v4737_v60, %s3860_s10  ;;  %v1696_v48 = vrot.slane %v4623_v9, 4 }
 0x2ba   :  { %v4747_v5 = vpop.permute.xlu0 %1368  ;;  %v4749_v59 = vpop.permute.xlu1 %1976 }
 0x2bb   :  { %v1391_v63 = vrot.slane %v4747_v5, 4  ;;  %v5433_v12 = vrot.slane %v4749_v59, 4  ;;  %v4755_v23 = vpop.permute.xlu2 %1374 }
 0x2bc   :  { %v1394_v58 = vrot.slane %v4755_v23, 4 }
 0x2bd   :  { %v1402_v61 = vsel %vm85_vm0, %v1390_v15, %v1391_v63  ;;  %v2010_v19 = vsel %vm85_vm0, %v1998_v62, %v5433_v12  ;;  %v1653_v12 = vld [vmem:[#allocation2 + $0x58] sm:$0xf] }
 0x2be   :  { %v1403_v20 = vsel %vm138_vm6, %v4548_v22, %v1402_v61  ;;  %v2011_v11 = vsel %vm448_vm8, %v4586_v3, %v2010_v19  ;;  %v1406_v18 = vsel %vm85_vm0, %v1393_v26, %v1394_v58 }
 0x2bf   :  { %1430 = vst [vmem:[#allocation4 + $0xa0] sm:$0xff] %v1403_v20  ;;  %v1407_v29 = vsel %vm138_vm6, %v4612_v17, %v1406_v18  ;;  %v1897_v17 = vrot.slane %v4598_v50, 4  ;;  %v1550_v18 = vld [vmem:[#allocation2 + $0x40] sm:$0xf] }
 0x2c0   :  { %2042 = vst [vmem:[#allocation4 + $0x280] sm:$0xff] %v2011_v11  ;;  %1770 = vrot.lane.b32.xlu1 %v4739_v7, %s3860_s10  ;;  %1682 = vrot.lane.b32.xlu0 %v1650_v55, %s3861_s15  ;;  %v1293_v55 = vrot.slane %v4566_v41, 4 }
 0x2c1   :  { %1433 = vst [vmem:[#allocation4 + $0xb4] sm:$0xff] %v1407_v29  ;;  %1892 = vrot.lane.b32.xlu2 %v4776_v27, %s3859_s9  ;;  %v1644_v29 = vld [vmem:[#allocation2 + $0x10] sm:$0xf] }
 0x2c2   :  { %v4781_v22 = vpop.permute.xlu0 %1674  ;;  %v4783_v3 = vpop.permute.xlu1 %1878 }
 0x2c3   :  { %v5435_v32 = vrot.slane %v4781_v22, 4  ;;  %v5443_v46 = vrot.slane %v4783_v3, 4  ;;  %v4789_v8 = vpop.permute.xlu2 %1680 }
 0x2c4   :  { %v5439_v15 = vrot.slane %v4789_v8, 4 }
 0x2c5   :  { %v1706_v62 = vsel %vm85_vm0, %v1693_v35, %v5435_v32  ;;  %v1911_v26 = vsel %vm85_vm0, %v1897_v17, %v5443_v46  ;;  %v1493_v35 = vrot.slane %v4610_v16, 4  ;;  %v1547_v32 = vld [vmem:[#allocation2 + $0x28] sm:$0xf] }
 0x2c6   :  { %v1707_v61 = vsel %vm291_vm3, %v4556_v52, %v1706_v62  ;;  %v1912_v19 = vsel %vm395_vm2, %v4598_v50, %v1911_v26  ;;  %v1710_v20 = vsel %vm85_vm0, %v1696_v48, %v5439_v15  ;;  %v1296_v62 = vrot.slane %v4635_v44, 4 }
 0x2c7   :  { %1733 = vst [vmem:[#allocation4 + $0x1a4] sm:$0xff] %v1707_v61  ;;  %v1711_v11 = vsel %vm291_vm3, %v4623_v9, %v1710_v20 }
 0x2c8   :  { %1941 = vst [vmem:[#allocation4 + $0x244] sm:$0xff] %v1912_v19  ;;  %1582 = vrot.lane.b32.xlu1 %v1550_v18, %s3862_s16  ;;  %1788 = vrot.lane.b32.xlu0 %v4776_v27, %s3860_s10 }
 0x2c9   :  { %1736 = vst [vmem:[#allocation4 + $0x1b8] sm:$0xff] %v1711_v11  ;;  %1670 = vrot.lane.b32.xlu2 %v1644_v29, %s3861_s15 }
 0x2ca   :  { %v4812_v52 = vpop.permute.xlu0 %1274  ;;  %v4814_v50 = vpop.permute.xlu1 %1474 }
 0x2cb   :  { %v1294_v9 = vrot.slane %v4812_v52, 4  ;;  %v1494_v17 = vrot.slane %v4814_v50, 4  ;;  %v4820_v48 = vpop.permute.xlu2 %1280 }
 0x2cc   :  { %v1297_v26 = vrot.slane %v4820_v48, 4 }
 0x2cd   :  { %v1306_v61 = vsel %vm85_vm0, %v1293_v55, %v1294_v9  ;;  %v1506_v19 = vsel %vm85_vm0, %v1493_v35, %v1494_v17  ;;  %v1647_v55 = vld [vmem:[#allocation2 + $0x28] sm:$0xf]  ;;  %v2001_v35 = vrot.slane %v4578_v10, 4 }
 0x2ce   :  { %v1307_v20 = vsel %vm87_vm9, %v4566_v41, %v1306_v61  ;;  %v1507_v11 = vsel %vm189_vm5, %v4610_v16, %v1506_v19  ;;  %v1310_v18 = vsel %vm85_vm0, %v1296_v62, %v1297_v26  ;;  %v1593_v62 = vrot.slane %v4621_v38, 4 }
 0x2cf   :  { %1333 = vst [vmem:[#allocation4 + $0x64] sm:$0xff] %v1307_v20  ;;  %v1311_v29 = vsel %vm87_vm9, %v4635_v44, %v1310_v18 }
 0x2d0   :  { %1533 = vst [vmem:[#allocation4 + $0x104] sm:$0xff] %v1507_v11  ;;  %1688 = vrot.lane.b32.xlu1 %v1653_v12, %s3861_s15  ;;  %1676 = vrot.lane.b32.xlu0 %v1647_v55, %s3861_s15  ;;  %v1499_v12 = vrot.slane %v4646_v31, 4 }
 0x2d1   :  { %1336 = vst [vmem:[#allocation4 + $0x78] sm:$0xff] %v1311_v29  ;;  %1990 = vrot.lane.b32.xlu2 %v4680_v42, %s3865_s19 }
 0x2d2   :  { %v4843_v41 = vpop.permute.xlu0 %1982  ;;  %v4845_v16 = vpop.permute.xlu1 %1574 }
 0x2d3   :  { %v5437_v44 = vrot.slane %v4843_v41, 4  ;;  %v5436_v61 = vrot.slane %v4845_v16, 4  ;;  %v4851_v19 = vpop.permute.xlu2 %1486 }
 0x2d4   :  { %v1500_v20 = vrot.slane %v4851_v19, 4 }
 0x2d5   :  { %v2015_v42 = vsel %vm85_vm0, %v2001_v35, %v5437_v44  ;;  %v1606_v11 = vsel %vm85_vm0, %v1593_v62, %v5436_v61  ;;  %v1544_v35 = vld [vmem:[#allocation2 + $0x10] sm:$0xf]  ;;  %v1553_v62 = vld [vmem:[#allocation2 + $0x58] sm:$0xf] }
 0x2d6   :  { %v2016_v18 = vsel %vm448_vm8, %v4578_v10, %v2015_v42  ;;  %v1607_v29 = vsel %vm240_vm4, %v4621_v38, %v1606_v11  ;;  %v1514_v55 = vsel %vm85_vm0, %v1499_v12, %v1500_v20  ;;  %v1496_v12 = vrot.slane %v4590_v56, 4 }
 0x2d7   :  { %2045 = vst [vmem:[#allocation4 + $0x294] sm:$0xff] %v2016_v18  ;;  %v1515_v6 = vsel %vm189_vm5, %v4646_v31, %v1514_v55  ;;  %v1900_v42 = vrot.slane %v4633_v40, 4 }
 0x2d8   :  { %1633 = vst [vmem:[#allocation4 + $0x154] sm:$0xff] %v1607_v29  ;;  %1576 = vrot.lane.b32.xlu1 %v1547_v32, %s3862_s16  ;;  %1570 = vrot.lane.b32.xlu0 %v1544_v35, %s3862_s16  ;;  %v1599_v32 = vrot.slane %v4655_v43, 4 }
 0x2d9   :  { %1539 = vst [vmem:[#allocation4 + $0x12c] sm:$0xff] %v1515_v6  ;;  %1588 = vrot.lane.b32.xlu2 %v1553_v62, %s3862_s16 }
 0x2da   :  { %v4873_v10 = vpop.permute.xlu0 %1480  ;;  %v4875_v38 = vpop.permute.xlu1 %1884 }
 0x2db   :  { %v1497_v31 = vrot.slane %v4873_v10, 4  ;;  %v1901_v11 = vrot.slane %v4875_v38, 4  ;;  %v4881_v18 = vpop.permute.xlu2 %1586 }
 0x2dc   :  { %v5438_v6 = vrot.slane %v4881_v18, 4 }
 0x2dd   :  { %v1510_v29 = vsel %vm85_vm0, %v1496_v12, %v1497_v31  ;;  %v1916_v55 = vsel %vm85_vm0, %v1900_v42, %v1901_v11  ;;  %v1596_v12 = vrot.slane %v4602_v30, 4  ;;  %v1796_v42 = vrot.slane %v4644_v54, 4 }
 0x2de   :  { %v1511_v35 = vsel %vm189_vm5, %v4590_v56, %v1510_v29  ;;  %v1917_v62 = vsel %vm395_vm2, %v4633_v40, %v1916_v55  ;;  %v1614_v61 = vsel %vm85_vm0, %v1599_v32, %v5438_v6  ;;  %v2962_v55 = vld [vmem:[%s5429_s5 + $0x10] sm:$0xff] }
 0x2df   :  { %1536 = vst [vmem:[#allocation4 + $0x118] sm:$0xff] %v1511_v35  ;;  %v1615_v44 = vsel %vm240_vm4, %v4655_v43, %v1614_v61  ;;  %v2960_v35 = vld [vmem:[%s5429_s5] sm:$0xff] }
 0x2e0   :  { %1944 = vst [vmem:[#allocation4 + $0x258] sm:$0xff] %v1917_v62  ;;  %1978 = vrot.lane.b32.xlu1 %v4739_v7, %s3865_s19  ;;  %1996 = vrot.lane.b32.xlu0 %v4776_v27, %s3865_s19  ;;  %v2007_v27 = vrot.slane %v4669_v39, 4  ;;  %v3785_v62 = vld [vmem:[#allocation4 + $0x128] sm:$0xf0]  ;;  %v3467_v14 = vld [vmem:[#allocation4 + $0x12c] sm:$0xf0] }
 0x2e1   :  { %1639 = vst [vmem:[#allocation4 + $0x17c] sm:$0xff] %v1615_v44  ;;  %1984 = vrot.lane.b32.xlu2 %v4737_v60, %s3865_s19  ;;  %v2961_v60 = vld [vmem:[%s5429_s5 + $0x8] sm:$0xff] }
 0x2e2   :  { %v4906_v56 = vpop.permute.xlu0 %1580  ;;  %v4908_v40 = vpop.permute.xlu1 %1780 }
 0x2e3   :  { %v5440_v43 = vrot.slane %v4906_v56, 4  ;;  %v1797_v61 = vrot.slane %v4908_v40, 4  ;;  %v4914_v7 = vpop.permute.xlu2 %1994 }
 0x2e4   :  { %v5445_v44 = vrot.slane %v4914_v7, 4 }
 0x2e5   :  { %v1610_v32 = vsel %vm85_vm0, %v1596_v12, %v5440_v43  ;;  %v1812_v29 = vsel %vm85_vm0, %v1796_v42, %v1797_v61 }
 0x2e6   :  { %v1611_v6 = vsel %vm240_vm4, %v4602_v30, %v1610_v32  ;;  %v1813_v15 = vsel %vm342_vm1, %v4644_v54, %v1812_v29  ;;  %v2025_v12 = vsel %vm85_vm0, %v2007_v27, %v5445_v44  ;;  %v3465_v42 = vld [vmem:[#allocation4 + $0x118] sm:$0xf]  ;;  %v3783_v43 = vld [vmem:[#allocation4 + $0x11c] sm:$0xf]  ;;  %v3780_v30 = vld [vmem:[#allocation4 + $0x100] sm:$0xf0] }
 0x2e7   :  { %1636 = vst [vmem:[#allocation4 + $0x168] sm:$0xff] %v1611_v6  ;;  %v2026_v53 = vsel %vm448_vm8, %v4669_v39, %v2025_v12  ;;  %v3466_v46 = vor.u32 %v3785_v62, %v3465_v42  ;;  %v3470_v2 = vor.u32 %v3783_v43, %v3467_v14  ;;  %v3447_v54 = vld [vmem:[#allocation4 + $0x104] sm:$0xf0]  ;;  %v2004_v32 = vrot.slane %v4614_v21, 4  ;;  %v3445_v6 = vld [vmem:[#allocation4 + $0xf0] sm:$0xf] }
 0x2e8   :  { %1840 = vst [vmem:[#allocation4 + $0x208] sm:$0xff] %v1813_v15  ;;  %2971 = vperm.xlu1 %3857, %v2961_v60   ;;  %2966 = vperm.xlu0 %3856, %v2960_v35   ;;  %v1396_v44 = vrot.slane %v4653_v51, 4  ;;  %v3446_v43 = vor.u32 %v3780_v30, %v3445_v6  ;;  %v3778_v60 = vld [vmem:[#allocation4 + $0xf4] sm:$0xf] }
 0x2e9   :  { %2051 = vst [vmem:[#allocation4 + $0x2bc] sm:$0xff] %v2026_v53  ;;  %2976 = vperm.xlu2 %3858, %v2962_v55   ;;  %2675 = vmatpush.bf16.msra.mxu0 %v3466_v46  ;;  %v3450_v53 = vor.u32 %v3778_v60, %v3447_v54  ;;  %v3004_v55 = vld [vmem:[%s5430_s6] sm:$0xff]  ;;  %v2963_v62 = vld [vmem:[%s5429_s5 + $0x18] sm:$0xff] }
 0x2ea   :  { %2732 = vmatpush.bf16.msra.mxu3 %v3470_v2  ;;  %v4943_v27 = vpop.permute.xlu0 %1988  ;;  %v1381_v29 = vpop.permute.xlu1 %1380 }
 0x2eb   :  { %v2005_v39 = vrot.slane %v4943_v27, 4  ;;  %v1397_v14 = vrot.slane %v1381_v29, 4  ;;  %v1377_v15 = vpop.permute.xlu2 %1376 }
 0x2ec   :  { %v1395_v35 = vrot.slane %v1377_v15, 4  ;;  %1435 = vst.msk [vmem:[#allocation4 + $0xc4] sm:$0xf] %vm50_vm7, %v1377_v15 }
 0x2ed   :  { %v2020_v2 = vsel %vm85_vm0, %v2004_v32, %v2005_v39  ;;  %v1410_v46 = vsel %vm85_vm0, %v1396_v44, %v1397_v14  ;;  %2676 = vmatpush.bf16.msra.mxu0 %v3446_v43  ;;  %v3005_v44 = vld [vmem:[%s5430_s6 + $0x8] sm:$0xff]  ;;  %v1903_v32 = vrot.slane %v4625_v24, 4 }
 0x2ee   :  { %v2021_v12 = vsel %vm448_vm8, %v4614_v21, %v2020_v2  ;;  %v1411_v42 = vsel %vm138_vm6, %v4653_v51, %v1410_v46  ;;  %v1408_v30 = vsel %vm85_vm0, %v1394_v58, %v1395_v35  ;;  %2733 = vmatpush.bf16.msra.mxu3 %v3450_v53  ;;  %v3007_v35 = vld [vmem:[%s5430_s6 + $0x18] sm:$0xff]  ;;  %v3006_v53 = vld [vmem:[%s5430_s6 + $0x10] sm:$0xff] }
 0x2ef   :  { %2048 = vst [vmem:[#allocation4 + $0x2a8] sm:$0xff] %v2021_v12  ;;  %v1409_v54 = vsel %vm138_vm6, %v4755_v23, %v1408_v30  ;;  %v3830_v30 = vld [vmem:[#allocation4 + $0x290] sm:$0xf0] }
 0x2f0   :  { %1436 = vst [vmem:[#allocation4 + $0xc8] sm:$0xff] %v1411_v42  ;;  %3010 = vperm.xlu1 %3857, %v3004_v55   ;;  %2981 = vperm.xlu0 %3856, %v2963_v62   ;;  %v3835_v12 = vld [vmem:[#allocation4 + $0x2b8] sm:$0xf0] }
 0x2f1   :  { %1434 = vst [vmem:[#allocation4 + $0xbc] sm:$0xff] %v1409_v54  ;;  %3015 = vperm.xlu2 %3858, %v3005_v44   ;;  %v1799_v44 = vrot.slane %v4637_v28, 4 }
 0x2f2   :  { %v4970_v21 = vpop.permute.xlu0 %1890  ;;  %v1371_v51 = vpop.permute.xlu1 %1370 }
 0x2f3   :  { %v1904_v58 = vrot.slane %v4970_v21, 4  ;;  %v1392_v6 = vrot.slane %v1371_v51, 4  ;;  %1432 = vst.msk [vmem:[#allocation4 + $0xb0] sm:$0xf] %vm50_vm7, %v1371_v51  ;;  %v1383_v15 = vpop.permute.xlu2 %1382 }
 0x2f4   :  { %v1398_v43 = vrot.slane %v1383_v15, 4  ;;  %1438 = vst.msk [vmem:[#allocation4 + $0xd8] sm:$0xf] %vm50_vm7, %v1383_v15 }
 0x2f5   :  { %v1921_v23 = vsel %vm85_vm0, %v1903_v32, %v1904_v58  ;;  %v1404_v60 = vsel %vm85_vm0, %v1391_v63, %v1392_v6 }
 0x2f6   :  { %v1922_v2 = vsel %vm395_vm2, %v4625_v24, %v1921_v23  ;;  %v1405_v46 = vsel %vm138_vm6, %v4747_v5, %v1404_v60  ;;  %v1412_v55 = vsel %vm85_vm0, %v1397_v14, %v1398_v43  ;;  %v3665_v62 = vld [vmem:[#allocation4 + $0x2a8] sm:$0xf]  ;;  %v3645_v5 = vld [vmem:[#allocation4 + $0x280] sm:$0xf]  ;;  %v1699_v14 = vrot.slane %v4667_v47, 4 }
 0x2f7   :  { %1947 = vst [vmem:[#allocation4 + $0x26c] sm:$0xff] %v1922_v2  ;;  %v1413_v63 = vsel %vm138_vm6, %v1381_v29, %v1412_v55  ;;  %v3666_v42 = vor.u32 %v3835_v12, %v3665_v62  ;;  %v3646_v6 = vor.u32 %v3830_v30, %v3645_v5  ;;  %v3625_v2 = vld [vmem:[#allocation4 + $0x258] sm:$0xf]  ;;  %v3820_v12 = vld [vmem:[#allocation4 + $0x240] sm:$0xf0] }
 0x2f8   :  { %1431 = vst [vmem:[#allocation4 + $0xa8] sm:$0xff] %v1405_v46  ;;  %3025 = vperm.xlu1 %3857, %v3007_v35   ;;  %3020 = vperm.xlu0 %3856, %v3006_v53  }
 0x2f9   :  { %1437 = vst [vmem:[#allocation4 + $0xd0] sm:$0xff] %v1413_v63  ;;  %2719 = vmatpush.bf16.msrb.mxu1 %v3666_v42  ;;  %v1299_v63 = vrot.slane %v4686_v0, 4 }
 0x2fa   :  { %v4995_v24 = vpop.permute.xlu0 %1786  ;;  %v4997_v54 = vpop.permute.xlu1 %1686 }
 0x2fb   :  { %v1800_v51 = vrot.slane %v4995_v24, 4  ;;  %v1700_v29 = vrot.slane %v4997_v54, 4  ;;  %v1489_v32 = vpop.permute.xlu2 %1488 }
 0x2fc   :  { %v1501_v15 = vrot.slane %v1489_v32, 4  ;;  %1541 = vst.msk [vmem:[#allocation4 + $0x13c] sm:$0xf] %vm50_vm7, %v1489_v32  ;;  %v3744_v32 = vld [vmem:[%s5431_s2 + $0x10] sm:$0xf0] }
 0x2fd   :  { %v1817_v43 = vsel %vm85_vm0, %v1799_v44, %v1800_v51  ;;  %v1714_v23 = vsel %vm85_vm0, %v1699_v14, %v1700_v29  ;;  %2720 = vmatpush.bf16.msrb.mxu1 %v3646_v6  ;;  %v3309_v14 = vld [vmem:[%s5431_s2 + $0x8] sm:$0xf] }
 0x2fe   :  { %v1818_v60 = vsel %vm342_vm1, %v4637_v28, %v1817_v43  ;;  %v1715_v35 = vsel %vm291_vm3, %v4667_v47, %v1714_v23  ;;  %v1516_v53 = vsel %vm85_vm0, %v1500_v20, %v1501_v15  ;;  %v3825_v46 = vld [vmem:[#allocation4 + $0x268] sm:$0xf0]  ;;  %v1399_v28 = vrot.slane %v4648_v49, 4  ;;  %v3605_v20 = vld [vmem:[#allocation4 + $0x230] sm:$0xf] }
 0x2ff   :  { %1843 = vst [vmem:[#allocation4 + $0x21c] sm:$0xff] %v1818_v60  ;;  %v1517_v55 = vsel %vm189_vm5, %v4851_v19, %v1516_v53  ;;  %v3626_v62 = vor.u32 %v3825_v46, %v3625_v2  ;;  %v3606_v19 = vor.u32 %v3820_v12, %v3605_v20  ;;  %v5033_v15 = vor.u32 %v3744_v32, %v3309_v14  ;;  %v3585_v2 = vld [vmem:[#allocation4 + $0x208] sm:$0xf]  ;;  %v3565_v12 = vld [vmem:[#allocation4 + $0x1e0] sm:$0xf] }
 0x300   :  { %1739 = vst [vmem:[#allocation4 + $0x1cc] sm:$0xff] %v1715_v35 }
 0x301   :  { %1540 = vst [vmem:[#allocation4 + $0x134] sm:$0xff] %v1517_v55  ;;  %2694 = vmatpush.bf16.msra.mxu2 %v3626_v62  ;;  %3683 = vmatmul.msk.bf16.vlgmr.msrb.gmra.mxu1 %vm2668_vm14, %v5033_v15 }
 0x302   :  { %v5020_v47 = vpop.permute.xlu0 %1386  ;;  %v5022_v42 = vpop.permute.xlu1 %1286 }
 0x303   :  { %v1400_v30 = vrot.slane %v5020_v47, 4  ;;  %v1300_v44 = vrot.slane %v5022_v42, 4  ;;  %v1271_v5 = vpop.permute.xlu2 %1270 }
 0x304   :  { %v1292_v6 = vrot.slane %v1271_v5, 4  ;;  %1332 = vst.msk [vmem:[#allocation4 + $0x60] sm:$0xf] %vm50_vm7, %v1271_v5 }
 0x305   :  { %v1414_v43 = vsel %vm85_vm0, %v1399_v28, %v1400_v30  ;;  %v1314_v23 = vsel %vm85_vm0, %v1299_v63, %v1300_v44  ;;  %2695 = vmatpush.bf16.msra.mxu2 %v3606_v19 }
 0x306   :  { %v1415_v60 = vsel %vm138_vm6, %v4648_v49, %v1414_v43  ;;  %v1315_v35 = vsel %vm87_vm9, %v4686_v0, %v1314_v23  ;;  %v1304_v53 = vsel %vm85_vm0, %v1291_v33, %v1292_v6  ;;  %v3815_v46 = vld [vmem:[#allocation4 + $0x218] sm:$0xf0]  ;;  %v3810_v49 = vld [vmem:[#allocation4 + $0x1f0] sm:$0xf0]  ;;  %v3425_v6 = vld [vmem:[#allocation4 + $0xc8] sm:$0xf] }
 0x307   :  { %1439 = vst [vmem:[#allocation4 + $0xdc] sm:$0xff] %v1415_v60  ;;  %v1305_v55 = vsel %vm87_vm9, %v4712_v25, %v1304_v53  ;;  %v3586_v62 = vor.u32 %v3815_v46, %v3585_v2  ;;  %v3566_v5 = vor.u32 %v3810_v49, %v3565_v12  ;;  %v3805_v19 = vld [vmem:[#allocation4 + $0x1c8] sm:$0xf0]  ;;  %v3545_v43 = vld [vmem:[#allocation4 + $0x1b8] sm:$0xf] }
 0x308   :  { %1339 = vst [vmem:[#allocation4 + $0x8c] sm:$0xff] %v1315_v35  ;;  %v3546_v2 = vor.u32 %v3805_v19, %v3545_v43  ;;  %v3770_v49 = vld [vmem:[#allocation4 + $0xb0] sm:$0xf0] }
 0x309   :  { %1331 = vst [vmem:[#allocation4 + $0x58] sm:$0xff] %v1305_v55  ;;  %2696 = vmatpush.bf16.msra.mxu2 %v3586_v62 }
 0x30a   :  { %v1471_v0 = vpop.permute.xlu0 %1470  ;;  %v1477_v28 = vpop.permute.xlu1 %1476 }
 0x30b   :  { %v1492_v63 = vrot.slane %v1471_v0, 4  ;;  %1532 = vst.msk [vmem:[#allocation4 + $0x100] sm:$0xf] %vm50_vm7, %v1471_v0  ;;  %v1495_v33 = vrot.slane %v1477_v28, 4  ;;  %v1783_v20 = vpop.permute.xlu2 %1782  ;;  %v3407_v0 = vld [vmem:[#allocation4 + $0xb4] sm:$0xf0] }
 0x30c   :  { %1535 = vst.msk [vmem:[#allocation4 + $0x114] sm:$0xf] %vm50_vm7, %v1477_v28  ;;  %v1798_v14 = vrot.slane %v1783_v20, 4 }
 0x30d   :  { %v1504_v25 = vsel %vm85_vm0, %v1491_v37, %v1492_v63  ;;  %v1508_v32 = vsel %vm85_vm0, %v1494_v17, %v1495_v33  ;;  %2697 = vmatpush.bf16.msra.mxu2 %v3566_v5  ;;  %v3773_v37 = vld [vmem:[#allocation4 + $0xcc] sm:$0xf]  ;;  %v3525_v33 = vld [vmem:[#allocation4 + $0x190] sm:$0xf] }
 0x30e   :  { %v1505_v23 = vsel %vm189_vm5, %v4671_v13, %v1504_v25  ;;  %v1509_v60 = vsel %vm189_vm5, %v4814_v50, %v1508_v32  ;;  %v1814_v35 = vsel %vm85_vm0, %v1797_v61, %v1798_v14  ;;  %v3775_v53 = vld [vmem:[#allocation4 + $0xd8] sm:$0xf0]  ;;  %v3427_v46 = vld [vmem:[#allocation4 + $0xdc] sm:$0xf0]  ;;  %v1816_v55 = vsel %vm342_vm1, %v1783_v20, %v1798_v14  ;;  %v3800_v50 = vld [vmem:[#allocation4 + $0x1a0] sm:$0xf0] }
 0x30f   :  { %1531 = vst [vmem:[#allocation4 + $0xf8] sm:$0xff] %v1505_v23  ;;  %v1815_v17 = vsel %vm342_vm1, %v4908_v40, %v1814_v35  ;;  %v3426_v62 = vor.u32 %v3775_v53, %v3425_v6  ;;  %v3430_v12 = vor.u32 %v3773_v37, %v3427_v46  ;;  %v3405_v13 = vld [vmem:[#allocation4 + $0xa0] sm:$0xf]  ;;  %v3768_v61 = vld [vmem:[#allocation4 + $0xa4] sm:$0xf]  ;;  %v3526_v25 = vor.u32 %v3800_v50, %v3525_v33 }
 0x310   :  { %1534 = vst [vmem:[#allocation4 + $0x10c] sm:$0xff] %v1509_v60  ;;  %v3505_v40 = vld [vmem:[#allocation4 + $0x168] sm:$0xf]  ;;  %v3406_v14 = vor.u32 %v3770_v49, %v3405_v13  ;;  %v3765_v32 = vld [vmem:[#allocation4 + $0x88] sm:$0xf0]  ;;  %v3410_v43 = vor.u32 %v3768_v61, %v3407_v0 }
 0x311   :  { %1841 = vst [vmem:[#allocation4 + $0x210] sm:$0xff] %v1815_v17  ;;  %2677 = vmatpush.bf16.msra.mxu0 %v3426_v62  ;;  %2698 = vmatpush.bf16.msra.mxu2 %v3546_v2  ;;  %v3321_v23 = vld [vmem:[%s5431_s2 + $0x20] sm:$0xf]  ;;  %v3795_v53 = vld [vmem:[#allocation4 + $0x178] sm:$0xf0] }
 0x312   :  { %1842 = vst.msk [vmem:[#allocation4 + $0x218] sm:$0xf] %vm50_vm7, %v1816_v55  ;;  %2734 = vmatpush.bf16.msra.mxu3 %v3430_v12  ;;  %v1483_v28 = vpop.permute.xlu1 %1482  ;;  %v1283_v63 = vpop.permute.xlu0 %1282  ;;  %v3387_v2 = vld [vmem:[#allocation4 + $0x8c] sm:$0xf0]  ;;  %v3747_v37 = vld [vmem:[%s5431_s2 + $0x28] sm:$0xf0]  ;;  %v3506_v55 = vor.u32 %v3795_v53, %v3505_v40 }
 0x313   :  { %v1498_v5 = vrot.slane %v1483_v28, 4  ;;  %1538 = vst.msk [vmem:[#allocation4 + $0x128] sm:$0xf] %vm50_vm7, %v1483_v28  ;;  %v1298_v20 = vrot.slane %v1283_v63, 4  ;;  %v1777_v19 = vpop.permute.xlu2 %1776  ;;  %v3760_v62 = vld [vmem:[#allocation4 + $0x60] sm:$0xf0]  ;;  %v5095_v61 = vor.u32 %v3747_v37, %v3321_v23 }
 0x314   :  { %1338 = vst.msk [vmem:[#allocation4 + $0x88] sm:$0xf] %vm50_vm7, %v1283_v63  ;;  %v1795_v6 = vrot.slane %v1777_v19, 4  ;;  %v3763_v50 = vld [vmem:[#allocation4 + $0x7c] sm:$0xf] }
 0x315   :  { %v1512_v60 = vsel %vm85_vm0, %v1497_v31, %v1498_v5  ;;  %v1312_v35 = vsel %vm85_vm0, %v1297_v26, %v1298_v20  ;;  %2678 = vmatpush.bf16.msra.mxu0 %v3406_v14  ;;  %2699 = vmatpush.bf16.msra.mxu2 %v3526_v25  ;;  %v3385_v26 = vld [vmem:[#allocation4 + $0x78] sm:$0xf]  ;;  %v3485_v0 = vld [vmem:[#allocation4 + $0x140] sm:$0xf]  ;;  %v3790_v28 = vld [vmem:[#allocation4 + $0x150] sm:$0xf0] }
 0x316   :  { %v1513_v46 = vsel %vm189_vm5, %v4873_v10, %v1512_v60  ;;  %v1313_v17 = vsel %vm87_vm9, %v4820_v48, %v1312_v35  ;;  %v1809_v31 = vsel %vm85_vm0, %v1794_v36, %v1795_v6  ;;  %2735 = vmatpush.bf16.msra.mxu3 %v3410_v43  ;;  %v1811_v13 = vsel %vm342_vm1, %v1777_v19, %v1795_v6  ;;  %v3367_v10 = vld [vmem:[#allocation4 + $0x64] sm:$0xf0]  ;;  %v3833_v36 = vld [vmem:[#allocation4 + $0x2ac] sm:$0xf]  ;;  %v3365_v20 = vld [vmem:[#allocation4 + $0x50] sm:$0xf] }
 0x317   :  { %1537 = vst [vmem:[#allocation4 + $0x120] sm:$0xff] %v1513_v46  ;;  %v1810_v12 = vsel %vm342_vm1, %v4718_v34, %v1809_v31  ;;  %v3386_v49 = vor.u32 %v3765_v32, %v3385_v26  ;;  %v3390_v48 = vor.u32 %v3763_v50, %v3387_v2  ;;  %v3345_v63 = vld [vmem:[#allocation4 + $0x28] sm:$0xf]  ;;  %v3742_v34 = vld [vmem:[%s5431_s2 + $0x4] sm:$0xf]  ;;  %3684 = vmatmul.msk.bf16.gmra.mxu1 %vm2668_vm14, %v5095_v61 }
 0x318   :  { %1337 = vst [vmem:[#allocation4 + $0x80] sm:$0xff] %v1313_v17  ;;  %v3303_v33 = vld [vmem:[%s5431_s2 + $0xc] sm:$0xf0]  ;;  %v3758_v19 = vld [vmem:[#allocation4 + $0x54] sm:$0xf]  ;;  %v3366_v6 = vor.u32 %v3760_v62, %v3365_v20  ;;  %v3486_v43 = vor.u32 %v3790_v28, %v3485_v0 }
 0x319   :  { %1838 = vst [vmem:[#allocation4 + $0x1fc] sm:$0xff] %v1810_v12  ;;  %2679 = vmatpush.bf16.msra.mxu0 %v3386_v49  ;;  %2700 = vmatpush.bf16.msra.mxu2 %v3506_v55  ;;  %v3667_v23 = vld [vmem:[#allocation4 + $0x2bc] sm:$0xf0]  ;;  %v3370_v35 = vor.u32 %v3758_v19, %v3367_v10  ;;  %v5107_v2 = vor.u32 %v3742_v34, %v3303_v33  ;;  %v3755_v31 = vld [vmem:[#allocation4 + $0x38] sm:$0xf0] }
 0x31a   :  { %1839 = vst.msk [vmem:[#allocation4 + $0x204] sm:$0xf] %vm50_vm7, %v1811_v13  ;;  %2736 = vmatpush.bf16.msra.mxu3 %v3390_v48  ;;  %v1887_v40 = vpop.permute.xlu1 %1886  ;;  %v1277_v5 = vpop.permute.xlu0 %1276  ;;  %v3670_v53 = vor.u32 %v3833_v36, %v3667_v23  ;;  %v3753_v26 = vld [vmem:[#allocation4 + $0x2c] sm:$0xf]  ;;  %v3647_v55 = vld [vmem:[#allocation4 + $0x294] sm:$0xf0]  ;;  %v3346_v13 = vor.u32 %v3755_v31, %v3345_v63 }
 0x31b   :  { %v1902_v14 = vrot.slane %v1887_v40, 4  ;;  %v1295_v25 = vrot.slane %v1277_v5, 4  ;;  %1335 = vst.msk [vmem:[#allocation4 + $0x74] sm:$0xf] %vm50_vm7, %v1277_v5  ;;  %v1893_v32 = vpop.permute.xlu2 %1892  ;;  %v3347_v49 = vld [vmem:[#allocation4 + $0x3c] sm:$0xf0] }
 0x31c   :  { %v1905_v60 = vrot.slane %v1893_v32, 4  ;;  %v3786_v50 = vld [vmem:[#allocation4 + $0x130] sm:$0xf0]  ;;  %v3828_v10 = vld [vmem:[#allocation4 + $0x284] sm:$0xf]  ;;  %v3350_v5 = vor.u32 %v3753_v26, %v3347_v49 }
 0x31d   :  { %v1918_v37 = vsel %vm85_vm0, %v1901_v11, %v1902_v14  ;;  %v1920_v46 = vsel %vm395_vm2, %v1887_v40, %v1902_v14  ;;  %v1308_v17 = vsel %vm85_vm0, %v1294_v9, %v1295_v25  ;;  %2680 = vmatpush.bf16.msra.mxu0 %v3366_v6  ;;  %2701 = vmatpush.bf16.msra.mxu2 %v3486_v43  ;;  %v3750_v48 = vld [vmem:[#allocation4 + $0x10] sm:$0xf0]  ;;  %v3475_v36 = vld [vmem:[#allocation4 + $0x134] sm:$0xf0]  ;;  %v3627_v34 = vld [vmem:[#allocation4 + $0x26c] sm:$0xf0] }
 0x31e   :  { %v1919_v62 = vsel %vm395_vm2, %v4875_v38, %v1918_v37  ;;  %1946 = vst.msk [vmem:[#allocation4 + $0x268] sm:$0xf] %vm50_vm7, %v1920_v46  ;;  %v1309_v12 = vsel %vm87_vm9, %v4812_v52, %v1308_v17  ;;  %v1923_v11 = vsel %vm85_vm0, %v1904_v58, %v1905_v60  ;;  %v3473_v9 = vld [vmem:[#allocation4 + $0x120] sm:$0xf]  ;;  %v1925_v38 = vsel %vm395_vm2, %v1893_v32, %v1905_v60  ;;  %v3784_v52 = vld [vmem:[#allocation4 + $0x124] sm:$0xf] }
 0x31f   :  { %1945 = vst [vmem:[#allocation4 + $0x260] sm:$0xff] %v1919_v62  ;;  %v1924_v0 = vsel %vm395_vm2, %v4970_v21, %v1923_v11  ;;  %2737 = vmatpush.bf16.msra.mxu3 %v3370_v35  ;;  %v3474_v28 = vor.u32 %v3786_v50, %v3473_v9  ;;  %v3325_v58 = vld [vmem:[#allocation4] sm:$0xf]  ;;  %v3327_v63 = vld [vmem:[#allocation4 + $0x14] sm:$0xf0]  ;;  %v3650_v21 = vor.u32 %v3828_v10, %v3647_v55  ;;  %v5448_v50 = vrot.slane %v4688_v1, 4 }
 0x320   :  { %1334 = vst [vmem:[#allocation4 + $0x6c] sm:$0xff] %v1309_v12  ;;  %2702 = vmatmul.bf16.vlgmr.msra.gmra.mxu2 %v5107_v2  ;;  %v3453_v33 = vld [vmem:[#allocation4 + $0xf8] sm:$0xf]  ;;  %v3781_v40 = vld [vmem:[#allocation4 + $0x108] sm:$0xf0]  ;;  %v3478_v32 = vor.u32 %v3784_v52, %v3475_v36 }
 0x321   :  { %2776 = vmatpush.bf16.msrb.mxu2 %v3670_v53  ;;  %1948 = vst [vmem:[#allocation4 + $0x274] sm:$0xff] %v1924_v0  ;;  %2681 = vmatpush.bf16.msra.mxu0 %v3346_v13  ;;  %v3301_v20 = vld [vmem:[%s5431_s2] sm:$0xf]  ;;  %v3743_v19 = vld [vmem:[%s5431_s2 + $0x8] sm:$0xf0]  ;;  %v3326_v53 = vor.u32 %v3750_v48, %v3325_v58  ;;  %v3454_v37 = vor.u32 %v3781_v40, %v3453_v33 }
 0x322   :  { %2789 = vmatpush.bf16.msra.mxu1 %v3474_v28  ;;  %1949 = vst.msk [vmem:[#allocation4 + $0x27c] sm:$0xf] %vm50_vm7, %v1925_v38  ;;  %v1289_v14 = vpop.permute.xlu1 %1288  ;;  %v1389_v25 = vpop.permute.xlu0 %1388  ;;  %v3823_v6 = vld [vmem:[#allocation4 + $0x25c] sm:$0xf]  ;;  %v3455_v46 = vld [vmem:[#allocation4 + $0x10c] sm:$0xf0]  ;;  %v5137_v55 = vor.u32 %v3743_v19, %v3301_v20 }
 0x323   :  { %v3779_v43 = vld [vmem:[#allocation4 + $0xfc] sm:$0xf]  ;;  %2738 = vmatpush.bf16.msra.mxu3 %v3350_v5  ;;  %v1301_v23 = vrot.slane %v1289_v14, 4  ;;  %1341 = vst.msk [vmem:[#allocation4 + $0x9c] sm:$0xf] %vm50_vm7, %v1289_v14  ;;  %v1401_v60 = vrot.slane %v1389_v25, 4  ;;  %v1671_v35 = vpop.permute.xlu2 %1670  ;;  %v3630_v26 = vor.u32 %v3823_v6, %v3627_v34 }
 0x324   :  { %1441 = vst.msk [vmem:[#allocation4 + $0xec] sm:$0xf] %vm50_vm7, %v1389_v25  ;;  %v1692_v17 = vrot.slane %v1671_v35, 4  ;;  %v3748_v31 = vld [vmem:[#allocation4 + $0x4] sm:$0xf]  ;;  %v3458_v10 = vor.u32 %v3779_v43, %v3455_v46  ;;  %v5449_v20 = vrot.slane %v4783_v3, 4 }
 0x325   :  { %2777 = vmatpush.bf16.msrb.mxu2 %v3650_v21  ;;  %v1316_v62 = vsel %vm85_vm0, %v1300_v44, %v1301_v23  ;;  %v1416_v12 = vsel %vm85_vm0, %v1400_v30, %v1401_v60  ;;  %1732 = vst.msk [vmem:[#allocation4 + $0x1a0] sm:$0xf] %vm50_vm7, %v1671_v35  ;;  %2682 = vmatpush.bf16.msra.mxu0 %v3326_v53  ;;  %v3607_v13 = vld [vmem:[#allocation4 + $0x244] sm:$0xf0]  ;;  %v3818_v0 = vld [vmem:[#allocation4 + $0x234] sm:$0xf] }
 0x326   :  { %v3330_v11 = vor.u32 %v3748_v31, %v3327_v63  ;;  %2790 = vmatpush.bf16.msra.mxu1 %v3454_v37  ;;  %v1317_v49 = vsel %vm87_vm9, %v5022_v42, %v1316_v62  ;;  %v1417_v9 = vsel %vm138_vm6, %v5020_v47, %v1416_v12  ;;  %v1704_v44 = vsel %vm85_vm0, %v5448_v50, %v1692_v17  ;;  %v3633_v48 = vld [vmem:[#allocation4 + $0x260] sm:$0xf]  ;;  %v3745_v28 = vld [vmem:[%s5431_s2 + $0x1c] sm:$0xf]  ;;  %v3813_v5 = vld [vmem:[#allocation4 + $0x20c] sm:$0xf] }
 0x327   :  { %1340 = vst [vmem:[#allocation4 + $0x94] sm:$0xff] %v1317_v49  ;;  %v1705_v30 = vsel %vm291_vm3, %v4688_v1, %v1704_v44  ;;  %v3610_v38 = vor.u32 %v3818_v0, %v3607_v13  ;;  %v3315_v52 = vld [vmem:[%s5431_s2 + $0x24] sm:$0xf0]  ;;  %v5450_v25 = vrot.slane %v4657_v45, 4  ;;  %v3808_v43 = vld [vmem:[#allocation4 + $0x1e4] sm:$0xf] }
 0x328   :  { %2739 = vmatpush.bf16.msra.mxu3 %v3330_v11  ;;  %1440 = vst [vmem:[#allocation4 + $0xe4] sm:$0xff] %v1417_v9  ;;  %2683 = vmatmul.bf16.vlgmr.msra.gmra.mxu0 %v5137_v55  ;;  %v3826_v42 = vld [vmem:[#allocation4 + $0x270] sm:$0xf0]  ;;  %v3587_v34 = vld [vmem:[#allocation4 + $0x21c] sm:$0xf0]  ;;  %v5163_v21 = vor.u32 %v3745_v28, %v3315_v52 }
 0x329   :  { %2846 = vmatpush.bf16.msra.mxu2 %v3478_v32  ;;  %2751 = vmatpush.bf16.msrb.mxu0 %v3630_v26  ;;  %1731 = vst [vmem:[#allocation4 + $0x198] sm:$0xff] %v1705_v30  ;;  %v3634_v47 = vor.u32 %v3826_v42, %v3633_v48  ;;  %v3590_v6 = vor.u32 %v3813_v5, %v3587_v34  ;;  %v3567_v23 = vld [vmem:[#allocation4 + $0x1f4] sm:$0xf0]  ;;  %v3433_v46 = vld [vmem:[#allocation4 + $0xd0] sm:$0xf] }
 0x32a   :  { %v1881_v36 = vpop.permute.xlu1 %1880  ;;  %v1875_v1 = vpop.permute.xlu0 %1874  ;;  %v3774_v17 = vld [vmem:[#allocation4 + $0xd4] sm:$0xf]  ;;  %v3413_v11 = vld [vmem:[#allocation4 + $0xa8] sm:$0xf]  ;;  %v3769_v13 = vld [vmem:[#allocation4 + $0xac] sm:$0xf] }
 0x32b   :  { %2740 = vmatmul.bf16.vlgmr.msra.gmra.mxu3 %v5137_v55  ;;  %v1899_v58 = vrot.slane %v1881_v36, 4  ;;  %v1896_v63 = vrot.slane %v1875_v1, 4  ;;  %v1991_v33 = vpop.permute.xlu2 %1990  ;;  %v3313_v49 = vld [vmem:[%s5431_s2 + $0x18] sm:$0xf]  ;;  %v3771_v44 = vld [vmem:[#allocation4 + $0xb8] sm:$0xf0] }
 0x32c   :  { %2808 = vmatpush.bf16.msrb.mxu3 %v3634_v47  ;;  %v2006_v40 = vrot.slane %v1991_v33, 4  ;;  %v3415_v42 = vld [vmem:[#allocation4 + $0xbc] sm:$0xf0]  ;;  %v3414_v47 = vor.u32 %v3771_v44, %v3413_v11  ;;  %v3803_v52 = vld [vmem:[#allocation4 + $0x1bc] sm:$0xf] }
 0x32d   :  { %2847 = vmatpush.bf16.msra.mxu2 %v3458_v10  ;;  %2752 = vmatpush.bf16.msrb.mxu0 %v3610_v38  ;;  %v1913_v19 = vsel %vm85_vm0, %v5449_v20, %v1899_v58  ;;  %v1915_v14 = vsel %vm395_vm2, %v1881_v36, %v1899_v58  ;;  %v1908_v32 = vsel %vm85_vm0, %v5450_v25, %v1896_v63  ;;  %v3547_v10 = vld [vmem:[#allocation4 + $0x1cc] sm:$0xf0]  ;;  %v3527_v20 = vld [vmem:[#allocation4 + $0x1a4] sm:$0xf0]  ;;  %v5453_v25 = vrot.slane %v4881_v18, 4 }
 0x32e   :  { %v1914_v60 = vsel %vm395_vm2, %v4783_v3, %v1913_v19  ;;  %1943 = vst.msk [vmem:[#allocation4 + $0x254] sm:$0xf] %vm50_vm7, %v1915_v14  ;;  %v1909_v35 = vsel %vm395_vm2, %v4657_v45, %v1908_v32  ;;  %v1910_v53 = vsel %vm395_vm2, %v1875_v1, %v1896_v63  ;;  %v2022_v37 = vsel %vm85_vm0, %v2005_v39, %v2006_v40  ;;  %v3766_v5 = vld [vmem:[#allocation4 + $0x90] sm:$0xf0] }
 0x32f   :  { %1942 = vst [vmem:[#allocation4 + $0x24c] sm:$0xff] %v1914_v60  ;;  %v2023_v31 = vsel %vm448_vm8, %v4943_v27, %v2022_v37  ;;  %v3776_v26 = vld [vmem:[#allocation4 + $0xe0] sm:$0xf0]  ;;  %v3435_v3 = vld [vmem:[#allocation4 + $0xe4] sm:$0xf0]  ;;  %v2024_v62 = vsel %vm448_vm8, %v1991_v33, %v2006_v40  ;;  %v3570_v39 = vor.u32 %v3808_v43, %v3567_v23  ;;  %v3418_v28 = vor.u32 %v3769_v13, %v3415_v42 }
 0x330   :  { %1939 = vst [vmem:[#allocation4 + $0x238] sm:$0xff] %v1909_v35  ;;  %v3434_v12 = vor.u32 %v3776_v26, %v3433_v46  ;;  %v3438_v45 = vor.u32 %v3774_v17, %v3435_v3  ;;  %2707 = vmatmul.bf16.gmra.mxu2 %v5163_v21  ;;  %v3746_v27 = vld [vmem:[%s5431_s2 + $0x20] sm:$0xf0]  ;;  %v5451_v1 = vrot.slane %v4710_v57, 4  ;;  %v5452_v63 = vrot.slane %v4789_v8, 4 }
 0x331   :  { %2753 = vmatpush.bf16.msrb.mxu0 %v3590_v6  ;;  %1940 = vst.msk [vmem:[#allocation4 + $0x240] sm:$0xf] %vm50_vm7, %v1910_v53  ;;  %v5194_v36 = vor.u32 %v3746_v27, %v3313_v49  ;;  %v3550_v40 = vor.u32 %v3803_v52, %v3547_v10  ;;  %v3395_v43 = vld [vmem:[#allocation4 + $0x94] sm:$0xf0]  ;;  %v3393_v60 = vld [vmem:[#allocation4 + $0x80] sm:$0xf] }
 0x332   :  { %2049 = vst [vmem:[#allocation4 + $0x2b0] sm:$0xff] %v2023_v31  ;;  %2791 = vmatpush.bf16.msra.mxu1 %v3434_v12  ;;  %2848 = vmatpush.bf16.msra.mxu2 %v3438_v45  ;;  %v1771_v9 = vpop.permute.xlu1 %1770  ;;  %v1683_v50 = vpop.permute.xlu0 %1682  ;;  %v3394_v35 = vor.u32 %v3766_v5, %v3393_v60  ;;  %v3764_v53 = vld [vmem:[#allocation4 + $0x84] sm:$0xf]  ;;  %v3798_v37 = vld [vmem:[#allocation4 + $0x194] sm:$0xf] }
 0x333   :  { %2050 = vst.msk [vmem:[#allocation4 + $0x2b8] sm:$0xf] %vm50_vm7, %v2024_v62  ;;  %v1792_v48 = vrot.slane %v1771_v9, 4  ;;  %v1698_v30 = vrot.slane %v1683_v50, 4  ;;  %v1589_v0 = vpop.permute.xlu2 %1588  ;;  %v3398_v46 = vor.u32 %v3764_v53, %v3395_v43  ;;  %v3530_v17 = vor.u32 %v3798_v37, %v3527_v20  ;;  %v3761_v31 = vld [vmem:[#allocation4 + $0x68] sm:$0xf0] }
 0x334   :  { %1738 = vst.msk [vmem:[#allocation4 + $0x1c8] sm:$0xf] %vm50_vm7, %v1683_v50  ;;  %v1601_v38 = vrot.slane %v1589_v0, 4  ;;  %v3375_v62 = vld [vmem:[#allocation4 + $0x6c] sm:$0xf0]  ;;  %v5456_v53 = vrot.slane %v4781_v22, 4 }
 0x335   :  { %2754 = vmatpush.bf16.msrb.mxu0 %v3570_v39  ;;  %v1804_v34 = vsel %vm85_vm0, %v5451_v1, %v1792_v48  ;;  %v1806_v58 = vsel %vm342_vm1, %v1771_v9, %v1792_v48  ;;  %v1712_v33 = vsel %vm85_vm0, %v5452_v63, %v1698_v30  ;;  %1641 = vst.msk [vmem:[#allocation4 + $0x18c] sm:$0xf] %vm50_vm7, %v1589_v0  ;;  %v3373_v13 = vld [vmem:[#allocation4 + $0x58] sm:$0xf]  ;;  %v3759_v27 = vld [vmem:[#allocation4 + $0x5c] sm:$0xf] }
 0x336   :  { %v1805_v19 = vsel %vm342_vm1, %v4710_v57, %v1804_v34  ;;  %1836 = vst.msk [vmem:[#allocation4 + $0x1f0] sm:$0xf] %vm50_vm7, %v1806_v58  ;;  %v1713_v14 = vsel %vm291_vm3, %v4789_v8, %v1712_v33  ;;  %v1616_v32 = vsel %vm85_vm0, %v5453_v25, %v1601_v38  ;;  %2792 = vmatpush.bf16.msra.mxu1 %v3414_v47  ;;  %v3821_v6 = vld [vmem:[#allocation4 + $0x248] sm:$0xf0]  ;;  %v5454_v9 = vrot.slane %v4906_v56, 4 }
 0x337   :  { %2849 = vmatpush.bf16.msra.mxu2 %v3418_v28  ;;  %1835 = vst [vmem:[#allocation4 + $0x1e8] sm:$0xff] %v1805_v19  ;;  %v1617_v23 = vsel %vm240_vm4, %v4881_v18, %v1616_v32  ;;  %v3613_v57 = vld [vmem:[#allocation4 + $0x238] sm:$0xf]  ;;  %v3793_v18 = vld [vmem:[#allocation4 + $0x16c] sm:$0xf]  ;;  %v3374_v49 = vor.u32 %v3761_v31, %v3373_v13  ;;  %v3378_v48 = vor.u32 %v3759_v27, %v3375_v62  ;;  %v5455_v38 = vrot.slane %v4843_v41, 4 }
 0x338   :  { %1737 = vst [vmem:[#allocation4 + $0x1c0] sm:$0xff] %v1713_v14  ;;  %2688 = vmatmul.bf16.gmra.mxu0 %v5194_v36  ;;  %v3614_v8 = vor.u32 %v3821_v6, %v3613_v57  ;;  %v3507_v30 = vld [vmem:[#allocation4 + $0x17c] sm:$0xf0]  ;;  %v3756_v52 = vld [vmem:[#allocation4 + $0x40] sm:$0xf0] }
 0x339   :  { %2755 = vmatpush.bf16.msrb.mxu0 %v3550_v40  ;;  %1640 = vst [vmem:[#allocation4 + $0x184] sm:$0xff] %v1617_v23  ;;  %v3510_v28 = vor.u32 %v3793_v18, %v3507_v30  ;;  %v3355_v1 = vld [vmem:[#allocation4 + $0x44] sm:$0xf0]  ;;  %v3754_v58 = vld [vmem:[#allocation4 + $0x34] sm:$0xf] }
 0x33a   :  { %2793 = vmatpush.bf16.msra.mxu1 %v3394_v35  ;;  %2809 = vmatpush.bf16.msrb.mxu3 %v3614_v8  ;;  %v1583_v26 = vpop.permute.xlu1 %1582  ;;  %v1789_v3 = vpop.permute.xlu0 %1788  ;;  %v3751_v63 = vld [vmem:[#allocation4 + $0x18] sm:$0xf0]  ;;  %v3335_v33 = vld [vmem:[#allocation4 + $0x1c] sm:$0xf0]  ;;  %v3358_v5 = vor.u32 %v3754_v58, %v3355_v1  ;;  %v3788_v20 = vld [vmem:[#allocation4 + $0x144] sm:$0xf] }
 0x33b   :  { %2850 = vmatpush.bf16.msra.mxu2 %v3398_v46  ;;  %v1598_v12 = vrot.slane %v1583_v26, 4  ;;  %1638 = vst.msk [vmem:[#allocation4 + $0x178] sm:$0xf] %vm50_vm7, %v1583_v26  ;;  %v1801_v45 = vrot.slane %v1789_v3, 4  ;;  %v1985_v11 = vpop.permute.xlu2 %1984  ;;  %2745 = vmatmul.bf16.gmra.mxu3 %v5194_v36  ;;  %v3641_v19 = vld [vmem:[#allocation4 + $0x268] sm:$0xf] }
 0x33c   :  { %v2003_v39 = vrot.slane %v1985_v11, 4  ;;  %v3824_v32 = vld [vmem:[#allocation4 + $0x264] sm:$0xf]  ;;  %v3635_v6 = vld [vmem:[#allocation4 + $0x274] sm:$0xf0] }
 0x33d   :  { %2756 = vmatpush.bf16.msrb.mxu0 %v3530_v17  ;;  %v1612_v50 = vsel %vm85_vm0, %v5454_v9, %v1598_v12  ;;  %v1819_v44 = vsel %vm85_vm0, %v1800_v51, %v1801_v45  ;;  %v1821_v10 = vsel %vm342_vm1, %v1789_v3, %v1801_v45  ;;  %v3827_v60 = vld [vmem:[#allocation4 + $0x278] sm:$0xf0]  ;;  %v3333_v57 = vld [vmem:[#allocation4 + $0x8] sm:$0xf]  ;;  %v3749_v35 = vld [vmem:[#allocation4 + $0xc] sm:$0xf]  ;;  %v3638_v62 = vor.u32 %v3824_v32, %v3635_v6 }
 0x33e   :  { %v1613_v0 = vsel %vm240_vm4, %v4906_v56, %v1612_v50  ;;  %v1820_v42 = vsel %vm342_vm1, %v4995_v24, %v1819_v44  ;;  %1845 = vst.msk [vmem:[#allocation4 + $0x22c] sm:$0xf] %vm50_vm7, %v1821_v10  ;;  %v2017_v47 = vsel %vm85_vm0, %v5455_v38, %v2003_v39  ;;  %v2019_v34 = vsel %vm448_vm8, %v1985_v11, %v2003_v39  ;;  %v3487_v56 = vld [vmem:[#allocation4 + $0x154] sm:$0xf0]  ;;  %v3353_v24 = vld [vmem:[#allocation4 + $0x30] sm:$0xf] }
 0x33f   :  { %1637 = vst [vmem:[#allocation4 + $0x170] sm:$0xff] %v1613_v0  ;;  %v2018_v51 = vsel %vm448_vm8, %v4843_v41, %v2017_v47  ;;  %2794 = vmatpush.bf16.msra.mxu1 %v3374_v49  ;;  %2851 = vmatpush.bf16.msra.mxu2 %v3378_v48  ;;  %v3354_v40 = vor.u32 %v3756_v52, %v3353_v24  ;;  %v3593_v31 = vld [vmem:[#allocation4 + $0x210] sm:$0xf]  ;;  %v3819_v12 = vld [vmem:[#allocation4 + $0x23c] sm:$0xf]  ;;  %v5458_v47 = vrot.slane %v4692_v4, 4 }
 0x340   :  { %1844 = vst [vmem:[#allocation4 + $0x224] sm:$0xff] %v1820_v42  ;;  %3685 = vmatmul.msk.bf16.vlgmr.msrb.gmra.mxu2 %vm2668_vm14, %v5033_v15  ;;  %v3490_v25 = vor.u32 %v3788_v20, %v3487_v56  ;;  %v3334_v46 = vor.u32 %v3751_v63, %v3333_v57  ;;  %v3338_v17 = vor.u32 %v3749_v35, %v3335_v33  ;;  %v3615_v45 = vld [vmem:[#allocation4 + $0x24c] sm:$0xf0]  ;;  %v3822_v11 = vld [vmem:[#allocation4 + $0x250] sm:$0xf0]  ;;  %v5457_v42 = vrot.slane %v4845_v16, 4 }
 0x341   :  { %2757 = vmatpush.bf16.msrb.mxu0 %v3510_v28  ;;  %2046 = vst [vmem:[#allocation4 + $0x29c] sm:$0xff] %v2018_v51  ;;  %v3642_v18 = vor.u32 %v3827_v60, %v3641_v19  ;;  %v3621_v13 = vld [vmem:[#allocation4 + $0x240] sm:$0xf]  ;;  %v3618_v27 = vor.u32 %v3819_v12, %v3615_v45  ;;  %v3811_v50 = vld [vmem:[#allocation4 + $0x1f8] sm:$0xf0] }
 0x342   :  { %2047 = vst.msk [vmem:[#allocation4 + $0x2a4] sm:$0xf] %vm50_vm7, %v2019_v34  ;;  %v1689_v41 = vpop.permute.xlu1 %1688  ;;  %v1677_v14 = vpop.permute.xlu0 %1676  ;;  %v3622_v9 = vor.u32 %v3822_v11, %v3621_v13  ;;  %v3814_v52 = vld [vmem:[#allocation4 + $0x214] sm:$0xf]  ;;  %v3601_v1 = vld [vmem:[#allocation4 + $0x218] sm:$0xf] }
 0x343   :  { %2795 = vmatpush.bf16.msra.mxu1 %v3354_v40  ;;  %2852 = vmatpush.bf16.msra.mxu2 %v3358_v5  ;;  %v1701_v43 = vrot.slane %v1689_v41, 4  ;;  %1741 = vst.msk [vmem:[#allocation4 + $0x1dc] sm:$0xf] %vm50_vm7, %v1689_v41  ;;  %v1695_v23 = vrot.slane %v1677_v14, 4  ;;  %v3553_v58 = vld [vmem:[#allocation4 + $0x1c0] sm:$0xf] }
 0x344   :  { %1735 = vst.msk [vmem:[#allocation4 + $0x1b4] sm:$0xf] %vm50_vm7, %v1677_v14  ;;  %v3809_v40 = vld [vmem:[#allocation4 + $0x1ec] sm:$0xf]  ;;  %v3581_v5 = vld [vmem:[#allocation4 + $0x1f0] sm:$0xf] }
 0x345   :  { %2758 = vmatpush.bf16.msrb.mxu0 %v3490_v25  ;;  %v1716_v8 = vsel %vm85_vm0, %v1700_v29, %v1701_v43  ;;  %v1708_v37 = vsel %vm85_vm0, %v5456_v53, %v1695_v23  ;;  %v3817_v44 = vld [vmem:[#allocation4 + $0x228] sm:$0xf0]  ;;  %v3575_v20 = vld [vmem:[#allocation4 + $0x1fc] sm:$0xf0]  ;;  %v3533_v60 = vld [vmem:[#allocation4 + $0x198] sm:$0xf] }
 0x346   :  { %v1717_v26 = vsel %vm291_vm3, %v4997_v54, %v1716_v8  ;;  %v1709_v3 = vsel %vm291_vm3, %v4781_v22, %v1708_v37  ;;  %v3573_v54 = vld [vmem:[#allocation4 + $0x1e8] sm:$0xf]  ;;  %v3602_v24 = vor.u32 %v3817_v44, %v3601_v1  ;;  %v3578_v25 = vor.u32 %v3809_v40, %v3575_v20  ;;  %v3804_v8 = vld [vmem:[#allocation4 + $0x1c4] sm:$0xf]  ;;  %v3681_v20 = vld [vmem:[#allocation4 + $0x2b8] sm:$0xf] }
 0x347   :  { %1740 = vst [vmem:[#allocation4 + $0x1d4] sm:$0xff] %v1717_v26  ;;  %2796 = vmatpush.bf16.msra.mxu1 %v3334_v46  ;;  %2853 = vmatpush.bf16.msra.mxu2 %v3338_v17  ;;  %v3816_v29 = vld [vmem:[#allocation4 + $0x220] sm:$0xf0]  ;;  %v3595_v30 = vld [vmem:[#allocation4 + $0x224] sm:$0xf0]  ;;  %v3574_v0 = vor.u32 %v3811_v50, %v3573_v54  ;;  %v5459_v37 = vrot.slane %v4749_v59, 4 }
 0x348   :  { %1734 = vst [vmem:[#allocation4 + $0x1ac] sm:$0xff] %v1709_v3  ;;  %v3594_v39 = vor.u32 %v3816_v29, %v3593_v31  ;;  %2759 = vmatmul.bf16.vlgmr.msrb.gmra.mxu0 %v5107_v2  ;;  %v3598_v56 = vor.u32 %v3814_v52, %v3595_v30  ;;  %v3561_v57 = vld [vmem:[#allocation4 + $0x1c8] sm:$0xf]  ;;  %v5460_v31 = vrot.slane %v4914_v7, 4  ;;  %v3796_v11 = vld [vmem:[#allocation4 + $0x180] sm:$0xf0] }
 0x349   :  { %v3799_v54 = vld [vmem:[#allocation4 + $0x19c] sm:$0xf]  ;;  %v3521_v50 = vld [vmem:[#allocation4 + $0x178] sm:$0xf]  ;;  %v3673_v30 = vld [vmem:[#allocation4 + $0x2b0] sm:$0xf] }
 0x34a   :  { %2810 = vmatpush.bf16.msrb.mxu3 %v3594_v39  ;;  %v1577_v49 = vpop.permute.xlu1 %1576  ;;  %v1571_v22 = vpop.permute.xlu0 %1570  ;;  %2797 = vmatmul.bf16.vlgmr.msra.gmra.mxu1 %v5137_v55  ;;  %v3807_v41 = vld [vmem:[#allocation4 + $0x1d8] sm:$0xf0] }
 0x34b   :  { %2865 = vmatpush.bf16.msrb.mxu1 %v3638_v62  ;;  %2922 = vmatpush.bf16.msrb.mxu2 %v3642_v18  ;;  %v1595_v10 = vrot.slane %v1577_v49, 4  ;;  %1635 = vst.msk [vmem:[#allocation4 + $0x164] sm:$0xf] %vm50_vm7, %v1577_v49  ;;  %v1592_v48 = vrot.slane %v1571_v22, 4  ;;  %v3562_v53 = vor.u32 %v3807_v41, %v3561_v57  ;;  %v3513_v62 = vld [vmem:[#allocation4 + $0x170] sm:$0xf] }
 0x34c   :  { %1632 = vst.msk [vmem:[#allocation4 + $0x150] sm:$0xf] %vm50_vm7, %v1571_v22  ;;  %v3802_v13 = vld [vmem:[#allocation4 + $0x1b0] sm:$0xf0]  ;;  %v3514_v39 = vor.u32 %v3796_v11, %v3513_v62  ;;  %v3541_v49 = vld [vmem:[#allocation4 + $0x1a0] sm:$0xf] }
 0x34d   :  { %v1608_v38 = vsel %vm85_vm0, %v5457_v42, %v1595_v10  ;;  %v1604_v28 = vsel %vm85_vm0, %v5458_v47, %v1592_v48  ;;  %v3515_v10 = vld [vmem:[#allocation4 + $0x184] sm:$0xf0]  ;;  %v3797_v48 = vld [vmem:[#allocation4 + $0x188] sm:$0xf0]  ;;  %v3831_v41 = vld [vmem:[#allocation4 + $0x298] sm:$0xf0] }
 0x34e   :  { %v1609_v51 = vsel %vm240_vm4, %v4845_v16, %v1608_v38  ;;  %v1605_v34 = vsel %vm240_vm4, %v4692_v4, %v1604_v28  ;;  %2811 = vmatpush.bf16.msrb.mxu3 %v3574_v0  ;;  %v3806_v63 = vld [vmem:[#allocation4 + $0x1d0] sm:$0xf0]  ;;  %v3812_v16 = vld [vmem:[#allocation4 + $0x200] sm:$0xf0]  ;;  %v3555_v6 = vld [vmem:[#allocation4 + $0x1d4] sm:$0xf0]  ;;  %v3522_v38 = vor.u32 %v3797_v48, %v3521_v50 }
 0x34f   :  { %2866 = vmatpush.bf16.msrb.mxu1 %v3618_v27  ;;  %2923 = vmatpush.bf16.msrb.mxu2 %v3622_v9  ;;  %1634 = vst [vmem:[#allocation4 + $0x15c] sm:$0xff] %v1609_v51  ;;  %v3554_v33 = vor.u32 %v3806_v63, %v3553_v58  ;;  %v3801_v19 = vld [vmem:[#allocation4 + $0x1a8] sm:$0xf0]  ;;  %v3582_v32 = vor.u32 %v3812_v16, %v3581_v5  ;;  %v3535_v29 = vld [vmem:[#allocation4 + $0x1ac] sm:$0xf0] }
 0x350   :  { %1631 = vst [vmem:[#allocation4 + $0x148] sm:$0xff] %v1605_v34  ;;  %3686 = vmatmul.msk.bf16.gmra.mxu2 %vm2668_vm14, %v5095_v61  ;;  %v3534_v35 = vor.u32 %v3801_v19, %v3533_v60  ;;  %v3558_v3 = vor.u32 %v3804_v8, %v3555_v6  ;;  %v3542_v27 = vor.u32 %v3802_v13, %v3541_v49  ;;  %v3794_v9 = vld [vmem:[#allocation4 + $0x174] sm:$0xf]  ;;  %v3481_v16 = vld [vmem:[#allocation4 + $0x128] sm:$0xf] }
 0x351   :  { %v3834_v0 = vld [vmem:[#allocation4 + $0x2b4] sm:$0xf]  ;;  %v3518_v42 = vor.u32 %v3794_v9, %v3515_v10  ;;  %v3461_v60 = vld [vmem:[#allocation4 + $0x100] sm:$0xf]  ;;  %v3401_v62 = vld [vmem:[#allocation4 + $0x88] sm:$0xf] }
 0x352   :  { %2812 = vmatpush.bf16.msrb.mxu3 %v3554_v33  ;;  %v1979_v4 = vpop.permute.xlu1 %1978  ;;  %v1997_v14 = vpop.permute.xlu0 %1996  ;;  %v3792_v52 = vld [vmem:[#allocation4 + $0x160] sm:$0xf0]  ;;  %v3782_v57 = vld [vmem:[#allocation4 + $0x110] sm:$0xf0]  ;;  %v3361_v13 = vld [vmem:[#allocation4 + $0x38] sm:$0xf] }
 0x353   :  { %2867 = vmatpush.bf16.msrb.mxu1 %v3598_v56  ;;  %2924 = vmatpush.bf16.msrb.mxu2 %v3602_v24  ;;  %v2000_v43 = vrot.slane %v1979_v4, 4  ;;  %v2009_v23 = vrot.slane %v1997_v14, 4  ;;  %v3501_v28 = vld [vmem:[#allocation4 + $0x150] sm:$0xf]  ;;  %v3462_v8 = vor.u32 %v3782_v57, %v3461_v60  ;;  %v3752_v49 = vld [vmem:[#allocation4 + $0x20] sm:$0xf0] }
 0x354   :  { %v3502_v5 = vor.u32 %v3792_v52, %v3501_v28 }
 0x355   :  { %v2012_v46 = vsel %vm85_vm0, %v5459_v37, %v2000_v43  ;;  %v2014_v17 = vsel %vm448_vm8, %v1979_v4, %v2000_v43  ;;  %v2027_v26 = vsel %vm85_vm0, %v5460_v31, %v2009_v23  ;;  %v2029_v45 = vsel %vm448_vm8, %v1997_v14, %v2009_v23  ;;  %v3655_v4 = vld [vmem:[#allocation4 + $0x29c] sm:$0xf0]  ;;  %v3832_v23 = vld [vmem:[#allocation4 + $0x2a0] sm:$0xf0]  ;;  %v3441_v37 = vld [vmem:[#allocation4 + $0xd8] sm:$0xf] }
 0x356   :  { %v2013_v18 = vsel %vm448_vm8, %v4749_v59, %v2012_v46  ;;  %2044 = vst.msk [vmem:[#allocation4 + $0x290] sm:$0xf] %vm50_vm7, %v2014_v17  ;;  %v2028_v12 = vsel %vm448_vm8, %v4914_v7, %v2027_v26  ;;  %2813 = vmatpush.bf16.msrb.mxu3 %v3534_v35  ;;  %v3791_v22 = vld [vmem:[#allocation4 + $0x158] sm:$0xf0]  ;;  %v3538_v7 = vor.u32 %v3799_v54, %v3535_v29  ;;  %v3495_v47 = vld [vmem:[#allocation4 + $0x15c] sm:$0xf0] }
 0x357   :  { %2868 = vmatpush.bf16.msrb.mxu1 %v3578_v25  ;;  %2925 = vmatpush.bf16.msrb.mxu2 %v3582_v32  ;;  %2043 = vst [vmem:[#allocation4 + $0x288] sm:$0xff] %v2013_v18  ;;  %v3493_v59 = vld [vmem:[#allocation4 + $0x148] sm:$0xf]  ;;  %v3789_v34 = vld [vmem:[#allocation4 + $0x14c] sm:$0xf]  ;;  %vm3072_vm0 = vcmask 818176  }
 0x358   :  { %2052 = vst [vmem:[#allocation4 + $0x2c4] sm:$0xff] %v2028_v12  ;;  %2764 = vmatmul.bf16.gmra.mxu0 %v5163_v21  ;;  %v3494_v44 = vor.u32 %v3791_v22, %v3493_v59  ;;  %v3498_v40 = vor.u32 %v3789_v34, %v3495_v47  ;;  %v3787_v32 = vld [vmem:[#allocation4 + $0x138] sm:$0xf0]  ;;  %v3421_v17 = vld [vmem:[#allocation4 + $0xb0] sm:$0xf] }
 0x359   :  { %2053 = vst.msk [vmem:[#allocation4 + $0x2cc] sm:$0xf] %vm50_vm7, %v2029_v45  ;;  %v3482_v43 = vor.u32 %v3787_v32, %v3481_v16  ;;  %v3772_v31 = vld [vmem:[#allocation4 + $0xc0] sm:$0xf0]  ;;  %v3762_v12 = vld [vmem:[#allocation4 + $0x70] sm:$0xf0] }
 0x35a   :  { %2814 = vmatpush.bf16.msrb.mxu3 %v3514_v39  ;;  %2802 = vmatmul.bf16.gmra.mxu1 %v5194_v36  ;;  %v3422_v26 = vor.u32 %v3772_v31, %v3421_v17  ;;  %v3381_v45 = vld [vmem:[#allocation4 + $0x60] sm:$0xf]  ;;  %v3757_v29 = vld [vmem:[#allocation4 + $0x48] sm:$0xf0]  ;;  %v3341_v54 = vld [vmem:[#allocation4 + $0x10] sm:$0xf]  ;;  %v5304_v22 = vpop.permute.xlu1 %2971 }
 0x35b   :  { %2869 = vmatpush.bf16.msrb.mxu1 %v3558_v3  ;;  %2926 = vmatpush.bf16.msrb.mxu2 %v3562_v53  ;;  %v3777_v53 = vld [vmem:[#allocation4 + $0xe8] sm:$0xf0]  ;;  %v3767_v3 = vld [vmem:[#allocation4 + $0x98] sm:$0xf0]  ;;  %v3382_v11 = vor.u32 %v3762_v12, %v3381_v45  ;;  %v3362_v39 = vor.u32 %v3757_v29, %v3361_v13  ;;  %v3342_v59 = vor.u32 %v3752_v49, %v3341_v54 }
 0x35c   :  { %v3442_v46 = vor.u32 %v3777_v53, %v3441_v37  ;;  %v3402_v18 = vor.u32 %v3767_v3, %v3401_v62 }
 0x35d   :  { %v3661_v6 = vld [vmem:[#allocation4 + $0x290] sm:$0xf] }
 0x35e   :  { %2815 = vmatpush.bf16.msrb.mxu3 %v3494_v44  ;;  %v3653_v63 = vld [vmem:[#allocation4 + $0x288] sm:$0xf]  ;;  %v3829_v33 = vld [vmem:[#allocation4 + $0x28c] sm:$0xf]  ;;  %v3662_v35 = vor.u32 %v3832_v23, %v3661_v6 }
 0x35f   :  { %2870 = vmatpush.bf16.msrb.mxu1 %v3538_v7  ;;  %2927 = vmatpush.bf16.msrb.mxu2 %v3542_v27  ;;  %v3836_v1 = vld [vmem:[#allocation4 + $0x2c0] sm:$0xf0]  ;;  %v3675_v51 = vld [vmem:[#allocation4 + $0x2c4] sm:$0xf0]  ;;  %v3654_v14 = vor.u32 %v3831_v41, %v3653_v63  ;;  %v3658_v25 = vor.u32 %v3829_v33, %v3655_v4 }
 0x360   :  { %v3674_v56 = vor.u32 %v3836_v1, %v3673_v30  ;;  %v3678_v24 = vor.u32 %v3834_v0, %v3675_v51  ;;  %v3837_v58 = vld [vmem:[#allocation4 + $0x2c8] sm:$0xf0]  ;;  %2854 = vmatmul.bf16.vlgmr.msra.gmra.mxu2 %v5137_v55 }
 0x361   :  { %2816 = vmatmul.bf16.vlgmr.msrb.gmra.mxu3 %v5107_v2  ;;  %v3682_v19 = vor.u32 %v3837_v58, %v3681_v20 }
 0x362   :  { %2833 = vmatpush.bf16.msra.mxu0 %v3674_v56  ;;  %2890 = vmatpush.bf16.msra.mxu3 %v3678_v24  ;;  %v5310_v44 = vpop.permute.xlu1 %3010 }
 0x363   :  { %2871 = vmatpush.bf16.msrb.mxu1 %v3518_v42  ;;  %2928 = vmatpush.bf16.msrb.mxu2 %v3522_v38 }
 0x366   :  { %2834 = vmatpush.bf16.msra.mxu0 %v3654_v14  ;;  %2891 = vmatpush.bf16.msra.mxu3 %v3658_v25 }
 0x367   :  { %2872 = vmatpush.bf16.msrb.mxu1 %v3498_v40  ;;  %2929 = vmatpush.bf16.msrb.mxu2 %v3502_v5 }
 0x369   :  { %3687 = vmatmul.msk.bf16.vlgmr.msra.gmra.mxu0 %vm2668_vm14, %v5033_v15 }
 0x36a   :  { %2903 = vmatpush.bf16.msrb.mxu0 %v3482_v43  ;;  %2873 = vmatmul.bf16.vlgmr.msrb.gmra.mxu1 %v5107_v2  ;;  %v5334_v32 = vpop.permute.xlu1 %3025 }
 0x36b   :  { %2947 = vmatpush.bf16.msra.mxu1 %v3682_v19 }
 0x36e   :  { %2904 = vmatpush.bf16.msrb.mxu0 %v3462_v8 }
 0x36f   :  { %2948 = vmatpush.bf16.msra.mxu1 %v3662_v35 }
 0x370   :  { %2859 = vmatmul.bf16.gmra.mxu2 %v5194_v36 }
 0x371   :  { %2821 = vmatmul.bf16.gmra.mxu3 %v5163_v21 }
 0x372   :  { %2905 = vmatpush.bf16.msrb.mxu0 %v3442_v46 }
 0x376   :  { %2906 = vmatpush.bf16.msrb.mxu0 %v3422_v26 }
 0x379   :  { %3688 = vmatmul.msk.bf16.gmra.mxu0 %vm2668_vm14, %v5095_v61 }
 0x37a   :  { %2907 = vmatpush.bf16.msrb.mxu0 %v3402_v18  ;;  %2878 = vmatmul.bf16.gmra.mxu1 %v5163_v21 }
 0x37e   :  { %2908 = vmatpush.bf16.msrb.mxu0 %v3382_v11  ;;  %v2722_v7 = vpop.f32.mrf.mxu1 }
 0x380   :  { %2930 = vmatmul.bf16.vlgmr.msrb.gmra.mxu2 %v5107_v2 }
 0x381   :  { %3689 = vmatmul.msk.bf16.vlgmr.msra.gmra.mxu3 %vm2668_vm14, %v5033_v15 }
 0x382   :  { %2909 = vmatpush.bf16.msrb.mxu0 %v3362_v39 }
 0x386   :  { %2910 = vmatpush.bf16.msrb.mxu0 %v3342_v59 }
 0x389   :  { %2911 = vmatmul.bf16.vlgmr.msrb.gmra.mxu0 %v5137_v55  ;;  %v5306_v55 = vpop.permute.xlu0 %2966 }
 0x38a   :  { %3691 = vmatmul.msk.bf16.vlgmr.msra.gmra.mxu1 %vm2668_vm14, %v5033_v15  ;;  %v5308_v15 = vpop.permute.xlu2 %2976 }
 0x390   :  { %2935 = vmatmul.bf16.gmra.mxu2 %v5163_v21 }
 0x391   :  { %3690 = vmatmul.msk.bf16.gmra.mxu3 %vm2668_vm14, %v5095_v61  ;;  %v5317_v38 = vpop.permute.xlu0 %2981 }
 0x392   :  { %v5320_v28 = vpop.permute.xlu2 %3015 }
 0x399   :  { %2916 = vmatmul.bf16.gmra.mxu0 %v5194_v36  ;;  %v2724_v36 = vpop.f32.mrf.mxu1  ;;  %v5327_v33 = vpop.permute.xlu0 %3020 }
 0x39a   :  { %3692 = vmatmul.msk.bf16.gmra.mxu1 %vm2668_vm14, %v5095_v61 }
 0x3a1   :  { %v2727_v34 = vpop.f32.mrf.mxu1 }
 0x3a3   :  { %v2703_v2 = vpop.f32.mrf.mxu2 }
 0x3a5   :  { %v2684_v27 = vpop.f32.mrf.mxu0 }
 0x3a6   :  { %v2704_v9 = vadd.f32 %v2703_v2, %v2684_v27 }
 0x3a8   :  { %v2723_v50 = vadd.f32 %v2722_v7, %v2704_v9 }
 0x3a9   :  { %v2729_v4 = vpop.f32.mrf.mxu1 }
 0x3aa   :  { %v2984_v21 = vmul.f32 %v5306_v55, %v2723_v50 }
 0x3ab   :  { %v2705_v10 = vpop.f32.mrf.mxu2 }
 0x3ac   :  { %v3028_v48 = vadd.f32 %v5310_v44, %v2984_v21 }
 0x3ad   :  { %v2686_v61 = vpop.f32.mrf.mxu0 }
 0x3ae   :  { %v3048_v30 = vmax.f32 %v3028_v48, 0.0  ;;  %v2706_v0 = vadd.f32 %v2705_v10, %v2686_v61  ;;  %v2741_v41 = vpop.f32.mrf.mxu3 }
 0x3b0   :  { %3068 = vst [vmem:[%s5432_s8] sm:$0xff] %v3048_v30  ;;  %v2725_v42 = vadd.f32 %v2724_v36, %v2706_v0 }
 0x3b2   :  { %v2989_v47 = vmul.f32 %v5304_v22, %v2725_v42 }
 0x3b3   :  { %v2708_v52 = vpop.f32.mrf.mxu2 }
 0x3b4   :  { %v3033_v1 = vadd.f32 %v5320_v28, %v2989_v47 }
 0x3b5   :  { %v2689_v51 = vpop.f32.mrf.mxu0 }
 0x3b6   :  { %v3053_v56 = vmax.f32 %v3033_v1, 0.0  ;;  %v2709_v24 = vadd.f32 %v2708_v52, %v2689_v51  ;;  %v2743_v8 = vpop.f32.mrf.mxu3 }
 0x3b8   :  { %3074 = vst [vmem:[%s5432_s8 + $0x28] sm:$0xff] %v3053_v56  ;;  %v2728_v58 = vadd.f32 %v2727_v34, %v2709_v24 }
 0x3ba   :  { %v2994_v63 = vmul.f32 %v5308_v15, %v2728_v58 }
 0x3bb   :  { %v2710_v40 = vpop.f32.mrf.mxu2 }
 0x3bc   :  { %v3038_v5 = vadd.f32 %v5327_v33, %v2994_v63 }
 0x3bd   :  { %v2691_v20 = vpop.f32.mrf.mxu0 }
 0x3be   :  { %v3058_v16 = vmax.f32 %v3038_v5, 0.0  ;;  %v2711_v19 = vadd.f32 %v2710_v40, %v2691_v20  ;;  %v2746_v12 = vpop.f32.mrf.mxu3 }
 0x3c0   :  { %3079 = vst [vmem:[%s5432_s8 + $0x50] sm:$0xff] %v3058_v16  ;;  %v2730_v14 = vadd.f32 %v2729_v4, %v2711_v19 }
 0x3c2   :  { %v2999_v25 = vmul.f32 %v5317_v38, %v2730_v14 }
 0x3c3   :  { %v2779_v6 = vpop.f32.mrf.mxu2 }
 0x3c4   :  { %v3043_v43 = vadd.f32 %v5334_v32, %v2999_v25 }
 0x3c5   :  { %v2760_v60 = vpop.f32.mrf.mxu0 }
 0x3c6   :  { %v3063_v23 = vmax.f32 %v3043_v43, 0.0  ;;  %v2761_v57 = vadd.f32 %v2760_v60, %v2741_v41  ;;  %v2748_v2 = vpop.f32.mrf.mxu3 }
 0x3c7   :  { %v2798_v35 = vpop.f32.mrf.mxu1 }
 0x3c8   :  { %3084 = vst [vmem:[%s5432_s8 + $0x78] sm:$0xff] %v3063_v23  ;;  %v2780_v53 = vadd.f32 %v2779_v6, %v2761_v57 }
 0x3ca   :  { %v2985_v37 = vmul.f32 %v5306_v55, %v2780_v53 }
 0x3cb   :  { %v2781_v46 = vpop.f32.mrf.mxu2 }
 0x3cc   :  { %v3029_v17 = vadd.f32 %v5310_v44, %v2985_v37 }
 0x3cd   :  { %v2762_v31 = vpop.f32.mrf.mxu0 }
 0x3ce   :  { %v3049_v26 = vmax.f32 %v3029_v17, 0.0  ;;  %v2763_v3 = vadd.f32 %v2762_v31, %v2743_v8 }
 0x3cf   :  { %v2800_v62 = vpop.f32.mrf.mxu1 }
 0x3d0   :  { %3069 = vst [vmem:[%s5432_s8 + $0x8] sm:$0xff] %v3049_v26  ;;  %v2782_v18 = vadd.f32 %v2781_v46, %v2763_v3 }
 0x3d2   :  { %v2990_v45 = vmul.f32 %v5304_v22, %v2782_v18 }
 0x3d3   :  { %v2784_v11 = vpop.f32.mrf.mxu2 }
 0x3d4   :  { %v3034_v29 = vadd.f32 %v5320_v28, %v2990_v45 }
 0x3d5   :  { %v2765_v13 = vpop.f32.mrf.mxu0 }
 0x3d6   :  { %v3054_v39 = vmax.f32 %v3034_v29, 0.0  ;;  %v2766_v54 = vadd.f32 %v2765_v13, %v2746_v12 }
 0x3d7   :  { %v2803_v49 = vpop.f32.mrf.mxu1 }
 0x3d8   :  { %3075 = vst [vmem:[%s5432_s8 + $0x30] sm:$0xff] %v3054_v39  ;;  %v2785_v59 = vadd.f32 %v2784_v11, %v2766_v54 }
 0x3da   :  { %v2995_v7 = vmul.f32 %v5308_v15, %v2785_v59 }
 0x3db   :  { %v2786_v27 = vpop.f32.mrf.mxu2 }
 0x3dc   :  { %v3039_v9 = vadd.f32 %v5327_v33, %v2995_v7 }
 0x3dd   :  { %v2767_v50 = vpop.f32.mrf.mxu0 }
 0x3de   :  { %v3059_v21 = vmax.f32 %v3039_v9, 0.0  ;;  %v2768_v10 = vadd.f32 %v2767_v50, %v2748_v2 }
 0x3df   :  { %v2805_v36 = vpop.f32.mrf.mxu1 }
 0x3e0   :  { %3080 = vst [vmem:[%s5432_s8 + $0x58] sm:$0xff] %v3059_v21  ;;  %v2787_v48 = vadd.f32 %v2786_v27, %v2768_v10 }
 0x3e2   :  { %v3000_v61 = vmul.f32 %v5317_v38, %v2787_v48 }
 0x3e3   :  { %v2855_v0 = vpop.f32.mrf.mxu2 }
 0x3e4   :  { %v2817_v30 = vpop.f32.mrf.mxu3  ;;  %v3044_v42 = vadd.f32 %v5334_v32, %v3000_v61 }
 0x3e5   :  { %v2818_v47 = vadd.f32 %v2817_v30, %v2798_v35 }
 0x3e6   :  { %v2836_v52 = vpop.f32.mrf.mxu0  ;;  %v3064_v1 = vmax.f32 %v3044_v42, 0.0 }
 0x3e7   :  { %v2837_v51 = vadd.f32 %v2836_v52, %v2818_v47  ;;  %v2874_v34 = vpop.f32.mrf.mxu1 }
 0x3e8   :  { %3085 = vst [vmem:[%s5432_s8 + $0x80] sm:$0xff] %v3064_v1  ;;  %v2875_v18 = vadd.f32 %v2874_v34, %v2855_v0 }
 0x3e9   :  { %v2986_v56 = vmul.f32 %v5306_v55, %v2837_v51 }
 0x3eb   :  { %v3030_v24 = vadd.f32 %v5310_v44, %v2986_v56  ;;  %v2857_v63 = vpop.f32.mrf.mxu2 }
 0x3ec   :  { %v2819_v58 = vpop.f32.mrf.mxu3 }
 0x3ed   :  { %v3050_v40 = vmax.f32 %v3030_v24, 0.0  ;;  %v2820_v5 = vadd.f32 %v2819_v58, %v2800_v62 }
 0x3ee   :  { %v2838_v20 = vpop.f32.mrf.mxu0 }
 0x3ef   :  { %3070 = vst [vmem:[%s5432_s8 + $0x10] sm:$0xff] %v3050_v40  ;;  %v2839_v16 = vadd.f32 %v2838_v20, %v2820_v5  ;;  %v2876_v19 = vpop.f32.mrf.mxu1 }
 0x3f0   :  { %v2877_v27 = vadd.f32 %v2876_v19, %v2857_v63 }
 0x3f1   :  { %v2991_v41 = vmul.f32 %v5304_v22, %v2839_v16 }
 0x3f3   :  { %v3035_v4 = vadd.f32 %v5320_v28, %v2991_v41  ;;  %v2860_v25 = vpop.f32.mrf.mxu2 }
 0x3f4   :  { %v2822_v14 = vpop.f32.mrf.mxu3 }
 0x3f5   :  { %v3055_v6 = vmax.f32 %v3035_v4, 0.0  ;;  %v2823_v43 = vadd.f32 %v2822_v14, %v2803_v49 }
 0x3f6   :  { %v2841_v23 = vpop.f32.mrf.mxu0 }
 0x3f7   :  { %3076 = vst [vmem:[%s5432_s8 + $0x38] sm:$0xff] %v3055_v6  ;;  %v2842_v60 = vadd.f32 %v2841_v23, %v2823_v43  ;;  %v2879_v57 = vpop.f32.mrf.mxu1 }
 0x3f8   :  { %v2880_v1 = vadd.f32 %v2879_v57, %v2860_v25 }
 0x3f9   :  { %v2996_v35 = vmul.f32 %v5308_v15, %v2842_v60 }
 0x3fb   :  { %v3040_v8 = vadd.f32 %v5327_v33, %v2996_v35  ;;  %v2862_v37 = vpop.f32.mrf.mxu2 }
 0x3fc   :  { %v2824_v53 = vpop.f32.mrf.mxu3 }
 0x3fd   :  { %v3060_v46 = vmax.f32 %v3040_v8, 0.0  ;;  %v2825_v17 = vadd.f32 %v2824_v53, %v2805_v36 }
 0x3fe   :  { %v2843_v31 = vpop.f32.mrf.mxu0 }
 0x3ff   :  { %3081 = vst [vmem:[%s5432_s8 + $0x60] sm:$0xff] %v3060_v46  ;;  %v2844_v26 = vadd.f32 %v2843_v31, %v2825_v17  ;;  %v2881_v3 = vpop.f32.mrf.mxu1 }
 0x400   :  { %v2882_v41 = vadd.f32 %v2881_v3, %v2862_v37 }
 0x401   :  { %v3001_v62 = vmul.f32 %v5317_v38, %v2844_v26 }
 0x403   :  { %v3045_v12 = vadd.f32 %v5334_v32, %v3001_v62  ;;  %v2931_v11 = vpop.f32.mrf.mxu2 }
 0x404   :  { %v2893_v45 = vpop.f32.mrf.mxu3 }
 0x405   :  { %v3065_v29 = vmax.f32 %v3045_v12, 0.0  ;;  %v2894_v13 = vadd.f32 %v2893_v45, %v2875_v18 }
 0x406   :  { %v2912_v39 = vpop.f32.mrf.mxu0 }
 0x407   :  { %3086 = vst [vmem:[%s5432_s8 + $0x88] sm:$0xff] %v3065_v29  ;;  %v2987_v54 = vmul.f32 %v5306_v55, %v2894_v13  ;;  %v2932_v49 = vadd.f32 %v2931_v11, %v2912_v39  ;;  %v2950_v59 = vpop.f32.mrf.mxu1 }
 0x409   :  { %v3031_v7 = vadd.f32 %v5310_v44, %v2987_v54  ;;  %v2951_v2 = vadd.f32 %v2950_v59, %v2932_v49 }
 0x40b   :  { %v3051_v9 = vmax.f32 %v3031_v7, 0.0  ;;  %v2988_v50 = vmul.f32 %v5306_v55, %v2951_v2  ;;  %v2933_v10 = vpop.f32.mrf.mxu2 }
 0x40c   :  { %v2895_v21 = vpop.f32.mrf.mxu3 }
 0x40d   :  { %3071 = vst [vmem:[%s5432_s8 + $0x18] sm:$0xff] %v3051_v9  ;;  %v3032_v36 = vadd.f32 %v5310_v44, %v2988_v50  ;;  %v2896_v48 = vadd.f32 %v2895_v21, %v2877_v27 }
 0x40e   :  { %v2914_v61 = vpop.f32.mrf.mxu0 }
 0x40f   :  { %v3052_v30 = vmax.f32 %v3032_v36, 0.0  ;;  %v2992_v0 = vmul.f32 %v5304_v22, %v2896_v48  ;;  %v2934_v42 = vadd.f32 %v2933_v10, %v2914_v61  ;;  %v2952_v47 = vpop.f32.mrf.mxu1 }
 0x411   :  { %3073 = vst.msk [vmem:[%s5432_s8 + $0x20] sm:$0xff] %vm3072_vm0, %v3052_v30  ;;  %v3036_v55 = vadd.f32 %v5320_v28, %v2992_v0  ;;  %v2953_v52 = vadd.f32 %v2952_v47, %v2934_v42 }
 0x413   :  { %v3056_v51 = vmax.f32 %v3036_v55, 0.0  ;;  %v2993_v44 = vmul.f32 %v5304_v22, %v2953_v52  ;;  %v2936_v56 = vpop.f32.mrf.mxu2 }
 0x414   :  { %v2898_v34 = vpop.f32.mrf.mxu3 }
 0x415   :  { %3077 = vst [vmem:[%s5432_s8 + $0x40] sm:$0xff] %v3056_v51  ;;  %v3037_v24 = vadd.f32 %v5320_v28, %v2993_v44  ;;  %v2899_v58 = vadd.f32 %v2898_v34, %v2880_v1 }
 0x416   :  { %v2917_v63 = vpop.f32.mrf.mxu0 }
 0x417   :  { %v3057_v40 = vmax.f32 %v3037_v24, 0.0  ;;  %v2997_v5 = vmul.f32 %v5308_v15, %v2899_v58  ;;  %v2937_v20 = vadd.f32 %v2936_v56, %v2917_v63  ;;  %v2955_v16 = vpop.f32.mrf.mxu1 }
 0x419   :  { %3078 = vst.msk [vmem:[%s5432_s8 + $0x48] sm:$0xff] %vm3072_vm0, %v3057_v40  ;;  %v3041_v22 = vadd.f32 %v5327_v33, %v2997_v5  ;;  %v2956_v19 = vadd.f32 %v2955_v16, %v2937_v20 }
 0x41b   :  { %v3061_v4 = vmax.f32 %v3041_v22, 0.0  ;;  %v2998_v14 = vmul.f32 %v5308_v15, %v2956_v19  ;;  %v2938_v23 = vpop.f32.mrf.mxu2 }
 0x41c   :  { %v2900_v28 = vpop.f32.mrf.mxu3 }
 0x41d   :  { %3082 = vst [vmem:[%s5432_s8 + $0x68] sm:$0xff] %v3061_v4  ;;  %v3042_v25 = vadd.f32 %v5327_v33, %v2998_v14  ;;  %v2901_v6 = vadd.f32 %v2900_v28, %v2882_v41 }
 0x41e   :  { %v2919_v43 = vpop.f32.mrf.mxu0 }
 0x41f   :  { %v3062_v60 = vmax.f32 %v3042_v25, 0.0  ;;  %v3002_v57 = vmul.f32 %v5317_v38, %v2901_v6  ;;  %v2939_v35 = vadd.f32 %v2938_v23, %v2919_v43  ;;  %v2957_v8 = vpop.f32.mrf.mxu1 }
 0x421   :  { %3083 = vst.msk [vmem:[%s5432_s8 + $0x70] sm:$0xff] %vm3072_vm0, %v3062_v60  ;;  %v3046_v15 = vadd.f32 %v5334_v32, %v3002_v57  ;;  %v2958_v53 = vadd.f32 %v2957_v8, %v2939_v35 }
 0x423   :  { %v3066_v37 = vmax.f32 %v3046_v15, 0.0  ;;  %v3003_v46 = vmul.f32 %v5317_v38, %v2958_v53 }
 0x425   :  { %3087 = vst [vmem:[%s5432_s8 + $0x90] sm:$0xff] %v3066_v37  ;;  %v3047_v33 = vadd.f32 %v5334_v32, %v3003_v46 }
 0x427   :  { %v3067_v17 = vmax.f32 %v3047_v33, 0.0 }
 0x429   :  { %3088 = vst.msk [vmem:[%s5432_s8 + $0x98] sm:$0xff] %vm3072_vm0, %v3067_v17 }

</bundles_post_ra>
